<compile_context>
chip_gen: v6e
topology: v6e:2x2x1
jax: 0.10.0
libtpu: 0.0.40
codegen_flags: <defaults>
</compile_context>

<pallas_src>
import math
from functools import partial

import jax
import jax.numpy as jnp
from jax.experimental import pallas as pl
from jax.experimental.pallas import tpu as pltpu

BN_EPS = 1e-5


def _round_up(x, m):
    return (x + m - 1) // m * m


# ----------------------------------------------------------------------------
# Fused matmul + per-channel scale/shift (bias & BN) + optional ReLU
# ----------------------------------------------------------------------------
def _mm_fused_single_kernel(a_ref, b_ref, ss_ref, o_ref, *, relu):
    # Single K step: no accumulator scratch needed.
    out = jnp.dot(a_ref[...], b_ref[...], preferred_element_type=jnp.float32)
    out = out * ss_ref[0:1, :] + ss_ref[1:2, :]
    if relu:
        out = jnp.maximum(out, 0.0)
    o_ref[...] = out.astype(o_ref.dtype)


def _mm_fused_acc_kernel(a_ref, b_ref, ss_ref, o_ref, acc_ref, *, relu):
    @pl.when(pl.program_id(2) == 0)
    def _():
        acc_ref[...] = jnp.zeros_like(acc_ref)

    acc_ref[...] += jnp.dot(a_ref[...], b_ref[...],
                            preferred_element_type=jnp.float32)

    @pl.when(pl.program_id(2) == pl.num_programs(2) - 1)
    def _():
        out = acc_ref[...] * ss_ref[0:1, :] + ss_ref[1:2, :]
        if relu:
            out = jnp.maximum(out, 0.0)
        o_ref[...] = out.astype(o_ref.dtype)


def matmul_fused(a, b, scale, shift, relu):
    """out = relu((A @ B) * scale[N] + shift[N]).  bf16 MXU, fp32 accumulate."""
    M, K = a.shape
    K2, N = b.shape
    assert K == K2

    # ---- padded, lane-dense geometry ------------------------------------
    N_pad = _round_up(N, 128)
    K_pad = _round_up(K, 128)
    if M >= 1024:
        tm = 512
    elif M >= 256:
        tm = 256
    else:
        tm = _round_up(M, 8)
    M_pad = _round_up(M, tm)
    tn = 512 if N_pad % 512 == 0 else (256 if N_pad % 256 == 0 else 128)
    tk = min(K_pad, 2048)
    while K_pad % tk:          # K_pad is a 128-multiple -> always terminates
        tk -= 128

    # ---- zero-pad + cast operands (exactness preserved) ------------------
    a_p = jnp.pad(a.astype(jnp.bfloat16), ((0, M_pad - M), (0, K_pad - K)))
    b_p = jnp.pad(b.astype(jnp.bfloat16), ((0, K_pad - K), (0, N_pad - N)))
    ss = jnp.stack([scale, shift]).astype(jnp.float32)            # (2, N)
    ss_p = jnp.pad(ss, ((0, 0), (0, N_pad - N)))

    k_steps = K_pad // tk

    if k_steps == 1:
        # Fast path: single-shot K, scratch-free, 2-D fully parallel grid.
        out = pl.pallas_call(
            partial(_mm_fused_single_kernel, relu=relu),
            out_shape=jax.ShapeDtypeStruct((M_pad, N_pad), jnp.float32),
            grid_spec=pltpu.PrefetchScalarGridSpec(
                num_scalar_prefetch=0,
                grid=(M_pad // tm, N_pad // tn),
                in_specs=[
                    pl.BlockSpec((tm, K_pad), lambda i, j: (i, 0)),
                    pl.BlockSpec((K_pad, tn), lambda i, j: (0, j)),
                    pl.BlockSpec((2, tn), lambda i, j: (0, j)),
                ],
                out_specs=pl.BlockSpec((tm, tn), lambda i, j: (i, j)),
            ),
            compiler_params=pltpu.CompilerParams(
                dimension_semantics=("parallel", "parallel")),
        )(a_p, b_p, ss_p)
    else:
        out = pl.pallas_call(
            partial(_mm_fused_acc_kernel, relu=relu),
            out_shape=jax.ShapeDtypeStruct((M_pad, N_pad), jnp.float32),
            grid_spec=pltpu.PrefetchScalarGridSpec(
                num_scalar_prefetch=0,
                grid=(M_pad // tm, N_pad // tn, k_steps),
                in_specs=[
                    pl.BlockSpec((tm, tk), lambda i, j, k: (i, k)),
                    pl.BlockSpec((tk, tn), lambda i, j, k: (k, j)),
                    pl.BlockSpec((2, tn), lambda i, j, k: (0, j)),
                ],
                out_specs=pl.BlockSpec((tm, tn), lambda i, j, k: (i, j)),
                scratch_shapes=[pltpu.VMEM((tm, tn), jnp.float32)],
            ),
            compiler_params=pltpu.CompilerParams(
                dimension_semantics=("parallel", "parallel", "arbitrary")),
        )(a_p, b_p, ss_p)
    return out[:M, :N]


# ----------------------------------------------------------------------------
# Fused FC head: fc1 -> ReLU -> fc2 -> ReLU -> (dropout=id) -> fc3, ONE kernel
# ----------------------------------------------------------------------------
def _fc_head_kernel(x_ref, w1_ref, b1_ref, w2_ref, b2_ref, w3_ref, b3_ref,
                    o_ref):
    h1 = jnp.dot(x_ref[...], w1_ref[...], preferred_element_type=jnp.float32)
    h1 = jnp.maximum(h1 + b1_ref[...], 0.0)
    h2 = jnp.dot(h1.astype(jnp.bfloat16), w2_ref[...],
                 preferred_element_type=jnp.float32)
    h2 = jnp.maximum(h2 + b2_ref[...], 0.0)
    # TODO(synk): F.dropout is identity here (inference mode).
    o_ref[...] = (jnp.dot(h2, w3_ref[...],
                          preferred_element_type=jnp.float32) + b3_ref[...])


def fc_head(x, w1, b1, w2, b2, w3, b3):
    """relu(x@w1+b1) -> relu(.@w2+b2) -> .@w3+b3, fused in one Pallas call."""
    M, K = x.shape
    H1 = w1.shape[1]
    H2 = w2.shape[1]
    NO = w3.shape[1]

    M_pad = _round_up(M, 8)
    K_pad = _round_up(K, 128)
    H1_pad = _round_up(H1, 128)
    H2_pad = _round_up(H2, 128)
    NO_pad = _round_up(NO, 128)

    x_p = jnp.pad(x.astype(jnp.bfloat16), ((0, M_pad - M), (0, K_pad - K)))
    w1_p = jnp.pad(w1.astype(jnp.bfloat16),
                   ((0, K_pad - K), (0, H1_pad - H1)))
    b1_p = jnp.pad(b1.astype(jnp.float32)[None, :], ((0, 0), (0, H1_pad - H1)))
    w2_p = jnp.pad(w2.astype(jnp.bfloat16),
                   ((0, H1_pad - H1), (0, H2_pad - H2)))
    b2_p = jnp.pad(b2.astype(jnp.float32)[None, :], ((0, 0), (0, H2_pad - H2)))
    w3_p = jnp.pad(w3.astype(jnp.float32),
                   ((0, H2_pad - H2), (0, NO_pad - NO)))
    b3_p = jnp.pad(b3.astype(jnp.float32)[None, :], ((0, 0), (0, NO_pad - NO)))

    out = pl.pallas_call(
        _fc_head_kernel,
        out_shape=jax.ShapeDtypeStruct((M_pad, NO_pad), jnp.float32),
        grid_spec=pltpu.PrefetchScalarGridSpec(
            num_scalar_prefetch=0,
            grid=(1,),
            in_specs=[
                pl.BlockSpec((M_pad, K_pad), lambda i: (0, 0)),
                pl.BlockSpec((K_pad, H1_pad), lambda i: (0, 0)),
                pl.BlockSpec((1, H1_pad), lambda i: (0, 0)),
                pl.BlockSpec((H1_pad, H2_pad), lambda i: (0, 0)),
                pl.BlockSpec((1, H2_pad), lambda i: (0, 0)),
                pl.BlockSpec((H2_pad, NO_pad), lambda i: (0, 0)),
                pl.BlockSpec((1, NO_pad), lambda i: (0, 0)),
            ],
            out_specs=pl.BlockSpec((M_pad, NO_pad), lambda i: (0, 0)),
        ),
        compiler_params=pltpu.CompilerParams(
            dimension_semantics=("arbitrary",)),
    )(x_p, w1_p, b1_p, w2_p, b2_p, w3_p, b3_p)
    return out[:M, :NO]


# ----------------------------------------------------------------------------
# Conv3d (no padding, strided) via bf16 im2col + fused Pallas matmul epilogue
# ----------------------------------------------------------------------------
def conv3d_bn_relu(x, w, scale, shift, stride):
    """x: (N,D,H,W,Cin); w: (kd,kh,kw,Cin,Cout); padding 0, stride `stride`.
    Conv bias + BatchNorm affine are pre-folded into (scale, shift)."""
    x = x.astype(jnp.bfloat16)                    # halve im2col HBM bytes
    Nb, D, H, W, Cin = x.shape
    kd, kh, kw, _, Cout = w.shape
    sd, sh, sw = stride
    Do = (D - kd) // sd + 1
    Ho = (H - kh) // sh + 1
    Wo = (W - kw) // sw + 1
    taps = []
    for a in range(kd):
        for b_ in range(kh):
            for c in range(kw):
                taps.append(x[:,
                              a:a + (Do - 1) * sd + 1:sd,
                              b_:b_ + (Ho - 1) * sh + 1:sh,
                              c:c + (Wo - 1) * sw + 1:sw, :])
    # (N,Do,Ho,Wo,KK,Cin) -> (M, KK*Cin); matches w.reshape(KK*Cin, Cout) order
    A = jnp.stack(taps, axis=4).reshape(Nb * Do * Ho * Wo, kd * kh * kw * Cin)
    B = w.reshape(kd * kh * kw * Cin, Cout)
    out = matmul_fused(A, B, scale, shift, relu=True)
    return out.reshape(Nb, Do, Ho, Wo, Cout)


def _bn_fold(gamma, beta, mean, var, conv_bias):
    scale = gamma / jnp.sqrt(var + BN_EPS)
    shift = scale * (conv_bias - mean) + beta
    return scale, shift


# ----------------------------------------------------------------------------
# CNN3D model
# ----------------------------------------------------------------------------
def conv3d_output_size(img_size, padding, kernel_size, stride):
    return tuple(int(math.floor((img_size[i] + 2 * padding[i]
                                 - kernel_size[i]) / stride[i] + 1))
                 for i in range(3))


def init_params(key, t_dim, img_x, img_y,
                fc_hidden1=256, fc_hidden2=128, ch1=32, ch2=48):
    c1 = conv3d_output_size((t_dim, img_x, img_y), (0, 0, 0), (5, 5, 5), (2, 2, 2))
    c2 = conv3d_output_size(c1, (0, 0, 0), (3, 3, 3), (2, 2, 2))
    fc1_in = ch2 * c2[0] * c2[1] * c2[2]

    keys = jax.random.split(key, 5)

    def conv_init(k, shape):                       # (kd,kh,kw,Cin,Cout)
        fan_in = shape[0] * shape[1] * shape[2] * shape[3]
        bound = 1.0 / math.sqrt(fan_in)
        return jax.random.uniform(k, shape, jnp.float32, -bound, bound)

    def fc_init(k, fin, fout):
        bound = 1.0 / math.sqrt(fin)
        return jax.random.uniform(k, (fin, fout), jnp.float32, -bound, bound)

    p = {}
    p["conv1_w"] = conv_init(keys[0], (5, 5, 5, 3, ch1)).astype(jnp.bfloat16)
    p["conv1_b"] = jnp.zeros((ch1,), jnp.float32)
    p["bn1_gamma"] = jnp.ones((ch1,), jnp.float32)
    p["bn1_beta"] = jnp.zeros((ch1,), jnp.float32)
    p["bn1_mean"] = jnp.zeros((ch1,), jnp.float32)
    p["bn1_var"] = jnp.ones((ch1,), jnp.float32)

    p["conv2_w"] = conv_init(keys[1], (3, 3, 3, ch1, ch2)).astype(jnp.bfloat16)
    p["conv2_b"] = jnp.zeros((ch2,), jnp.float32)
    p["bn2_gamma"] = jnp.ones((ch2,), jnp.float32)
    p["bn2_beta"] = jnp.zeros((ch2,), jnp.float32)
    p["bn2_mean"] = jnp.zeros((ch2,), jnp.float32)
    p["bn2_var"] = jnp.ones((ch2,), jnp.float32)

    p["fc1_w"] = fc_init(keys[2], fc1_in, fc_hidden1).astype(jnp.bfloat16)
    p["fc1_b"] = jnp.zeros((fc_hidden1,), jnp.float32)
    p["fc2_w"] = fc_init(keys[3], fc_hidden1, fc_hidden2).astype(jnp.bfloat16)
    p["fc2_b"] = jnp.zeros((fc_hidden2,), jnp.float32)
    p["fc3_w"] = fc_init(keys[4], fc_hidden2, 1)
    p["fc3_b"] = jnp.zeros((1,), jnp.float32)
    return p


@jax.jit
def cnn3d_forward(x_ncdhw, params):
    # torch NCDHW -> NDHWC (channels on the 128-lane axis)
    h = jnp.transpose(x_ncdhw, (0, 2, 3, 4, 1)).astype(jnp.float32)

    # conv1 -> bn1 -> relu   (Dropout3d: identity in inference)
    s1, sh1 = _bn_fold(params["bn1_gamma"], params["bn1_beta"],
                       params["bn1_mean"], params["bn1_var"], params["conv1_b"])
    h = conv3d_bn_relu(h, params["conv1_w"], s1, sh1, stride=(2, 2, 2))
    # TODO(synk): Dropout3d / F.dropout implemented as identity (inference mode);
    # training-mode RNG dropout not replicated.

    # conv2 -> bn2 -> relu
    s2, sh2 = _bn_fold(params["bn2_gamma"], params["bn2_beta"],
                       params["bn2_mean"], params["bn2_var"], params["conv2_b"])
    h = conv3d_bn_relu(h, params["conv2_w"], s2, sh2, stride=(2, 2, 2))
    # TODO(synk): BatchNorm uses inference running stats folded into the matmul
    # epilogue; training-mode batch statistics not replicated.

    # flatten in torch NCDHW order: (N, C, D, H, W) -> (N, C*D*H*W)
    h = jnp.transpose(h, (0, 4, 1, 2, 3)).reshape(h.shape[0], -1)

    # fc1 -> ReLU -> fc2 -> ReLU -> (dropout=id) -> fc3, ONE fused Pallas kernel
    out = fc_head(h,
                  params["fc1_w"], params["fc1_b"],
                  params["fc2_w"], params["fc2_b"],
                  params["fc3_w"], params["fc3_b"])
    return out


if __name__ == "__main__":
    t_dim, img_x, img_y = 16, 32, 32
    batch = 2

    key = jax.random.PRNGKey(0)
    kx, kp = jax.random.split(key)
    x = jax.random.normal(kx, (batch, 3, t_dim, img_x, img_y), jnp.float32)
    params = init_params(kp, t_dim, img_x, img_y)

    out = cnn3d_forward(x, params)
    out = jax.block_until_ready(out)
    assert out.shape == (batch, 1), out.shape
    assert bool(jnp.all(jnp.isfinite(out)))
    print("KERNEL_OK")
</pallas_src>

<mosaic_0001>
module attributes {stable_mosaic.version = 11 : i64} {
  func.func @_mm_fused_single_kernel(%arg0: i32, %arg1: i32, %arg2: memref<512x384xbf16, #tpu.memory_space<vmem>>, %arg3: memref<384x128xbf16, #tpu.memory_space<vmem>>, %arg4: memref<2x128xf32, #tpu.memory_space<vmem>>, %arg5: memref<512x128xf32, #tpu.memory_space<vmem>>) attributes {dimension_semantics = [#tpu.dimension_semantics<parallel>, #tpu.dimension_semantics<parallel>], iteration_bounds = array<i64: 5, 1>, scalar_prefetch = 0 : i64, scratch_operands = 0 : i64, tpu.core_type = #tpu.core_type<tc>, window_params = [{transform_indices = @transform_0, window_bounds = array<i64: 512, 384>}, {transform_indices = @transform_1, window_bounds = array<i64: 384, 128>}, {transform_indices = @transform_2, window_bounds = array<i64: 2, 128>}, {transform_indices = @transform_3, window_bounds = array<i64: 512, 128>}]} {
    %c0 = arith.constant 0 : index
    %c0_0 = arith.constant 0 : index
    %0 = vector.load %arg2[%c0, %c0_0] : memref<512x384xbf16, #tpu.memory_space<vmem>>, vector<512x384xbf16>
    %c0_1 = arith.constant 0 : index
    %c0_2 = arith.constant 0 : index
    %1 = vector.load %arg3[%c0_1, %c0_2] : memref<384x128xbf16, #tpu.memory_space<vmem>>, vector<384x128xbf16>
    %cst = arith.constant dense<0.000000e+00> : vector<512x128xf32>
    %2 = tpu.matmul %0, %1, %cst {dimension_numbers = #tpu.dot_dimension_numbers<[1], [0], [0], [1], [0, 0, 1, 1], [], []>} : vector<512x384xbf16>, vector<384x128xbf16>, vector<512x128xf32> -> vector<512x128xf32>
    %c0_3 = arith.constant 0 : index
    %c0_4 = arith.constant 0 : index
    %3 = vector.load %arg4[%c0_3, %c0_4] : memref<2x128xf32, #tpu.memory_space<vmem>>, vector<1x128xf32>
    %4 = vector.broadcast %3 : vector<1x128xf32> to vector<512x128xf32>
    %5 = arith.mulf %2, %4 : vector<512x128xf32>
    %c1 = arith.constant 1 : index
    %c0_5 = arith.constant 0 : index
    %6 = vector.load %arg4[%c1, %c0_5] : memref<2x128xf32, #tpu.memory_space<vmem>>, vector<1x128xf32>
    %7 = vector.broadcast %6 : vector<1x128xf32> to vector<512x128xf32>
    %8 = arith.addf %5, %7 : vector<512x128xf32>
    %cst_6 = arith.constant 0.000000e+00 : f32
    %9 = vector.broadcast %cst_6 : f32 to vector<512x128xf32>
    %10 = arith.maximumf %8, %9 : vector<512x128xf32>
    %c0_7 = arith.constant 0 : index
    %c0_8 = arith.constant 0 : index
    %11 = vector.load %arg5[%c0_7, %c0_8] : memref<512x128xf32, #tpu.memory_space<vmem>>, vector<512x128xf32>
    tpu.vector_store %arg5[%c0_7, %c0_8], %10 {strides = array<i32>} : memref<512x128xf32, #tpu.memory_space<vmem>>, vector<512x128xf32>,
    return
  }
  func.func @transform_0(%arg0: i32, %arg1: i32) -> (i32, i32) {
    %c0_i32 = arith.constant 0 : i32
    %c0_i32_0 = arith.constant 0 : i32
    return %arg0, %c0_i32 : i32, i32
  }
  func.func @transform_1(%arg0: i32, %arg1: i32) -> (i32, i32) {
    %c0_i32 = arith.constant 0 : i32
    %c0_i32_0 = arith.constant 0 : i32
    return %c0_i32, %arg1 : i32, i32
  }
  func.func @transform_2(%arg0: i32, %arg1: i32) -> (i32, i32) {
    %c0_i32 = arith.constant 0 : i32
    %c0_i32_0 = arith.constant 0 : i32
    return %c0_i32, %arg1 : i32, i32
  }
  func.func @transform_3(%arg0: i32, %arg1: i32) -> (i32, i32) {
    %c0_i32 = arith.constant 0 : i32
    return %arg0, %arg1 : i32, i32
  }
}

module attributes {stable_mosaic.version = 11 : i64} {
  func.func @_mm_fused_single_kernel(%arg0: i32, %arg1: i32, %arg2: memref<144x896xbf16, #tpu.memory_space<vmem>>, %arg3: memref<896x128xbf16, #tpu.memory_space<vmem>>, %arg4: memref<2x128xf32, #tpu.memory_space<vmem>>, %arg5: memref<144x128xf32, #tpu.memory_space<vmem>>) attributes {dimension_semantics = [#tpu.dimension_semantics<parallel>, #tpu.dimension_semantics<parallel>], iteration_bounds = array<i64: 1, 1>, scalar_prefetch = 0 : i64, scratch_operands = 0 : i64, tpu.core_type = #tpu.core_type<tc>, window_params = [{transform_indices = @transform_0, window_bounds = array<i64: 144, 896>}, {transform_indices = @transform_1, window_bounds = array<i64: 896, 128>}, {transform_indices = @transform_2, window_bounds = array<i64: 2, 128>}, {transform_indices = @transform_3, window_bounds = array<i64: 144, 128>}]} {
    %c0 = arith.constant 0 : index
    %c0_0 = arith.constant 0 : index
    %0 = vector.load %arg2[%c0, %c0_0] : memref<144x896xbf16, #tpu.memory_space<vmem>>, vector<144x896xbf16>
    %c0_1 = arith.constant 0 : index
    %c0_2 = arith.constant 0 : index
    %1 = vector.load %arg3[%c0_1, %c0_2] : memref<896x128xbf16, #tpu.memory_space<vmem>>, vector<896x128xbf16>
    %cst = arith.constant dense<0.000000e+00> : vector<144x128xf32>
    %2 = tpu.matmul %0, %1, %cst {dimension_numbers = #tpu.dot_dimension_numbers<[1], [0], [0], [1], [0, 0, 1, 1], [], []>} : vector<144x896xbf16>, vector<896x128xbf16>, vector<144x128xf32> -> vector<144x128xf32>
    %c0_3 = arith.constant 0 : index
    %c0_4 = arith.constant 0 : index
    %3 = vector.load %arg4[%c0_3, %c0_4] : memref<2x128xf32, #tpu.memory_space<vmem>>, vector<1x128xf32>
    %4 = vector.broadcast %3 : vector<1x128xf32> to vector<144x128xf32>
    %5 = arith.mulf %2, %4 : vector<144x128xf32>
    %c1 = arith.constant 1 : index
    %c0_5 = arith.constant 0 : index
    %6 = vector.load %arg4[%c1, %c0_5] : memref<2x128xf32, #tpu.memory_space<vmem>>, vector<1x128xf32>
    %7 = vector.broadcast %6 : vector<1x128xf32> to vector<144x128xf32>
    %8 = arith.addf %5, %7 : vector<144x128xf32>
    %cst_6 = arith.constant 0.000000e+00 : f32
    %9 = vector.broadcast %cst_6 : f32 to vector<144x128xf32>
    %10 = arith.maximumf %8, %9 : vector<144x128xf32>
    %c0_7 = arith.constant 0 : index
    %c0_8 = arith.constant 0 : index
    %11 = vector.load %arg5[%c0_7, %c0_8] : memref<144x128xf32, #tpu.memory_space<vmem>>, vector<144x128xf32>
    tpu.vector_store %arg5[%c0_7, %c0_8], %10 {strides = array<i32>} : memref<144x128xf32, #tpu.memory_space<vmem>>, vector<144x128xf32>,
    return
  }
  func.func @transform_0(%arg0: i32, %arg1: i32) -> (i32, i32) {
    %c0_i32 = arith.constant 0 : i32
    %c0_i32_0 = arith.constant 0 : i32
    return %arg0, %c0_i32 : i32, i32
  }
  func.func @transform_1(%arg0: i32, %arg1: i32) -> (i32, i32) {
    %c0_i32 = arith.constant 0 : i32
    %c0_i32_0 = arith.constant 0 : i32
    return %c0_i32, %arg1 : i32, i32
  }
  func.func @transform_2(%arg0: i32, %arg1: i32) -> (i32, i32) {
    %c0_i32 = arith.constant 0 : i32
    %c0_i32_0 = arith.constant 0 : i32
    return %c0_i32, %arg1 : i32, i32
  }
  func.func @transform_3(%arg0: i32, %arg1: i32) -> (i32, i32) {
    %c0_i32 = arith.constant 0 : i32
    return %arg0, %arg1 : i32, i32
  }
}

module attributes {stable_mosaic.version = 11 : i64} {
  func.func @_fc_head_kernel(%arg0: i32, %arg1: memref<8x3456xbf16, #tpu.memory_space<vmem>>, %arg2: memref<3456x256xbf16, #tpu.memory_space<vmem>>, %arg3: memref<1x256xf32, #tpu.memory_space<vmem>>, %arg4: memref<256x128xbf16, #tpu.memory_space<vmem>>, %arg5: memref<1x128xf32, #tpu.memory_space<vmem>>, %arg6: memref<128x128xf32, #tpu.memory_space<vmem>>, %arg7: memref<1x128xf32, #tpu.memory_space<vmem>>, %arg8: memref<8x128xf32, #tpu.memory_space<vmem>>) attributes {dimension_semantics = [#tpu.dimension_semantics<arbitrary>], iteration_bounds = array<i64: 1>, scalar_prefetch = 0 : i64, scratch_operands = 0 : i64, tpu.core_type = #tpu.core_type<tc>, window_params = [{pipeline_mode = #tpu.pipeline_mode<synchronous>, transform_indices = @transform_0, window_bounds = array<i64: 8, 3456>}, {pipeline_mode = #tpu.pipeline_mode<synchronous>, transform_indices = @transform_1, window_bounds = array<i64: 3456, 256>}, {pipeline_mode = #tpu.pipeline_mode<synchronous>, transform_indices = @transform_2, window_bounds = array<i64: 1, 256>}, {pipeline_mode = #tpu.pipeline_mode<synchronous>, transform_indices = @transform_3, window_bounds = array<i64: 256, 128>}, {pipeline_mode = #tpu.pipeline_mode<synchronous>, transform_indices = @transform_4, window_bounds = array<i64: 1, 128>}, {pipeline_mode = #tpu.pipeline_mode<synchronous>, transform_indices = @transform_5, window_bounds = array<i64: 128, 128>}, {pipeline_mode = #tpu.pipeline_mode<synchronous>, transform_indices = @transform_6, window_bounds = array<i64: 1, 128>}, {pipeline_mode = #tpu.pipeline_mode<synchronous>, transform_indices = @transform_7, window_bounds = array<i64: 8, 128>}]} {
    %c0 = arith.constant 0 : index
    %c0_0 = arith.constant 0 : index
    %0 = vector.load %arg1[%c0, %c0_0] : memref<8x3456xbf16, #tpu.memory_space<vmem>>, vector<8x3456xbf16>
    %c0_1 = arith.constant 0 : index
    %c0_2 = arith.constant 0 : index
    %1 = vector.load %arg2[%c0_1, %c0_2] : memref<3456x256xbf16, #tpu.memory_space<vmem>>, vector<3456x256xbf16>
    %cst = arith.constant dense<0.000000e+00> : vector<8x256xf32>
    %2 = tpu.matmul %0, %1, %cst {dimension_numbers = #tpu.dot_dimension_numbers<[1], [0], [0], [1], [0, 0, 1, 1], [], []>} : vector<8x3456xbf16>, vector<3456x256xbf16>, vector<8x256xf32> -> vector<8x256xf32>
    %c0_3 = arith.constant 0 : index
    %c0_4 = arith.constant 0 : index
    %3 = vector.load %arg3[%c0_3, %c0_4] : memref<1x256xf32, #tpu.memory_space<vmem>>, vector<1x256xf32>
    %4 = vector.broadcast %3 : vector<1x256xf32> to vector<8x256xf32>
    %5 = arith.addf %2, %4 : vector<8x256xf32>
    %cst_5 = arith.constant 0.000000e+00 : f32
    %6 = vector.broadcast %cst_5 : f32 to vector<8x256xf32>
    %7 = arith.maximumf %5, %6 : vector<8x256xf32>
    %8 = arith.truncf %7 : vector<8x256xf32> to vector<8x256xbf16>
    %c0_6 = arith.constant 0 : index
    %c0_7 = arith.constant 0 : index
    %9 = vector.load %arg4[%c0_6, %c0_7] : memref<256x128xbf16, #tpu.memory_space<vmem>>, vector<256x128xbf16>
    %cst_8 = arith.constant dense<0.000000e+00> : vector<8x128xf32>
    %10 = tpu.matmul %8, %9, %cst_8 {dimension_numbers = #tpu.dot_dimension_numbers<[1], [0], [0], [1], [0, 0, 1, 1], [], []>} : vector<8x256xbf16>, vector<256x128xbf16>, vector<8x128xf32> -> vector<8x128xf32>
    %c0_9 = arith.constant 0 : index
    %c0_10 = arith.constant 0 : index
    %11 = vector.load %arg5[%c0_9, %c0_10] : memref<1x128xf32, #tpu.memory_space<vmem>>, vector<1x128xf32>
    %12 = vector.broadcast %11 : vector<1x128xf32> to vector<8x128xf32>
    %13 = arith.addf %10, %12 : vector<8x128xf32>
    %cst_11 = arith.constant 0.000000e+00 : f32
    %14 = vector.broadcast %cst_11 : f32 to vector<8x128xf32>
    %15 = arith.maximumf %13, %14 : vector<8x128xf32>
    %c0_12 = arith.constant 0 : index
    %c0_13 = arith.constant 0 : index
    %16 = vector.load %arg6[%c0_12, %c0_13] : memref<128x128xf32, #tpu.memory_space<vmem>>, vector<128x128xf32>
    %cst_14 = arith.constant dense<0.000000e+00> : vector<8x128xf32>
    %17 = tpu.matmul %15, %16, %cst_14 {dimension_numbers = #tpu.dot_dimension_numbers<[1], [0], [0], [1], [0, 0, 1, 1], [], []>} : vector<8x128xf32>, vector<128x128xf32>, vector<8x128xf32> -> vector<8x128xf32>
    %c0_15 = arith.constant 0 : index
    %c0_16 = arith.constant 0 : index
    %18 = vector.load %arg7[%c0_15, %c0_16] : memref<1x128xf32, #tpu.memory_space<vmem>>, vector<1x128xf32>
    %19 = vector.broadcast %18 : vector<1x128xf32> to vector<8x128xf32>
    %20 = arith.addf %17, %19 : vector<8x128xf32>
    %c0_17 = arith.constant 0 : index
    %c0_18 = arith.constant 0 : index
    %21 = vector.load %arg8[%c0_17, %c0_18] : memref<8x128xf32, #tpu.memory_space<vmem>>, vector<8x128xf32>
    tpu.vector_store %arg8[%c0_17, %c0_18], %20 {strides = array<i32>} : memref<8x128xf32, #tpu.memory_space<vmem>>, vector<8x128xf32>,
    return
  }
  func.func @transform_0(%arg0: i32) -> (i32, i32) {
    %c0_i32 = arith.constant 0 : i32
    %c0_i32_0 = arith.constant 0 : i32
    %c0_i32_1 = arith.constant 0 : i32
    return %c0_i32, %c0_i32_0 : i32, i32
  }
  func.func @transform_1(%arg0: i32) -> (i32, i32) {
    %c0_i32 = arith.constant 0 : i32
    %c0_i32_0 = arith.constant 0 : i32
    %c0_i32_1 = arith.constant 0 : i32
    return %c0_i32, %c0_i32_0 : i32, i32
  }
  func.func @transform_2(%arg0: i32) -> (i32, i32) {
    %c0_i32 = arith.constant 0 : i32
    %c0_i32_0 = arith.constant 0 : i32
    %c0_i32_1 = arith.constant 0 : i32
    return %c0_i32, %c0_i32_0 : i32, i32
  }
  func.func @transform_3(%arg0: i32) -> (i32, i32) {
    %c0_i32 = arith.constant 0 : i32
    %c0_i32_0 = arith.constant 0 : i32
    %c0_i32_1 = arith.constant 0 : i32
    return %c0_i32, %c0_i32_0 : i32, i32
  }
  func.func @transform_4(%arg0: i32) -> (i32, i32) {
    %c0_i32 = arith.constant 0 : i32
    %c0_i32_0 = arith.constant 0 : i32
    %c0_i32_1 = arith.constant 0 : i32
    return %c0_i32, %c0_i32_0 : i32, i32
  }
  func.func @transform_5(%arg0: i32) -> (i32, i32) {
    %c0_i32 = arith.constant 0 : i32
    %c0_i32_0 = arith.constant 0 : i32
    %c0_i32_1 = arith.constant 0 : i32
    return %c0_i32, %c0_i32_0 : i32, i32
  }
  func.func @transform_6(%arg0: i32) -> (i32, i32) {
    %c0_i32 = arith.constant 0 : i32
    %c0_i32_0 = arith.constant 0 : i32
    %c0_i32_1 = arith.constant 0 : i32
    return %c0_i32, %c0_i32_0 : i32, i32
  }
  func.func @transform_7(%arg0: i32) -> (i32, i32) {
    %c0_i32 = arith.constant 0 : i32
    %c0_i32_0 = arith.constant 0 : i32
    %c0_i32_1 = arith.constant 0 : i32
    return %c0_i32, %c0_i32_0 : i32, i32
  }
}

</mosaic_0001>

<bundles_post_ra>
// kernel: cnn3d_forward.3
= control target key start
LH: loop header
LB: loop body
LE: loop exit
PB: predicated region body
PF: predicated region fallthrough
CT: control target
= control target key end

     0   :  { %s2523_s12 = smov 0   ;;  %s2525_s13 = smov 0   ;;  %s3101_s0 = inlined_call_operand.vmem [shape: bf16[2560,384], index: 0, kind: input, shape index: {}]   ;;  %s3102_s1 = inlined_call_operand.vmem [shape: bf16[384,128], index: 1, kind: input, shape index: {}]   ;;  %s3103_s2 = inlined_call_operand.vmem [shape: f32[2,128], index: 2, kind: input, shape index: {}]   ;;  %s3104_s3 = inlined_call_operand.vmem [shape: f32[2560,128], index: 3, kind: output, shape index: {}]  }
   0x1   :  { %s2527_s14 = smov 0  }
   0x2 LB: > { %s25_s15 = sadd.s32 1, %s2496_s13  ;;  %p2019_p0 = scmp.ge.s32.totalorder %s2500_s14, 1  ;;  %s2500_s14 = sphi %s2527_s14, %s13_s14   ;;  %s2496_s13 = sphi %s2525_s13, %s3106_s13   ;;  %s2492_s12 = sphi %s2523_s12, %s3105_s12  }
   0x3   : > { %p27_p1 = scmp.ge.s32.totalorder %s25_s15, 5  ;;  %p171_p2 = scmp.lt.s32.totalorder %s2500_s14, 6 }
   0x5   : > { %s3108_s15 = smov (%p27_p1, %s25_s15), 0  ;;  %p172_p3 = pnand %p2019_p0, %p171_p2 }
   0x6   : > { %s2020_s18 = sshll.u32 (!%p172_p3), %s2492_s12, 6 }
   0x7   : > { %175 = sbr.rel (%p172_p3) target bundleno = 470 (0x1d6), region = 32  ;;  %p208_p4 = scmp.lt.s32.totalorder (!%p172_p3), %s2020_s18, 319 }
   0xc   : > { %v2326_v0 = vld [vmem:[%s3102_s1 + $0x38] sm:$0xff]   ;;  %v2502_v1 = vmov 0   ;;  %v2327_v2 = vld [vmem:[%s3102_s1 + $0x30] sm:$0xff]   ;;  %v2328_v3 = vld [vmem:[%s3102_s1 + $0x28] sm:$0xff]   ;;  %s3110_s18 = smov (!%p208_p4, %s2020_s18), 319 }
   0xd   : > { %1064 = vmatprep.subr.bf16.mxu0 %v2502_v1  ;;  %2268 = vmatprep.subr.bf16.mxu1 %v2502_v1  ;;  %v2329_v4 = vld [vmem:[%s3102_s1 + $0x20] sm:$0xff]   ;;  %s2300_s25 = smul.u32 12, %s3110_s18  ;;  %v2330_v5 = vld [vmem:[%s3102_s1 + $0x18] sm:$0xff]   ;;  %v2331_v7 = vld [vmem:[%s3102_s1 + $0x10] sm:$0xff]   ;;  %s2023_s27 = sshll.u32 %s3110_s18, 3 }
   0xe   : > { %1065 = vmatpush1.bf16.msra.mxu0 %v2326_v0  ;;  %2284 = vmatpush1.bf16.msra.mxu1 %v2326_v0  ;;  %v2332_v9 = vld [vmem:[%s3102_s1 + $0x8] sm:$0xff]   ;;  %v2333_v10 = vld [vmem:[%s3102_s1] sm:$0xff]   ;;  %v2334_v11 = vld [vmem:[%s3102_s1 + $0x78] sm:$0xff]   ;;  %s2834_s4 = scalar_lea.vmem %s3104_s3, %s2023_s27 }
   0xf   : > { %1066 = vmatprep.subr.bf16.mxu0 %v2502_v1  ;;  %2269 = vmatprep.subr.bf16.mxu1 %v2502_v1  ;;  %s2570_s30 = scalar_lea.vmem %s3101_s0, %s2300_s25  ;;  %v2335_v12 = vld [vmem:[%s3102_s1 + $0x70] sm:$0xff]   ;;  %v2336_v13 = vld [vmem:[%s3102_s1 + $0x68] sm:$0xff]   ;;  %v2337_v14 = vld [vmem:[%s3102_s1 + $0x60] sm:$0xff]  }
  0x10   : > { %v2344_v6 = vld [vmem:[%s2570_s30 + $0x4] ss:$12 sps:$4 sm:$0xff]   ;;  %v2338_v15 = vld [vmem:[%s3102_s1 + $0x58] sm:$0xff]   ;;  %v2340_v17 = vld [vmem:[%s3102_s1 + $0x48] sm:$0xff]  }
  0x11   : > { %v2347_v8 = vld [vmem:[%s2570_s30 + $0x244] ss:$12 sps:$4 sm:$0xff]   ;;  %1096 = vmatprep.mubr.bf16.mxu0 %v2344_v6  ;;  %v2348_v19 = vld [vmem:[%s3102_s1 + $0xb8] sm:$0xff]   ;;  %v2342_v20 = vld [vmem:[%s2570_s30] ss:$12 sps:$4 sm:$0xff]  }
  0x12   : > { %1067 = vmatpush1.bf16.msra.mxu0 %v2327_v2  ;;  %2285 = vmatpush1.bf16.msra.mxu1 %v2327_v2  ;;  %v2339_v16 = vld [vmem:[%s3102_s1 + $0x50] sm:$0xff]   ;;  %v2341_v18 = vld [vmem:[%s3102_s1 + $0x40] sm:$0xff]   ;;  %v2349_v22 = vld [vmem:[%s2570_s30 + $0x1c] ss:$12 sps:$4 sm:$0xff]  }
  0x13   : > { %1068 = vmatprep.subr.bf16.mxu0 %v2502_v1  ;;  %2270 = vmatprep.subr.bf16.mxu1 %v2502_v1  ;;  %v2345_v21 = vld [vmem:[%s2570_s30 + $0x240] ss:$12 sps:$4 sm:$0xff]   ;;  %v2351_v23 = vld [vmem:[%s2570_s30 + $0x25c] ss:$12 sps:$4 sm:$0xff]   ;;  %v2355_v24 = vld [vmem:[%s3102_s1 + $0xb0] sm:$0xff]  }
  0x14   : > { %1288 = vmatprep.mubr.bf16.mxu1 %v2347_v8  ;;  %v2362_v25 = vld [vmem:[%s3102_s1 + $0xa8] sm:$0xff]   ;;  %v2353_v26 = vld [vmem:[%s2570_s30 + $0x18] ss:$12 sps:$4 sm:$0xff]   ;;  %v2356_v28 = vld [vmem:[%s2570_s30 + $0x34] ss:$12 sps:$4 sm:$0xff]  }
  0x15   : > { %v2354_v27 = vld [vmem:[%s2570_s30 + $0x258] ss:$12 sps:$4 sm:$0xff]   ;;  %v2358_v29 = vld [vmem:[%s2570_s30 + $0x274] ss:$12 sps:$4 sm:$0xff]   ;;  %v2360_v31 = vld [vmem:[%s2570_s30 + $0x30] ss:$12 sps:$4 sm:$0xff]  }
  0x16   : > { %1069 = vmatpush1.bf16.msra.mxu0 %v2328_v3  ;;  %2286 = vmatpush1.bf16.msra.mxu1 %v2328_v3  ;;  %v2369_v30 = vld [vmem:[%s3102_s1 + $0xa0] sm:$0xff]   ;;  %v2376_v32 = vld [vmem:[%s3102_s1 + $0x98] sm:$0xff]   ;;  %v2383_v36 = vld [vmem:[%s3102_s1 + $0x90] sm:$0xff]  }
  0x17   : > { %1070 = vmatprep.subr.bf16.mxu0 %v2502_v1  ;;  %2271 = vmatprep.subr.bf16.mxu1 %v2502_v1  ;;  %v2361_v33 = vld [vmem:[%s2570_s30 + $0x270] ss:$12 sps:$4 sm:$0xff]   ;;  %v2363_v34 = vld [vmem:[%s2570_s30 + $0x4c] ss:$12 sps:$4 sm:$0xff]   ;;  %v2367_v37 = vld [vmem:[%s2570_s30 + $0x48] ss:$12 sps:$4 sm:$0xff]  }
  0x18   : > { %v2365_v35 = vld [vmem:[%s2570_s30 + $0x28c] ss:$12 sps:$4 sm:$0xff]   ;;  %v2368_v38 = vld [vmem:[%s2570_s30 + $0x288] ss:$12 sps:$4 sm:$0xff]   ;;  %v2370_v39 = vld [vmem:[%s2570_s30 + $0x64] ss:$12 sps:$4 sm:$0xff]  }
  0x19   : > { %v2372_v40 = vld [vmem:[%s2570_s30 + $0x2a4] ss:$12 sps:$4 sm:$0xff]   ;;  %v2390_v41 = vld [vmem:[%s3102_s1 + $0x88] sm:$0xff]   ;;  %v2384_v49 = vld [vmem:[%s2570_s30 + $0x94] ss:$12 sps:$4 sm:$0xff]  }
  0x1a   : > { %1071 = vmatpush1.bf16.msra.mxu0 %v2329_v4  ;;  %2287 = vmatpush1.bf16.msra.mxu1 %v2329_v4  ;;  %v2397_v42 = vld [vmem:[%s3102_s1 + $0x80] sm:$0xff]   ;;  %v2377_v45 = vld [vmem:[%s2570_s30 + $0x7c] ss:$12 sps:$4 sm:$0xff]   ;;  %v2391_v53 = vld [vmem:[%s2570_s30 + $0xac] ss:$12 sps:$4 sm:$0xff]  }
  0x1b   : > { %1072 = vmatprep.subr.bf16.mxu0 %v2502_v1  ;;  %2272 = vmatprep.subr.bf16.mxu1 %v2502_v1  ;;  %v2374_v43 = vld [vmem:[%s2570_s30 + $0x60] ss:$12 sps:$4 sm:$0xff]   ;;  %v2379_v46 = vld [vmem:[%s2570_s30 + $0x2bc] ss:$12 sps:$4 sm:$0xff]   ;;  %v2381_v47 = vld [vmem:[%s2570_s30 + $0x78] ss:$12 sps:$4 sm:$0xff]  }
  0x1c   : > { %v2375_v44 = vld [vmem:[%s2570_s30 + $0x2a0] ss:$12 sps:$4 sm:$0xff]   ;;  %v2382_v48 = vld [vmem:[%s2570_s30 + $0x2b8] ss:$12 sps:$4 sm:$0xff]   ;;  %v2388_v51 = vld [vmem:[%s2570_s30 + $0x90] ss:$12 sps:$4 sm:$0xff]  }
  0x1d   : > { %v2386_v50 = vld [vmem:[%s2570_s30 + $0x2d4] ss:$12 sps:$4 sm:$0xff]   ;;  %v2389_v52 = vld [vmem:[%s2570_s30 + $0x2d0] ss:$12 sps:$4 sm:$0xff]   ;;  %v2393_v54 = vld [vmem:[%s2570_s30 + $0x2ec] ss:$12 sps:$4 sm:$0xff]  }
  0x1e   : > { %1073 = vmatpush1.bf16.msra.mxu0 %v2330_v5  ;;  %2288 = vmatpush1.bf16.msra.mxu1 %v2330_v5  ;;  %v2395_v55 = vld [vmem:[%s2570_s30 + $0xa8] ss:$12 sps:$4 sm:$0xff]   ;;  %v2398_v57 = vld [vmem:[%s2570_s30 + $0xc4] ss:$12 sps:$4 sm:$0xff]   ;;  %v2401_v59 = vld [vmem:[%s2570_s30 + $0xc0] ss:$12 sps:$4 sm:$0xff]  }
  0x1f   : > { %1074 = vmatprep.subr.bf16.mxu0 %v2502_v1  ;;  %2273 = vmatprep.subr.bf16.mxu1 %v2502_v1  ;;  %v2396_v56 = vld [vmem:[%s2570_s30 + $0x2e8] ss:$12 sps:$4 sm:$0xff]   ;;  %v2402_v60 = vld [vmem:[%s2570_s30 + $0x20] ss:$12 sps:$4 sm:$0xff]   ;;  %v2405_v62 = vld [vmem:[%s2570_s30 + $0x38] ss:$12 sps:$4 sm:$0xff]  }
  0x20   : > { %v2400_v58 = vld [vmem:[%s2570_s30 + $0x8] ss:$12 sps:$4 sm:$0xff]   ;;  %v2406_v63 = vld [vmem:[%s2570_s30 + $0xd8] ss:$12 sps:$4 sm:$0xff]   ;;  %v2407_v0 = vld [vmem:[%s2570_s30 + $0x50] ss:$12 sps:$4 sm:$0xff]  }
  0x21   : > { %v2403_v61 = vld [vmem:[%s2570_s30 + $0xdc] ss:$12 sps:$4 sm:$0xff]   ;;  %v2412_v4 = vld [vmem:[%s2570_s30 + $0x80] ss:$12 sps:$4 sm:$0xff]   ;;  %v2415_v6 = vld [vmem:[%s2570_s30 + $0x98] ss:$12 sps:$4 sm:$0xff]  }
  0x22   : > { %1075 = vmatpush1.bf16.msra.mxu0 %v2331_v7  ;;  %2289 = vmatpush1.bf16.msra.mxu1 %v2331_v7  ;;  %v2410_v2 = vld [vmem:[%s2570_s30 + $0x68] ss:$12 sps:$4 sm:$0xff]   ;;  %v2411_v3 = vld [vmem:[%s2570_s30 + $0xf0] ss:$12 sps:$4 sm:$0xff]   ;;  %v2413_v5 = vld [vmem:[%s2570_s30 + $0x10c] ss:$12 sps:$4 sm:$0xff]  }
  0x23   : > { %1076 = vmatprep.subr.bf16.mxu0 %v2502_v1  ;;  %2274 = vmatprep.subr.bf16.mxu1 %v2502_v1  ;;  %v2416_v7 = vld [vmem:[%s2570_s30 + $0x108] ss:$12 sps:$4 sm:$0xff]   ;;  %v2417_v8 = vld [vmem:[%s2570_s30 + $0xb0] ss:$12 sps:$4 sm:$0xff]  }
  0x26   : > { %1077 = vmatpush1.bf16.msra.mxu0 %v2332_v9  ;;  %2290 = vmatpush1.bf16.msra.mxu1 %v2332_v9  ;;  %v2418_v9 = vld [vmem:[%s2570_s30 + $0x124] ss:$12 sps:$4 sm:$0xff]  }
  0x27   : > { %1078 = vmatprep.subr.bf16.mxu0 %v2502_v1  ;;  %2275 = vmatprep.subr.bf16.mxu1 %v2502_v1 }
  0x2a   : > { %1079 = vmatpush1.bf16.msra.mxu0 %v2333_v10  ;;  %2291 = vmatpush1.bf16.msra.mxu1 %v2333_v10  ;;  %v2420_v10 = vld [vmem:[%s2570_s30 + $0xc8] ss:$12 sps:$4 sm:$0xff]  }
  0x2b   : > { %1080 = vmatprep.subr.bf16.mxu0 %v2502_v1  ;;  %2276 = vmatprep.subr.bf16.mxu1 %v2502_v1 }
  0x2e   : > { %1081 = vmatpush2.bf16.msra.mxu0 %v2334_v11  ;;  %2292 = vmatpush2.bf16.msra.mxu1 %v2334_v11  ;;  %v2421_v11 = vld [vmem:[%s2570_s30 + $0x120] ss:$12 sps:$4 sm:$0xff]  }
  0x2f   : > { %1082 = vmatprep.subr.bf16.mxu0 %v2502_v1  ;;  %2277 = vmatprep.subr.bf16.mxu1 %v2502_v1 }
  0x32   : > { %1083 = vmatpush2.bf16.msra.mxu0 %v2335_v12  ;;  %2293 = vmatpush2.bf16.msra.mxu1 %v2335_v12  ;;  %v2422_v12 = vld [vmem:[%s2570_s30 + $0xe0] ss:$12 sps:$4 sm:$0xff]  }
  0x33   : > { %1084 = vmatprep.subr.bf16.mxu0 %v2502_v1  ;;  %2278 = vmatprep.subr.bf16.mxu1 %v2502_v1 }
  0x36   : > { %1085 = vmatpush2.bf16.msra.mxu0 %v2336_v13  ;;  %2294 = vmatpush2.bf16.msra.mxu1 %v2336_v13  ;;  %v2423_v13 = vld [vmem:[%s2570_s30 + $0x13c] ss:$12 sps:$4 sm:$0xff]  }
  0x37   : > { %1086 = vmatprep.subr.bf16.mxu0 %v2502_v1  ;;  %2279 = vmatprep.subr.bf16.mxu1 %v2502_v1 }
  0x3a   : > { %1087 = vmatpush2.bf16.msra.mxu0 %v2337_v14  ;;  %2295 = vmatpush2.bf16.msra.mxu1 %v2337_v14  ;;  %v2425_v14 = vld [vmem:[%s2570_s30 + $0xf8] ss:$12 sps:$4 sm:$0xff]  }
  0x3b   : > { %1088 = vmatprep.subr.bf16.mxu0 %v2502_v1  ;;  %2280 = vmatprep.subr.bf16.mxu1 %v2502_v1 }
  0x3e   : > { %1089 = vmatpush2.bf16.msra.mxu0 %v2338_v15  ;;  %2296 = vmatpush2.bf16.msra.mxu1 %v2338_v15  ;;  %v2426_v15 = vld [vmem:[%s2570_s30 + $0x138] ss:$12 sps:$4 sm:$0xff]  }
  0x3f   : > { %1090 = vmatprep.subr.bf16.mxu0 %v2502_v1  ;;  %2281 = vmatprep.subr.bf16.mxu1 %v2502_v1 }
  0x42   : > { %1091 = vmatpush2.bf16.msra.mxu0 %v2339_v16  ;;  %2297 = vmatpush2.bf16.msra.mxu1 %v2339_v16  ;;  %v2427_v16 = vld [vmem:[%s2570_s30 + $0x110] ss:$12 sps:$4 sm:$0xff]  }
  0x43   : > { %1092 = vmatprep.subr.bf16.mxu0 %v2502_v1  ;;  %2282 = vmatprep.subr.bf16.mxu1 %v2502_v1 }
  0x46   : > { %1093 = vmatpush2.bf16.msra.mxu0 %v2340_v17  ;;  %2298 = vmatpush2.bf16.msra.mxu1 %v2340_v17  ;;  %v2428_v17 = vld [vmem:[%s2570_s30 + $0x154] ss:$12 sps:$4 sm:$0xff]  }
  0x47   : > { %1094 = vmatprep.subr.bf16.mxu0 %v2502_v1  ;;  %2283 = vmatprep.subr.bf16.mxu1 %v2502_v1  ;;  %v2408_v1 = vld [vmem:[%s2570_s30 + $0xf4] ss:$12 sps:$4 sm:$0xff]  }
  0x4a   : > { %1095 = vmatpush2.bf16.msra.mxu0 %v2341_v18  ;;  %2299 = vmatpush2.bf16.msra.mxu1 %v2341_v18  ;;  %v2430_v18 = vld [vmem:[%s2570_s30 + $0x128] ss:$12 sps:$4 sm:$0xff]  }
  0x4b   : > { %2188 = vmatprep.subr.bf16.mxu1 %v2348_v19 }
  0x4d   : > { %1097 = vmatmul.mubr.bf16.vlgmr.msra.gmra.mxu0 %v2342_v20  ;;  %1289 = vmatmul.mubr.bf16.vlgmr.msra.gmra.mxu1 %v2345_v21  ;;  %v2432_v20 = vld [vmem:[%s2570_s30 + $0x140] ss:$12 sps:$4 sm:$0xff]  }
  0x4e   : > { %2189 = vmatpush3.bf16.msra.mxu1 %v2348_v19  ;;  %1104 = vmatprep.mubr.bf16.mxu0 %v2349_v22  ;;  %v2431_v19 = vld [vmem:[%s2570_s30 + $0x150] ss:$12 sps:$4 sm:$0xff]   ;;  %v2433_v21 = vld [vmem:[%s2570_s30 + $0x16c] ss:$12 sps:$4 sm:$0xff]  }
  0x4f   : > { %1296 = vmatprep.mubr.bf16.mxu1 %v2351_v23  ;;  %2190 = vmatprep.subr.bf16.mxu1 %v2355_v24  ;;  %v2435_v22 = vld [vmem:[%s2570_s30 + $0x158] ss:$12 sps:$4 sm:$0xff]   ;;  %v2436_v23 = vld [vmem:[%s2570_s30 + $0x168] ss:$12 sps:$4 sm:$0xff]  }
  0x52   : > { %2191 = vmatpush3.bf16.msra.mxu1 %v2355_v24  ;;  %v2437_v24 = vld [vmem:[%s2570_s30 + $0x170] ss:$12 sps:$4 sm:$0xff]  }
  0x53   : > { %2192 = vmatprep.subr.bf16.mxu1 %v2362_v25 }
  0x55   : > { %1105 = vmatmul.mubr.bf16.gmra.mxu0 %v2353_v26  ;;  %1297 = vmatmul.mubr.bf16.gmra.mxu1 %v2354_v27  ;;  %v2440_v26 = vld [vmem:[%s2570_s30 + $0x188] ss:$12 sps:$4 sm:$0xff]   ;;  %v2441_v27 = vld [vmem:[%s2570_s30 + $0x180] ss:$12 sps:$4 sm:$0xff]  }
  0x56   : > { %1112 = vmatprep.mubr.bf16.mxu0 %v2356_v28  ;;  %1304 = vmatprep.mubr.bf16.mxu1 %v2358_v29  ;;  %v2442_v28 = vld [vmem:[%s2570_s30 + $0x1a0] ss:$12 sps:$4 sm:$0xff]   ;;  %v2443_v29 = vld [vmem:[%s2570_s30 + $0x19c] ss:$12 sps:$4 sm:$0xff]  }
  0x57   : > { %2193 = vmatpush3.bf16.msra.mxu1 %v2362_v25  ;;  %v2438_v25 = vld [vmem:[%s2570_s30 + $0x184] ss:$12 sps:$4 sm:$0xff]  }
  0x58   : > { %2194 = vmatprep.subr.bf16.mxu1 %v2369_v30 }
  0x5b   : > { %2195 = vmatpush3.bf16.msra.mxu1 %v2369_v30  ;;  %v2445_v30 = vld [vmem:[%s2570_s30 + $0x1b8] ss:$12 sps:$4 sm:$0xff]  }
  0x5c   : > { %2196 = vmatprep.subr.bf16.mxu1 %v2376_v32 }
  0x5d   : > { %1113 = vmatmul.mubr.bf16.gmra.mxu0 %v2360_v31  ;;  %1305 = vmatmul.mubr.bf16.gmra.mxu1 %v2361_v33  ;;  %v2446_v31 = vld [vmem:[%s2570_s30 + $0x198] ss:$12 sps:$4 sm:$0xff]   ;;  %v2448_v33 = vld [vmem:[%s2570_s30 + $0x1b4] ss:$12 sps:$4 sm:$0xff]  }
  0x5e   : > { %1120 = vmatprep.mubr.bf16.mxu0 %v2363_v34  ;;  %1312 = vmatprep.mubr.bf16.mxu1 %v2365_v35  ;;  %v2450_v34 = vld [vmem:[%s2570_s30 + $0x1e8] ss:$12 sps:$4 sm:$0xff]   ;;  %v2451_v35 = vld [vmem:[%s2570_s30 + $0x1b0] ss:$12 sps:$4 sm:$0xff]  }
  0x5f   : > { %2197 = vmatpush3.bf16.msra.mxu1 %v2376_v32  ;;  %v2447_v32 = vld [vmem:[%s2570_s30 + $0x1d0] ss:$12 sps:$4 sm:$0xff]  }
  0x60   : > { %2198 = vmatprep.subr.bf16.mxu1 %v2383_v36 }
  0x63   : > { %2199 = vmatpush3.bf16.msra.mxu1 %v2383_v36  ;;  %v2452_v36 = vld [vmem:[%s2570_s30 + $0x200] ss:$12 sps:$4 sm:$0xff]  }
  0x64   : > { %2200 = vmatprep.subr.bf16.mxu1 %v2390_v41 }
  0x65   : > { %1121 = vmatmul.mubr.bf16.gmra.mxu0 %v2367_v37  ;;  %1313 = vmatmul.mubr.bf16.gmra.mxu1 %v2368_v38  ;;  %v2453_v37 = vld [vmem:[%s2570_s30 + $0x1cc] ss:$12 sps:$4 sm:$0xff]  }
  0x66   : > { %1128 = vmatprep.mubr.bf16.mxu0 %v2370_v39  ;;  %1320 = vmatprep.mubr.bf16.mxu1 %v2372_v40  ;;  %v2455_v38 = vld [vmem:[%s2570_s30 + $0x218] ss:$12 sps:$4 sm:$0xff]   ;;  %v2456_v39 = vld [vmem:[%s2570_s30 + $0x1c8] ss:$12 sps:$4 sm:$0xff]   ;;  %v2457_v40 = vld [vmem:[%s2570_s30 + $0x230] ss:$12 sps:$4 sm:$0xff]  }
  0x67   : > { %2201 = vmatpush3.bf16.msra.mxu1 %v2390_v41  ;;  %v2458_v41 = vld [vmem:[%s2570_s30 + $0x1e4] ss:$12 sps:$4 sm:$0xff]  }
  0x68   : > { %2202 = vmatprep.subr.bf16.mxu1 %v2397_v42 }
  0x6b   : > { %2203 = vmatpush3.bf16.msra.mxu1 %v2397_v42  ;;  %v2460_v42 = vld [vmem:[%s2570_s30 + $0x248] ss:$12 sps:$4 sm:$0xff]  }
  0x6d   : > { %1129 = vmatmul.mubr.bf16.gmra.mxu0 %v2374_v43  ;;  %1321 = vmatmul.mubr.bf16.gmra.mxu1 %v2375_v44  ;;  %v2461_v43 = vld [vmem:[%s2570_s30 + $0x1e0] ss:$12 sps:$4 sm:$0xff]  }
  0x6e   : > { %1136 = vmatprep.mubr.bf16.mxu0 %v2377_v45  ;;  %1328 = vmatprep.mubr.bf16.mxu1 %v2379_v46  ;;  %v2462_v44 = vld [vmem:[%s2570_s30 + $0x260] ss:$12 sps:$4 sm:$0xff]   ;;  %v2463_v45 = vld [vmem:[%s2570_s30 + $0x1fc] ss:$12 sps:$4 sm:$0xff]   ;;  %v2465_v46 = vld [vmem:[%s2570_s30 + $0x278] ss:$12 sps:$4 sm:$0xff]  }
  0x75   : > { %1137 = vmatmul.mubr.bf16.gmra.mxu0 %v2381_v47  ;;  %1329 = vmatmul.mubr.bf16.gmra.mxu1 %v2382_v48  ;;  %v2466_v47 = vld [vmem:[%s2570_s30 + $0x1f8] ss:$12 sps:$4 sm:$0xff]   ;;  %v2467_v48 = vld [vmem:[%s2570_s30 + $0x290] ss:$12 sps:$4 sm:$0xff]  }
  0x76   : > { %1144 = vmatprep.mubr.bf16.mxu0 %v2384_v49  ;;  %1336 = vmatprep.mubr.bf16.mxu1 %v2386_v50  ;;  %v2468_v49 = vld [vmem:[%s2570_s30 + $0x214] ss:$12 sps:$4 sm:$0xff]  }
  0x77   : > { %v2470_v50 = vld [vmem:[%s2570_s30 + $0x2a8] ss:$12 sps:$4 sm:$0xff]  }
  0x7d   : > { %1145 = vmatmul.mubr.bf16.gmra.mxu0 %v2388_v51  ;;  %1337 = vmatmul.mubr.bf16.gmra.mxu1 %v2389_v52  ;;  %v2471_v51 = vld [vmem:[%s2570_s30 + $0x210] ss:$12 sps:$4 sm:$0xff]   ;;  %v2472_v52 = vld [vmem:[%s2570_s30 + $0x2c0] ss:$12 sps:$4 sm:$0xff]  }
  0x7e   : > { %1152 = vmatprep.mubr.bf16.mxu0 %v2391_v53  ;;  %1344 = vmatprep.mubr.bf16.mxu1 %v2393_v54  ;;  %v2473_v53 = vld [vmem:[%s2570_s30 + $0x22c] ss:$12 sps:$4 sm:$0xff]  }
  0x7f   : > { %v2475_v54 = vld [vmem:[%s2570_s30 + $0x2d8] ss:$12 sps:$4 sm:$0xff]  }
  0x85   : > { %1153 = vmatmul.mubr.bf16.gmra.mxu0 %v2395_v55  ;;  %1345 = vmatmul.mubr.bf16.gmra.mxu1 %v2396_v56  ;;  %v2476_v55 = vld [vmem:[%s2570_s30 + $0x228] ss:$12 sps:$4 sm:$0xff]   ;;  %v2477_v56 = vld [vmem:[%s2570_s30 + $0x2f0] ss:$12 sps:$4 sm:$0xff]  }
  0x86   : > { %1160 = vmatprep.mubr.bf16.mxu0 %v2398_v57  ;;  %2204 = vmatprep.mubr.bf16.mxu1 %v2400_v58 }
  0x8d   : > { %1161 = vmatmul.mubr.bf16.gmra.mxu0 %v2401_v59  ;;  %2205 = vmatmul.mubr.bf16.vlgmr.msra.gmra.mxu1 %v2402_v60 }
  0x8e   : > { %1168 = vmatprep.mubr.bf16.mxu0 %v2403_v61  ;;  %2208 = vmatprep.mubr.bf16.mxu1 %v2405_v62 }
  0x95   : > { %1169 = vmatmul.mubr.bf16.gmra.mxu0 %v2406_v63  ;;  %2209 = vmatmul.mubr.bf16.gmra.mxu1 %v2407_v0 }
  0x96   : > { %1176 = vmatprep.mubr.bf16.mxu0 %v2408_v1  ;;  %2212 = vmatprep.mubr.bf16.mxu1 %v2410_v2 }
  0x9d   : > { %1177 = vmatmul.mubr.bf16.gmra.mxu0 %v2411_v3  ;;  %2213 = vmatmul.mubr.bf16.gmra.mxu1 %v2412_v4 }
  0x9e   : > { %1184 = vmatprep.mubr.bf16.mxu0 %v2413_v5  ;;  %2216 = vmatprep.mubr.bf16.mxu1 %v2415_v6 }
  0xa5   : > { %1185 = vmatmul.mubr.bf16.gmra.mxu0 %v2416_v7  ;;  %2217 = vmatmul.mubr.bf16.gmra.mxu1 %v2417_v8 }
  0xa6   : > { %1192 = vmatprep.mubr.bf16.mxu0 %v2418_v9  ;;  %2220 = vmatprep.mubr.bf16.mxu1 %v2420_v10 }
  0xad   : > { %1193 = vmatmul.mubr.bf16.gmra.mxu0 %v2421_v11  ;;  %2221 = vmatmul.mubr.bf16.gmra.mxu1 %v2422_v12 }
  0xae   : > { %1200 = vmatprep.mubr.bf16.mxu0 %v2423_v13  ;;  %2224 = vmatprep.mubr.bf16.mxu1 %v2425_v14 }
  0xb5   : > { %1201 = vmatmul.mubr.bf16.gmra.mxu0 %v2426_v15  ;;  %2225 = vmatmul.mubr.bf16.gmra.mxu1 %v2427_v16 }
  0xb6   : > { %1208 = vmatprep.mubr.bf16.mxu0 %v2428_v17  ;;  %2228 = vmatprep.mubr.bf16.mxu1 %v2430_v18 }
  0xbd   : > { %1209 = vmatmul.mubr.bf16.gmra.mxu0 %v2431_v19  ;;  %2229 = vmatmul.mubr.bf16.gmra.mxu1 %v2432_v20 }
  0xbe   : > { %1216 = vmatprep.mubr.bf16.mxu0 %v2433_v21  ;;  %2232 = vmatprep.mubr.bf16.mxu1 %v2435_v22 }
  0xc5   : > { %1217 = vmatmul.mubr.bf16.gmra.mxu0 %v2436_v23  ;;  %2233 = vmatmul.mubr.bf16.gmra.mxu1 %v2437_v24 }
  0xc6   : > { %1224 = vmatprep.mubr.bf16.mxu0 %v2438_v25  ;;  %2236 = vmatprep.mubr.bf16.mxu1 %v2440_v26 }
  0xcd   : > { %1225 = vmatmul.mubr.bf16.gmra.mxu0 %v2441_v27  ;;  %2237 = vmatmul.mubr.bf16.gmra.mxu1 %v2442_v28 }
  0xce   : > { %1232 = vmatprep.mubr.bf16.mxu0 %v2443_v29  ;;  %2240 = vmatprep.mubr.bf16.mxu1 %v2445_v30 }
  0xd5   : > { %1233 = vmatmul.mubr.bf16.gmra.mxu0 %v2446_v31  ;;  %2241 = vmatmul.mubr.bf16.gmra.mxu1 %v2447_v32 }
  0xd6   : > { %1240 = vmatprep.mubr.bf16.mxu0 %v2448_v33  ;;  %2244 = vmatprep.mubr.bf16.mxu1 %v2450_v34 }
  0xdd   : > { %1241 = vmatmul.mubr.bf16.gmra.mxu0 %v2451_v35  ;;  %2245 = vmatmul.mubr.bf16.gmra.mxu1 %v2452_v36 }
  0xde   : > { %1248 = vmatprep.mubr.bf16.mxu0 %v2453_v37  ;;  %2248 = vmatprep.mubr.bf16.mxu1 %v2455_v38 }
  0xe5   : > { %1249 = vmatmul.mubr.bf16.gmra.mxu0 %v2456_v39  ;;  %2249 = vmatmul.mubr.bf16.gmra.mxu1 %v2457_v40 }
  0xe6   : > { %1256 = vmatprep.mubr.bf16.mxu0 %v2458_v41  ;;  %2252 = vmatprep.mubr.bf16.mxu1 %v2460_v42 }
  0xed   : > { %1257 = vmatmul.mubr.bf16.gmra.mxu0 %v2461_v43  ;;  %2253 = vmatmul.mubr.bf16.gmra.mxu1 %v2462_v44 }
  0xee   : > { %1264 = vmatprep.mubr.bf16.mxu0 %v2463_v45  ;;  %2256 = vmatprep.mubr.bf16.mxu1 %v2465_v46 }
  0xf5   : > { %1265 = vmatmul.mubr.bf16.gmra.mxu0 %v2466_v47  ;;  %2257 = vmatmul.mubr.bf16.gmra.mxu1 %v2467_v48 }
  0xf6   : > { %1272 = vmatprep.mubr.bf16.mxu0 %v2468_v49  ;;  %2260 = vmatprep.mubr.bf16.mxu1 %v2470_v50 }
  0xfd   : > { %1273 = vmatmul.mubr.bf16.gmra.mxu0 %v2471_v51  ;;  %2261 = vmatmul.mubr.bf16.gmra.mxu1 %v2472_v52 }
  0xfe   : > { %1280 = vmatprep.mubr.bf16.mxu0 %v2473_v53  ;;  %2264 = vmatprep.mubr.bf16.mxu1 %v2475_v54 }
 0x105   : > { %1281 = vmatmul.mubr.bf16.gmra.mxu0 %v2476_v55  ;;  %2265 = vmatmul.mubr.bf16.gmra.mxu1 %v2477_v56 }
 0x10d   : > { %v2749_v57 = vpop.f32.mrf.mxu0  ;;  %v2751_v58 = vpop.f32.mrf.mxu1 }
 0x10f   : > { %v1100_v59 = vpop.f32.mrf.mxu0  ;;  %v1292_v60 = vpop.f32.mrf.mxu1 }
 0x111   : > { %v2753_v61 = vpop.f32.mrf.mxu0  ;;  %v2755_v62 = vpop.f32.mrf.mxu1 }
 0x113   : > { %v1103_v63 = vpop.f32.mrf.mxu0  ;;  %v1295_v0 = vpop.f32.mrf.mxu1 }
 0x114   : > { %v2816_v63 = vld [vmem:[%s3103_s2] ss:$0 sm:$0xff] }
 0x115   : > { %v1106_v1 = vpop.f32.mrf.mxu0  ;;  %v2757_v2 = vpop.f32.mrf.mxu1 }
 0x117   : > { %v1108_v3 = vpop.f32.mrf.mxu0  ;;  %v1300_v4 = vpop.f32.mrf.mxu1 }
 0x118   : > { %v2821_v3 = vld [vmem:[%s3103_s2 + $0x1] ss:$0 sm:$0xff] }
 0x119   : > { %v2759_v5 = vpop.f32.mrf.mxu0  ;;  %v2761_v6 = vpop.f32.mrf.mxu1 }
 0x11b   : > { %v1111_v7 = vpop.f32.mrf.mxu0  ;;  %v1303_v8 = vpop.f32.mrf.mxu1 }
 0x11d   : > { %v2763_v9 = vpop.f32.mrf.mxu0  ;;  %v2765_v10 = vpop.f32.mrf.mxu1 }
 0x11f   : > { %v1116_v11 = vpop.f32.mrf.mxu0  ;;  %v1308_v12 = vpop.f32.mrf.mxu1 }
 0x121   : > { %v2767_v13 = vpop.f32.mrf.mxu0  ;;  %v2769_v14 = vpop.f32.mrf.mxu1 }
 0x123   : > { %v1119_v15 = vpop.f32.mrf.mxu0  ;;  %v1311_v16 = vpop.f32.mrf.mxu1 }
 0x125   : > { %v2771_v17 = vpop.f32.mrf.mxu0  ;;  %v2773_v18 = vpop.f32.mrf.mxu1 }
 0x127   : > { %v1124_v19 = vpop.f32.mrf.mxu0  ;;  %v1316_v20 = vpop.f32.mrf.mxu1 }
 0x129   : > { %v2775_v21 = vpop.f32.mrf.mxu0  ;;  %v2777_v22 = vpop.f32.mrf.mxu1 }
 0x12b   : > { %v1127_v23 = vpop.f32.mrf.mxu0  ;;  %v1319_v24 = vpop.f32.mrf.mxu1 }
 0x12d   : > { %v2779_v25 = vpop.f32.mrf.mxu0  ;;  %v2781_v26 = vpop.f32.mrf.mxu1 }
 0x12f   : > { %v1132_v27 = vpop.f32.mrf.mxu0  ;;  %v1324_v28 = vpop.f32.mrf.mxu1 }
 0x131   : > { %v2783_v29 = vpop.f32.mrf.mxu0  ;;  %v2785_v30 = vpop.f32.mrf.mxu1 }
 0x133   : > { %v1135_v31 = vpop.f32.mrf.mxu0  ;;  %v1327_v32 = vpop.f32.mrf.mxu1 }
 0x135   : > { %v2787_v33 = vpop.f32.mrf.mxu0  ;;  %v2789_v34 = vpop.f32.mrf.mxu1 }
 0x137   : > { %v1140_v35 = vpop.f32.mrf.mxu0  ;;  %v1332_v36 = vpop.f32.mrf.mxu1 }
 0x139   : > { %v2791_v37 = vpop.f32.mrf.mxu0  ;;  %v2793_v38 = vpop.f32.mrf.mxu1 }
 0x13b   : > { %v1143_v39 = vpop.f32.mrf.mxu0  ;;  %v1335_v40 = vpop.f32.mrf.mxu1 }
 0x13d   : > { %v2795_v41 = vpop.f32.mrf.mxu0  ;;  %v2797_v42 = vpop.f32.mrf.mxu1 }
 0x13f   : > { %v1148_v43 = vpop.f32.mrf.mxu0  ;;  %v1340_v44 = vpop.f32.mrf.mxu1 }
 0x141   : > { %v2799_v45 = vpop.f32.mrf.mxu0  ;;  %v2801_v46 = vpop.f32.mrf.mxu1 }
 0x143   : > { %v1151_v47 = vpop.f32.mrf.mxu0  ;;  %v1343_v48 = vpop.f32.mrf.mxu1 }
 0x145   : > { %v2803_v49 = vpop.f32.mrf.mxu0  ;;  %v2805_v50 = vpop.f32.mrf.mxu1 }
 0x147   : > { %v1156_v51 = vpop.f32.mrf.mxu0  ;;  %v1348_v52 = vpop.f32.mrf.mxu1 }
 0x149   : > { %v2807_v53 = vpop.f32.mrf.mxu0  ;;  %v2809_v54 = vpop.f32.mrf.mxu1 }
 0x14b   : > { %v1159_v55 = vpop.f32.mrf.mxu0  ;;  %v1351_v56 = vpop.f32.mrf.mxu1 }
 0x14d   : > { %v2811_v59 = vpop.f32.mrf.mxu0  ;;  %v2206_v60 = vpop.f32.mrf.mxu1 }
 0x14e   : > { %v1396_v0 = vadd.f32 %v2206_v60, %v1106_v1 }
 0x14f   : > { %v1164_v4 = vpop.f32.mrf.mxu0  ;;  %v1387_v7 = vpop.f32.mrf.mxu1 }
 0x150   : > { %v1649_v8 = vmul.f32 %v2816_v63, %v1396_v0  ;;  %v1388_v11 = vadd.f32 %v1387_v7, %v2749_v57 }
 0x151   : > { %v2826_v12 = vpop.f32.mrf.mxu0  ;;  %v2207_v15 = vpop.f32.mrf.mxu1 }
 0x152   : > { %v1718_v16 = vadd.f32 %v2821_v3, %v1649_v8  ;;  %v1647_v19 = vmul.f32 %v2816_v63, %v1388_v11  ;;  %v1399_v1 = vadd.f32 %v2207_v15, %v2759_v5 }
 0x153   : > { %v1167_v20 = vpop.f32.mrf.mxu0  ;;  %v1390_v23 = vpop.f32.mrf.mxu1 }
 0x154   : > { %v1782_v24 = vmax.f32 %v1718_v16, 0.0  ;;  %v1716_v57 = vadd.f32 %v2821_v3, %v1647_v19  ;;  %v1650_v27 = vmul.f32 %v2816_v63, %v1399_v1  ;;  %v1391_v28 = vadd.f32 %v1390_v23, %v2753_v61 }
 0x155   : > { %v2839_v31 = vpop.f32.mrf.mxu0  ;;  %v2210_v5 = vpop.f32.mrf.mxu1 }
 0x156   : > { %1846 = vst [vmem:[%s2834_s4 + $0x10] sm:$0xff] %v1782_v24  ;;  %v1780_v32 = vmax.f32 %v1716_v57, 0.0  ;;  %v1719_v35 = vadd.f32 %v2821_v3, %v1650_v27  ;;  %v1648_v36 = vmul.f32 %v2816_v63, %v1391_v28  ;;  %v1412_v39 = vadd.f32 %v2210_v5, %v2771_v17 }
 0x157   : > { %v1172_v40 = vpop.f32.mrf.mxu0  ;;  %v1403_v43 = vpop.f32.mrf.mxu1 }
 0x158   : > { %1844 = vst [vmem:[%s2834_s4] sm:$0xff] %v1780_v32  ;;  %v1783_v44 = vmax.f32 %v1719_v35, 0.0  ;;  %v1717_v47 = vadd.f32 %v2821_v3, %v1648_v36  ;;  %v1653_v61 = vmul.f32 %v2816_v63, %v1412_v39  ;;  %v1404_v48 = vadd.f32 %v1403_v43, %v2763_v9 }
 0x159   : > { %v2849_v51 = vpop.f32.mrf.mxu0  ;;  %v2211_v52 = vpop.f32.mrf.mxu1 }
 0x15a   : > { %1847 = vst [vmem:[%s2834_s4 + $0x18] sm:$0xff] %v1783_v44  ;;  %v1781_v55 = vmax.f32 %v1717_v47, 0.0  ;;  %v1722_v56 = vadd.f32 %v2821_v3, %v1653_v61  ;;  %v1651_v17 = vmul.f32 %v2816_v63, %v1404_v48  ;;  %v1415_v60 = vadd.f32 %v2211_v52, %v2775_v21 }
 0x15b   : > { %v1175_v0 = vpop.f32.mrf.mxu0  ;;  %v1406_v4 = vpop.f32.mrf.mxu1 }
 0x15c   : > { %1845 = vst [vmem:[%s2834_s4 + $0x8] sm:$0xff] %v1781_v55  ;;  %v1786_v7 = vmax.f32 %v1722_v56, 0.0  ;;  %v1720_v8 = vadd.f32 %v2821_v3, %v1651_v17  ;;  %v1654_v9 = vmul.f32 %v2816_v63, %v1415_v60  ;;  %v1407_v11 = vadd.f32 %v1406_v4, %v2767_v13 }
 0x15d   : > { %v2859_v15 = vpop.f32.mrf.mxu0  ;;  %v2214_v16 = vpop.f32.mrf.mxu1 }
 0x15e   : > { %1850 = vst [vmem:[%s2834_s4 + $0x30] sm:$0xff] %v1786_v7  ;;  %v1784_v19 = vmax.f32 %v1720_v8, 0.0  ;;  %v1723_v1 = vadd.f32 %v2821_v3, %v1654_v9  ;;  %v1652_v21 = vmul.f32 %v2816_v63, %v1407_v11  ;;  %v1428_v20 = vadd.f32 %v2214_v16, %v2787_v33 }
 0x15f   : > { %v1180_v23 = vpop.f32.mrf.mxu0  ;;  %v1419_v24 = vpop.f32.mrf.mxu1 }
 0x160   : > { %1848 = vst [vmem:[%s2834_s4 + $0x20] sm:$0xff] %v1784_v19  ;;  %v1787_v57 = vmax.f32 %v1723_v1, 0.0  ;;  %v1721_v27 = vadd.f32 %v2821_v3, %v1652_v21  ;;  %v1657_v13 = vmul.f32 %v2816_v63, %v1428_v20  ;;  %v1420_v28 = vadd.f32 %v1419_v24, %v2779_v25 }
 0x161   : > { %v2869_v5 = vpop.f32.mrf.mxu0  ;;  %v2215_v32 = vpop.f32.mrf.mxu1 }
 0x162   : > { %1851 = vst [vmem:[%s2834_s4 + $0x38] sm:$0xff] %v1787_v57  ;;  %v1785_v35 = vmax.f32 %v1721_v27, 0.0  ;;  %v1726_v36 = vadd.f32 %v2821_v3, %v1657_v13  ;;  %v1655_v33 = vmul.f32 %v2816_v63, %v1420_v28  ;;  %v1431_v39 = vadd.f32 %v2215_v32, %v2791_v37 }
 0x163   : > { %v1183_v40 = vpop.f32.mrf.mxu0  ;;  %v1422_v43 = vpop.f32.mrf.mxu1 }
 0x164   : > { %1849 = vst [vmem:[%s2834_s4 + $0x28] sm:$0xff] %v1785_v35  ;;  %v1790_v44 = vmax.f32 %v1726_v36, 0.0  ;;  %v1724_v47 = vadd.f32 %v2821_v3, %v1655_v33  ;;  %v1658_v25 = vmul.f32 %v2816_v63, %v1431_v39  ;;  %v1423_v61 = vadd.f32 %v1422_v43, %v2783_v29 }
 0x165   : > { %v1186_v48 = vpop.f32.mrf.mxu0  ;;  %v2218_v52 = vpop.f32.mrf.mxu1 }
 0x166   : > { %1854 = vst [vmem:[%s2834_s4 + $0x50] sm:$0xff] %v1790_v44  ;;  %v1788_v55 = vmax.f32 %v1724_v47, 0.0  ;;  %v1727_v56 = vadd.f32 %v2821_v3, %v1658_v25  ;;  %v1656_v37 = vmul.f32 %v2816_v63, %v1423_v61  ;;  %v1444_v17 = vadd.f32 %v2218_v52, %v2803_v49 }
 0x167   : > { %v1188_v60 = vpop.f32.mrf.mxu0  ;;  %v1435_v0 = vpop.f32.mrf.mxu1 }
 0x168   : > { %1852 = vst [vmem:[%s2834_s4 + $0x40] sm:$0xff] %v1788_v55  ;;  %v1791_v4 = vmax.f32 %v1727_v56, 0.0  ;;  %v1725_v7 = vadd.f32 %v2821_v3, %v1656_v37  ;;  %v1661_v29 = vmul.f32 %v2816_v63, %v1444_v17  ;;  %v1436_v8 = vadd.f32 %v1435_v0, %v2795_v41 }
 0x169   : > { %v1189_v9 = vpop.f32.mrf.mxu0  ;;  %v2219_v11 = vpop.f32.mrf.mxu1 }
 0x16a   : > { %1855 = vst [vmem:[%s2834_s4 + $0x58] sm:$0xff] %v1791_v4  ;;  %v1789_v16 = vmax.f32 %v1725_v7, 0.0  ;;  %v1730_v19 = vadd.f32 %v2821_v3, %v1661_v29  ;;  %v1659_v49 = vmul.f32 %v2816_v63, %v1436_v8  ;;  %v1447_v1 = vadd.f32 %v2219_v11, %v2807_v53 }
 0x16b   : > { %v1191_v21 = vpop.f32.mrf.mxu0  ;;  %v1438_v20 = vpop.f32.mrf.mxu1 }
 0x16c   : > { %1853 = vst [vmem:[%s2834_s4 + $0x48] sm:$0xff] %v1789_v16  ;;  %v1794_v23 = vmax.f32 %v1730_v19, 0.0  ;;  %v1728_v24 = vadd.f32 %v2821_v3, %v1659_v49  ;;  %v1662_v41 = vmul.f32 %v2816_v63, %v1447_v1  ;;  %v1439_v57 = vadd.f32 %v1438_v20, %v2799_v45 }
 0x16d   : > { %v2895_v27 = vpop.f32.mrf.mxu0  ;;  %v2222_v13 = vpop.f32.mrf.mxu1 }
 0x16e   : > { %1858 = vst [vmem:[%s2834_s4 + $0x70] sm:$0xff] %v1794_v23  ;;  %v1792_v28 = vmax.f32 %v1728_v24, 0.0  ;;  %v1731_v32 = vadd.f32 %v2821_v3, %v1662_v41  ;;  %v1660_v53 = vmul.f32 %v2816_v63, %v1439_v57  ;;  %v1460_v35 = vadd.f32 %v2222_v13, %v2839_v31 }
 0x16f   : > { %v1196_v36 = vpop.f32.mrf.mxu0  ;;  %v1451_v33 = vpop.f32.mrf.mxu1 }
 0x170   : > { %1856 = vst [vmem:[%s2834_s4 + $0x60] sm:$0xff] %v1792_v28  ;;  %v1795_v39 = vmax.f32 %v1731_v32, 0.0  ;;  %v1729_v40 = vadd.f32 %v2821_v3, %v1660_v53  ;;  %v1665_v45 = vmul.f32 %v2816_v63, %v1460_v35  ;;  %v1452_v43 = vadd.f32 %v1451_v33, %v2811_v59 }
 0x171   : > { %v2905_v44 = vpop.f32.mrf.mxu0  ;;  %v2223_v47 = vpop.f32.mrf.mxu1 }
 0x172   : > { %1859 = vst [vmem:[%s2834_s4 + $0x78] sm:$0xff] %v1795_v39  ;;  %v1793_v25 = vmax.f32 %v1729_v40, 0.0  ;;  %v1734_v61 = vadd.f32 %v2821_v3, %v1665_v45  ;;  %v1663_v31 = vmul.f32 %v2816_v63, %v1452_v43  ;;  %v1463_v52 = vadd.f32 %v2223_v47, %v2849_v51 }
 0x173   : > { %v1199_v55 = vpop.f32.mrf.mxu0  ;;  %v1454_v56 = vpop.f32.mrf.mxu1 }
 0x174   : > { %1857 = vst [vmem:[%s2834_s4 + $0x68] sm:$0xff] %v1793_v25  ;;  %v1798_v37 = vmax.f32 %v1734_v61, 0.0  ;;  %v1732_v17 = vadd.f32 %v2821_v3, %v1663_v31  ;;  %v1666_v59 = vmul.f32 %v2816_v63, %v1463_v52  ;;  %v1455_v60 = vadd.f32 %v1454_v56, %v2826_v12 }
 0x175   : > { %v1202_v0 = vpop.f32.mrf.mxu0  ;;  %v2226_v4 = vpop.f32.mrf.mxu1 }
 0x176   : > { %1862 = vst [vmem:[%s2834_s4 + $0x90] sm:$0xff] %v1798_v37  ;;  %v1796_v7 = vmax.f32 %v1732_v17, 0.0  ;;  %v1735_v29 = vadd.f32 %v2821_v3, %v1666_v59  ;;  %v1664_v51 = vmul.f32 %v2816_v63, %v1455_v60  ;;  %v1476_v8 = vadd.f32 %v2226_v4, %v1186_v48 }
 0x177   : > { %v1204_v11 = vpop.f32.mrf.mxu0  ;;  %v1467_v16 = vpop.f32.mrf.mxu1 }
 0x178   : > { %1860 = vst [vmem:[%s2834_s4 + $0x80] sm:$0xff] %v1796_v7  ;;  %v1799_v19 = vmax.f32 %v1735_v29, 0.0  ;;  %v1733_v49 = vadd.f32 %v2821_v3, %v1664_v51  ;;  %v1669_v1 = vmul.f32 %v2816_v63, %v1476_v8  ;;  %v1468_v12 = vadd.f32 %v1467_v16, %v2859_v15 }
 0x179   : > { %v1205_v21 = vpop.f32.mrf.mxu0  ;;  %v2227_v20 = vpop.f32.mrf.mxu1 }
 0x17a   : > { %1863 = vst [vmem:[%s2834_s4 + $0x98] sm:$0xff] %v1799_v19  ;;  %v1797_v23 = vmax.f32 %v1733_v49, 0.0  ;;  %v1738_v24 = vadd.f32 %v2821_v3, %v1669_v1  ;;  %v1667_v48 = vmul.f32 %v2816_v63, %v1468_v12  ;;  %v1479_v41 = vadd.f32 %v2227_v20, %v1189_v9 }
 0x17b   : > { %v1207_v57 = vpop.f32.mrf.mxu0  ;;  %v1470_v13 = vpop.f32.mrf.mxu1 }
 0x17c   : > { %1861 = vst [vmem:[%s2834_s4 + $0x88] sm:$0xff] %v1797_v23  ;;  %v1802_v28 = vmax.f32 %v1738_v24, 0.0  ;;  %v1736_v32 = vadd.f32 %v2821_v3, %v1667_v48  ;;  %v1670_v53 = vmul.f32 %v2816_v63, %v1479_v41  ;;  %v1471_v15 = vadd.f32 %v1470_v13, %v2869_v5 }
 0x17d   : > { %v1210_v35 = vpop.f32.mrf.mxu0  ;;  %v2230_v36 = vpop.f32.mrf.mxu1 }
 0x17e   : > { %1866 = vst [vmem:[%s2834_s4 + $0xb0] sm:$0xff] %v1802_v28  ;;  %v1800_v33 = vmax.f32 %v1736_v32, 0.0  ;;  %v1739_v39 = vadd.f32 %v2821_v3, %v1670_v53  ;;  %v1668_v9 = vmul.f32 %v2816_v63, %v1471_v15  ;;  %v1492_v40 = vadd.f32 %v2230_v36, %v1202_v0 }
 0x17f   : > { %v1212_v45 = vpop.f32.mrf.mxu0  ;;  %v1483_v43 = vpop.f32.mrf.mxu1 }
 0x180   : > { %1864 = vst [vmem:[%s2834_s4 + $0xa0] sm:$0xff] %v1800_v33  ;;  %v1803_v47 = vmax.f32 %v1739_v39, 0.0  ;;  %v1737_v25 = vadd.f32 %v2821_v3, %v1668_v9  ;;  %v1673_v61 = vmul.f32 %v2816_v63, %v1492_v40  ;;  %v1484_v5 = vadd.f32 %v1483_v43, %v2895_v27 }
 0x181   : > { %v1213_v31 = vpop.f32.mrf.mxu0  ;;  %v2231_v52 = vpop.f32.mrf.mxu1 }
 0x182   : > { %1867 = vst [vmem:[%s2834_s4 + $0xb8] sm:$0xff] %v1803_v47  ;;  %v1801_v55 = vmax.f32 %v1737_v25, 0.0  ;;  %v1742_v56 = vadd.f32 %v2821_v3, %v1673_v61  ;;  %v1671_v37 = vmul.f32 %v2816_v63, %v1484_v5  ;;  %v1495_v17 = vadd.f32 %v2231_v52, %v1205_v21 }
 0x183   : > { %v1215_v59 = vpop.f32.mrf.mxu0  ;;  %v1486_v60 = vpop.f32.mrf.mxu1 }
 0x184   : > { %1865 = vst [vmem:[%s2834_s4 + $0xa8] sm:$0xff] %v1801_v55  ;;  %v1806_v0 = vmax.f32 %v1742_v56, 0.0  ;;  %v1740_v4 = vadd.f32 %v2821_v3, %v1671_v37  ;;  %v1674_v7 = vmul.f32 %v2816_v63, %v1495_v17  ;;  %v1487_v27 = vadd.f32 %v1486_v60, %v2905_v44 }
 0x185   : > { %v1218_v29 = vpop.f32.mrf.mxu0  ;;  %v2234_v51 = vpop.f32.mrf.mxu1 }
 0x186   : > { %1870 = vst [vmem:[%s2834_s4 + $0xd0] sm:$0xff] %v1806_v0  ;;  %v1804_v8 = vmax.f32 %v1740_v4, 0.0  ;;  %v1743_v11 = vadd.f32 %v2821_v3, %v1674_v7  ;;  %v1672_v16 = vmul.f32 %v2816_v63, %v1487_v27  ;;  %v1508_v19 = vadd.f32 %v2234_v51, %v1218_v29 }
 0x187   : > { %v1220_v49 = vpop.f32.mrf.mxu0  ;;  %v1499_v1 = vpop.f32.mrf.mxu1 }
 0x188   : > { %1868 = vst [vmem:[%s2834_s4 + $0xc0] sm:$0xff] %v1804_v8  ;;  %v1807_v12 = vmax.f32 %v1743_v11, 0.0  ;;  %v1741_v21 = vadd.f32 %v2821_v3, %v1672_v16  ;;  %v1677_v20 = vmul.f32 %v2816_v63, %v1508_v19  ;;  %v1500_v44 = vadd.f32 %v1499_v1, %v1210_v35 }
 0x189   : > { %v1221_v23 = vpop.f32.mrf.mxu0  ;;  %v2235_v24 = vpop.f32.mrf.mxu1 }
 0x18a   : > { %1871 = vst [vmem:[%s2834_s4 + $0xd8] sm:$0xff] %v1807_v12  ;;  %v1805_v48 = vmax.f32 %v1741_v21, 0.0  ;;  %v1746_v41 = vadd.f32 %v2821_v3, %v1677_v20  ;;  %v1675_v57 = vmul.f32 %v2816_v63, %v1500_v44  ;;  %v1511_v13 = vadd.f32 %v2235_v24, %v1221_v23 }
 0x18b   : > { %v1223_v28 = vpop.f32.mrf.mxu0  ;;  %v1502_v32 = vpop.f32.mrf.mxu1 }
 0x18c   : > { %1869 = vst [vmem:[%s2834_s4 + $0xc8] sm:$0xff] %v1805_v48  ;;  %v1810_v53 = vmax.f32 %v1746_v41, 0.0  ;;  %v1744_v15 = vadd.f32 %v2821_v3, %v1675_v57  ;;  %v1678_v36 = vmul.f32 %v2816_v63, %v1511_v13  ;;  %v1503_v35 = vadd.f32 %v1502_v32, %v1213_v31 }
 0x18d   : > { %v1226_v33 = vpop.f32.mrf.mxu0  ;;  %v2238_v39 = vpop.f32.mrf.mxu1 }
 0x18e   : > { %1874 = vst [vmem:[%s2834_s4 + $0xf0] sm:$0xff] %v1810_v53  ;;  %v1808_v9 = vmax.f32 %v1744_v15, 0.0  ;;  %v1747_v40 = vadd.f32 %v2821_v3, %v1678_v36  ;;  %v1676_v45 = vmul.f32 %v2816_v63, %v1503_v35 }
 0x18f   : > { %v1228_v43 = vpop.f32.mrf.mxu0  ;;  %v1515_v47 = vpop.f32.mrf.mxu1 }
 0x190   : > { %1872 = vst [vmem:[%s2834_s4 + $0xe0] sm:$0xff] %v1808_v9  ;;  %v1811_v25 = vmax.f32 %v1747_v40, 0.0  ;;  %v1745_v61 = vadd.f32 %v2821_v3, %v1676_v45  ;;  %v1516_v5 = vadd.f32 %v1515_v47, %v1226_v33 }
 0x191   : > { %v1229_v52 = vpop.f32.mrf.mxu0  ;;  %v2239_v55 = vpop.f32.mrf.mxu1 }
 0x192   : > { %1875 = vst [vmem:[%s2834_s4 + $0xf8] sm:$0xff] %v1811_v25  ;;  %v1809_v31 = vmax.f32 %v1745_v61, 0.0  ;;  %v1679_v56 = vmul.f32 %v2816_v63, %v1516_v5 }
 0x193   : > { %v1231_v37 = vpop.f32.mrf.mxu0  ;;  %v1518_v17 = vpop.f32.mrf.mxu1 }
 0x194   : > { %1873 = vst [vmem:[%s2834_s4 + $0xe8] sm:$0xff] %v1809_v31  ;;  %v1748_v59 = vadd.f32 %v2821_v3, %v1679_v56  ;;  %v1519_v60 = vadd.f32 %v1518_v17, %v1229_v52 }
 0x195   : > { %v1234_v0 = vpop.f32.mrf.mxu0  ;;  %v2242_v4 = vpop.f32.mrf.mxu1 }
 0x196   : > { %v1812_v7 = vmax.f32 %v1748_v59, 0.0  ;;  %v1680_v27 = vmul.f32 %v2816_v63, %v1519_v60  ;;  %v1524_v29 = vadd.f32 %v2238_v39, %v1234_v0 }
 0x197   : > { %v1236_v51 = vpop.f32.mrf.mxu0  ;;  %v1531_v8 = vpop.f32.mrf.mxu1 }
 0x198   : > { %1876 = vst [vmem:[%s2834_s4 + $0x100] sm:$0xff] %v1812_v7  ;;  %v1749_v11 = vadd.f32 %v2821_v3, %v1680_v27  ;;  %v1681_v16 = vmul.f32 %v2816_v63, %v1524_v29 }
 0x199   : > { %v1237_v19 = vpop.f32.mrf.mxu0  ;;  %v2243_v49 = vpop.f32.mrf.mxu1 }
 0x19a   : > { %v1813_v1 = vmax.f32 %v1749_v11, 0.0  ;;  %v1750_v12 = vadd.f32 %v2821_v3, %v1681_v16  ;;  %v1527_v21 = vadd.f32 %v2239_v55, %v1237_v19 }
 0x19b   : > { %v1239_v20 = vpop.f32.mrf.mxu0  ;;  %v1534_v44 = vpop.f32.mrf.mxu1 }
 0x19c   : > { %1877 = vst [vmem:[%s2834_s4 + $0x108] sm:$0xff] %v1813_v1  ;;  %v1814_v23 = vmax.f32 %v1750_v12, 0.0  ;;  %v1682_v24 = vmul.f32 %v2816_v63, %v1527_v21 }
 0x19d   : > { %v1242_v48 = vpop.f32.mrf.mxu0  ;;  %v2971_v41 = vpop.f32.mrf.mxu1 }
 0x19e   : > { %1878 = vst [vmem:[%s2834_s4 + $0x110] sm:$0xff] %v1814_v23  ;;  %v1751_v57 = vadd.f32 %v2821_v3, %v1682_v24  ;;  %v1532_v13 = vadd.f32 %v1531_v8, %v1242_v48 }
 0x19f   : > { %v1244_v28 = vpop.f32.mrf.mxu0  ;;  %v1547_v32 = vpop.f32.mrf.mxu1 }
 0x1a0   : > { %v1815_v53 = vmax.f32 %v1751_v57, 0.0  ;;  %v1683_v15 = vmul.f32 %v2816_v63, %v1532_v13 }
 0x1a1   : > { %v1245_v36 = vpop.f32.mrf.mxu0  ;;  %v2976_v35 = vpop.f32.mrf.mxu1 }
 0x1a2   : > { %1879 = vst [vmem:[%s2834_s4 + $0x118] sm:$0xff] %v1815_v53  ;;  %v1752_v33 = vadd.f32 %v2821_v3, %v1683_v15  ;;  %v1535_v39 = vadd.f32 %v1534_v44, %v1245_v36 }
 0x1a3   : > { %v1247_v9 = vpop.f32.mrf.mxu0  ;;  %v1550_v40 = vpop.f32.mrf.mxu1 }
 0x1a4   : > { %v1816_v45 = vmax.f32 %v1752_v33, 0.0  ;;  %v1684_v43 = vmul.f32 %v2816_v63, %v1535_v39 }
 0x1a5   : > { %v1250_v47 = vpop.f32.mrf.mxu0  ;;  %v2981_v25 = vpop.f32.mrf.mxu1 }
 0x1a6   : > { %1880 = vst [vmem:[%s2834_s4 + $0x120] sm:$0xff] %v1816_v45  ;;  %v1753_v61 = vadd.f32 %v2821_v3, %v1684_v43  ;;  %v1540_v5 = vadd.f32 %v2242_v4, %v1250_v47 }
 0x1a7   : > { %v1252_v52 = vpop.f32.mrf.mxu0  ;;  %v2985_v55 = vpop.f32.mrf.mxu1 }
 0x1a8   : > { %v1817_v31 = vmax.f32 %v1753_v61, 0.0  ;;  %v1685_v56 = vmul.f32 %v2816_v63, %v1540_v5 }
 0x1a9   : > { %v1253_v37 = vpop.f32.mrf.mxu0  ;;  %v2988_v17 = vpop.f32.mrf.mxu1 }
 0x1aa   : > { %1881 = vst [vmem:[%s2834_s4 + $0x128] sm:$0xff] %v1817_v31  ;;  %v1754_v59 = vadd.f32 %v2821_v3, %v1685_v56  ;;  %v1543_v60 = vadd.f32 %v2243_v49, %v1253_v37 }
 0x1ab   : > { %v1255_v0 = vpop.f32.mrf.mxu0  ;;  %v2992_v7 = vpop.f32.mrf.mxu1 }
 0x1ac   : > { %v1818_v27 = vmax.f32 %v1754_v59, 0.0  ;;  %v1686_v4 = vmul.f32 %v2816_v63, %v1543_v60 }
 0x1ad   : > { %v1258_v29 = vpop.f32.mrf.mxu0  ;;  %v2254_v51 = vpop.f32.mrf.mxu1 }
 0x1ae   : > { %1882 = vst [vmem:[%s2834_s4 + $0x130] sm:$0xff] %v1818_v27  ;;  %v1755_v8 = vadd.f32 %v2821_v3, %v1686_v4  ;;  %v1548_v11 = vadd.f32 %v1547_v32, %v1258_v29  ;;  %v1588_v16 = vadd.f32 %v2254_v51, %v2757_v2 }
 0x1af   : > { %v1260_v19 = vpop.f32.mrf.mxu0  ;;  %v1579_v1 = vpop.f32.mrf.mxu1 }
 0x1b0   : > { %v1819_v12 = vmax.f32 %v1755_v8, 0.0  ;;  %v1687_v49 = vmul.f32 %v2816_v63, %v1548_v11  ;;  %v1697_v21 = vmul.f32 %v2816_v63, %v1588_v16  ;;  %v1580_v20 = vadd.f32 %v1579_v1, %v2751_v58 }
 0x1b1   : > { %v1261_v44 = vpop.f32.mrf.mxu0  ;;  %v2255_v23 = vpop.f32.mrf.mxu1 }
 0x1b2   : > { %1883 = vst [vmem:[%s2834_s4 + $0x138] sm:$0xff] %v1819_v12  ;;  %v1756_v24 = vadd.f32 %v2821_v3, %v1687_v49  ;;  %v1766_v48 = vadd.f32 %v2821_v3, %v1697_v21  ;;  %v1695_v2 = vmul.f32 %v2816_v63, %v1580_v20  ;;  %v1551_v57 = vadd.f32 %v1550_v40, %v1261_v44 }
 0x1b3   : > { %v1591_v13 = vadd.f32 %v2255_v23, %v2761_v6  ;;  %v1263_v28 = vpop.f32.mrf.mxu0  ;;  %v1582_v32 = vpop.f32.mrf.mxu1 }
 0x1b4   : > { %v1820_v53 = vmax.f32 %v1756_v24, 0.0  ;;  %v1830_v15 = vmax.f32 %v1766_v48, 0.0  ;;  %v1764_v58 = vadd.f32 %v2821_v3, %v1695_v2  ;;  %v1688_v36 = vmul.f32 %v2816_v63, %v1551_v57 }
 0x1b5   : > { %v1698_v33 = vmul.f32 %v2816_v63, %v1591_v13  ;;  %v1583_v39 = vadd.f32 %v1582_v32, %v2755_v62  ;;  %v1266_v9 = vpop.f32.mrf.mxu0  ;;  %v2258_v45 = vpop.f32.mrf.mxu1 }
 0x1b6   : > { %1884 = vst [vmem:[%s2834_s4 + $0x140] sm:$0xff] %v1820_v53  ;;  %1894 = vst [vmem:[%s2834_s4 + $0x190] sm:$0xff] %v1830_v15  ;;  %v1828_v40 = vmax.f32 %v1764_v58, 0.0  ;;  %v1757_v6 = vadd.f32 %v2821_v3, %v1688_v36  ;;  %v1556_v43 = vadd.f32 %v2971_v41, %v1266_v9  ;;  %v1604_v47 = vadd.f32 %v2258_v45, %v2773_v18 }
 0x1b7   : > { %v1767_v61 = vadd.f32 %v2821_v3, %v1698_v33  ;;  %v1696_v5 = vmul.f32 %v2816_v63, %v1583_v39  ;;  %v1268_v52 = vpop.f32.mrf.mxu0  ;;  %v1595_v31 = vpop.f32.mrf.mxu1 }
 0x1b8   : > { %1892 = vst [vmem:[%s2834_s4 + $0x180] sm:$0xff] %v1828_v40  ;;  %v1821_v62 = vmax.f32 %v1757_v6, 0.0  ;;  %v1689_v56 = vmul.f32 %v2816_v63, %v1556_v43  ;;  %v1701_v37 = vmul.f32 %v2816_v63, %v1604_v47  ;;  %v1596_v59 = vadd.f32 %v1595_v31, %v2765_v10 }
 0x1b9   : > { %v1831_v60 = vmax.f32 %v1767_v61, 0.0  ;;  %v1765_v41 = vadd.f32 %v2821_v3, %v1696_v5  ;;  %v1269_v0 = vpop.f32.mrf.mxu0  ;;  %v2259_v18 = vpop.f32.mrf.mxu1 }
 0x1ba   : > { %1885 = vst [vmem:[%s2834_s4 + $0x148] sm:$0xff] %v1821_v62  ;;  %v1758_v27 = vadd.f32 %v2821_v3, %v1689_v56  ;;  %v1770_v4 = vadd.f32 %v2821_v3, %v1701_v37  ;;  %v1699_v29 = vmul.f32 %v2816_v63, %v1596_v59  ;;  %v1559_v51 = vadd.f32 %v2976_v35, %v1269_v0 }
 0x1bb   : > { %1895 = vst [vmem:[%s2834_s4 + $0x198] sm:$0xff] %v1831_v60  ;;  %v1829_v8 = vmax.f32 %v1765_v41, 0.0  ;;  %v1607_v10 = vadd.f32 %v2259_v18, %v2777_v22  ;;  %v1271_v11 = vpop.f32.mrf.mxu0  ;;  %v1598_v16 = vpop.f32.mrf.mxu1 }
 0x1bc   : > { %v1822_v19 = vmax.f32 %v1758_v27, 0.0  ;;  %v1834_v1 = vmax.f32 %v1770_v4, 0.0  ;;  %v1768_v12 = vadd.f32 %v2821_v3, %v1699_v29  ;;  %v1690_v49 = vmul.f32 %v2816_v63, %v1559_v51 }
 0x1bd   : > { %1893 = vst [vmem:[%s2834_s4 + $0x188] sm:$0xff] %v1829_v8  ;;  %v1702_v21 = vmul.f32 %v2816_v63, %v1607_v10  ;;  %v1599_v20 = vadd.f32 %v1598_v16, %v2769_v14  ;;  %v1274_v35 = vpop.f32.mrf.mxu0  ;;  %v2262_v44 = vpop.f32.mrf.mxu1 }
 0x1be   : > { %1886 = vst [vmem:[%s2834_s4 + $0x150] sm:$0xff] %v1822_v19  ;;  %1898 = vst [vmem:[%s2834_s4 + $0x1b0] sm:$0xff] %v1834_v1  ;;  %v1832_v23 = vmax.f32 %v1768_v12, 0.0  ;;  %v1759_v22 = vadd.f32 %v2821_v3, %v1690_v49  ;;  %v1564_v24 = vadd.f32 %v2985_v55, %v1274_v35  ;;  %v1620_v48 = vadd.f32 %v2262_v44, %v2789_v34 }
 0x1bf   : > { %v1771_v2 = vadd.f32 %v2821_v3, %v1702_v21  ;;  %v1700_v57 = vmul.f32 %v2816_v63, %v1599_v20  ;;  %v1276_v13 = vpop.f32.mrf.mxu0  ;;  %v1611_v28 = vpop.f32.mrf.mxu1 }
 0x1c0   : > { %1896 = vst [vmem:[%s2834_s4 + $0x1a0] sm:$0xff] %v1832_v23  ;;  %v1823_v14 = vmax.f32 %v1759_v22, 0.0  ;;  %v1691_v32 = vmul.f32 %v2816_v63, %v1564_v24  ;;  %v1705_v53 = vmul.f32 %v2816_v63, %v1620_v48  ;;  %v1612_v15 = vadd.f32 %v1611_v28, %v2781_v26 }
 0x1c1   : > { %v1835_v58 = vmax.f32 %v1771_v2, 0.0  ;;  %v1769_v55 = vadd.f32 %v2821_v3, %v1700_v57  ;;  %v1277_v36 = vpop.f32.mrf.mxu0  ;;  %v2263_v34 = vpop.f32.mrf.mxu1 }
 0x1c2   : > { %1887 = vst [vmem:[%s2834_s4 + $0x158] sm:$0xff] %v1823_v14  ;;  %v1760_v33 = vadd.f32 %v2821_v3, %v1691_v32  ;;  %v1774_v39 = vadd.f32 %v2821_v3, %v1705_v53  ;;  %v1703_v9 = vmul.f32 %v2816_v63, %v1612_v15  ;;  %v1567_v45 = vadd.f32 %v2992_v7, %v1277_v36 }
 0x1c3   : > { %1899 = vst [vmem:[%s2834_s4 + $0x1b8] sm:$0xff] %v1835_v58  ;;  %v1833_v40 = vmax.f32 %v1769_v55, 0.0  ;;  %v1623_v26 = vadd.f32 %v2263_v34, %v2793_v38  ;;  %v1279_v6 = vpop.f32.mrf.mxu0  ;;  %v1614_v43 = vpop.f32.mrf.mxu1 }
 0x1c4   : > { %v1824_v47 = vmax.f32 %v1760_v33, 0.0  ;;  %v1838_v61 = vmax.f32 %v1774_v39, 0.0  ;;  %v1772_v5 = vadd.f32 %v2821_v3, %v1703_v9  ;;  %v1692_v52 = vmul.f32 %v2816_v63, %v1567_v45 }
 0x1c5   : > { %1897 = vst [vmem:[%s2834_s4 + $0x1a8] sm:$0xff] %v1833_v40  ;;  %v1706_v31 = vmul.f32 %v2816_v63, %v1623_v26  ;;  %v1615_v62 = vadd.f32 %v1614_v43, %v2785_v30  ;;  %v1282_v7 = vpop.f32.mrf.mxu0  ;;  %v2266_v56 = vpop.f32.mrf.mxu1 }
 0x1c6   : > { %1888 = vst [vmem:[%s2834_s4 + $0x160] sm:$0xff] %v1824_v47  ;;  %1902 = vst [vmem:[%s2834_s4 + $0x1d0] sm:$0xff] %v1838_v61  ;;  %v1836_v37 = vmax.f32 %v1772_v5, 0.0  ;;  %v1761_v38 = vadd.f32 %v2821_v3, %v1692_v52  ;;  %v1572_v59 = vadd.f32 %v2981_v25, %v1282_v7  ;;  %v1636_v60 = vadd.f32 %v2266_v56, %v2805_v50 }
 0x1c7   : > { %v1775_v41 = vadd.f32 %v2821_v3, %v1706_v31  ;;  %v1704_v0 = vmul.f32 %v2816_v63, %v1615_v62  ;;  %v1284_v18 = vpop.f32.mrf.mxu0  ;;  %v1627_v27 = vpop.f32.mrf.mxu1 }
 0x1c8   : > { %1900 = vst [vmem:[%s2834_s4 + $0x1c0] sm:$0xff] %v1836_v37  ;;  %v1825_v30 = vmax.f32 %v1761_v38, 0.0  ;;  %v1693_v4 = vmul.f32 %v2816_v63, %v1572_v59  ;;  %v1709_v29 = vmul.f32 %v2816_v63, %v1636_v60  ;;  %v1628_v51 = vadd.f32 %v1627_v27, %v2797_v42 }
 0x1c9   : > { %v1839_v8 = vmax.f32 %v1775_v41, 0.0  ;;  %v1773_v25 = vadd.f32 %v2821_v3, %v1704_v0  ;;  %v1285_v10 = vpop.f32.mrf.mxu0  ;;  %v2267_v50 = vpop.f32.mrf.mxu1 }
 0x1ca   : > { %1889 = vst [vmem:[%s2834_s4 + $0x168] sm:$0xff] %v1825_v30  ;;  %v1762_v11 = vadd.f32 %v2821_v3, %v1693_v4  ;;  %v1778_v16 = vadd.f32 %v2821_v3, %v1709_v29  ;;  %v1707_v19 = vmul.f32 %v2816_v63, %v1628_v51  ;;  %v1575_v1 = vadd.f32 %v2988_v17, %v1285_v10 }
 0x1cb   : > { %1903 = vst [vmem:[%s2834_s4 + $0x1d8] sm:$0xff] %v1839_v8  ;;  %v1837_v12 = vmax.f32 %v1773_v25, 0.0  ;;  %v1639_v42 = vadd.f32 %v2267_v50, %v2809_v54  ;;  %v1287_v49 = vpop.f32.mrf.mxu0  ;;  %v1630_v21 = vpop.f32.mrf.mxu1 }
 0x1cc   : > { %v1826_v20 = vmax.f32 %v1762_v11, 0.0  ;;  %v1842_v35 = vmax.f32 %v1778_v16, 0.0  ;;  %v1776_v44 = vadd.f32 %v2821_v3, %v1707_v19  ;;  %v1694_v23 = vmul.f32 %v2816_v63, %v1575_v1 }
 0x1cd   : > { %1901 = vst [vmem:[%s2834_s4 + $0x1c8] sm:$0xff] %v1837_v12  ;;  %v1710_v22 = vmul.f32 %v2816_v63, %v1639_v42  ;;  %v1631_v17 = vadd.f32 %v1630_v21, %v2801_v46 }
 0x1ce   : > { %1890 = vst [vmem:[%s2834_s4 + $0x170] sm:$0xff] %v1826_v20  ;;  %1906 = vst [vmem:[%s2834_s4 + $0x1f0] sm:$0xff] %v1842_v35  ;;  %v1840_v54 = vmax.f32 %v1776_v44, 0.0  ;;  %v1763_v24 = vadd.f32 %v2821_v3, %v1694_v23 }
 0x1cf   : > { %v1779_v48 = vadd.f32 %v2821_v3, %v1710_v22  ;;  %v1708_v2 = vmul.f32 %v2816_v63, %v1631_v17 }
 0x1d0   : > { %1904 = vst [vmem:[%s2834_s4 + $0x1e0] sm:$0xff] %v1840_v54  ;;  %v1827_v57 = vmax.f32 %v1763_v24, 0.0 }
 0x1d1   : > { %v1843_v13 = vmax.f32 %v1779_v48, 0.0  ;;  %v1777_v28 = vadd.f32 %v2821_v3, %v1708_v2 }
 0x1d2   : > { %1891 = vst [vmem:[%s2834_s4 + $0x178] sm:$0xff] %v1827_v57 }
 0x1d3   : > { %1907 = vst [vmem:[%s2834_s4 + $0x1f8] sm:$0xff] %v1843_v13  ;;  %v1841_v14 = vmax.f32 %v1777_v28, 0.0 }
 0x1d5   : > { %1905 = vst [vmem:[%s2834_s4 + $0x1e8] sm:$0xff] %v1841_v14 }
 0x1d6 PF: > { %s13_s14 = sadd.s32 1, %s2500_s14   ;;  %s3105_s12 = smov %s2496_s13 }
 0x1d7   : > { %p10_p5 = scmp.ge.s32.totalorder %s13_s14, 7   ;;  %s3106_s13 = smov %s3108_s15 }
 0x1d9   :  { %12 = sbr.rel (!%p10_p5) target bundleno = 2 (0x2), region = 68 }

// kernel: cnn3d_forward.4
= control target key start
LH: loop header
LB: loop body
LE: loop exit
PB: predicated region body
PF: predicated region fallthrough
CT: control target
= control target key end

     0   :  { %v1913_v36 = vmov 0.0   ;;  %vm1914_vm0 = vmmov 0   ;;  %s2472_s1 = inlined_call_operand.vmem [shape: bf16[896,128], index: 1, kind: input, shape index: {}]   ;;  %s2473_s0 = inlined_call_operand.vmem [shape: bf16[144,896], index: 0, kind: input, shape index: {}]   ;;  %s2474_s2 = inlined_call_operand.vmem [shape: f32[2,128], index: 2, kind: input, shape index: {}]   ;;  %s2475_s3 = inlined_call_operand.vmem [shape: f32[144,128], index: 3, kind: output, shape index: {}]  }
   0x1   :  { %v1767_v0 = vld [vmem:[%s2472_s1 + $0x78] sm:$0xff]   ;;  %v1771_v4 = vld [vmem:[%s2472_s1 + $0x70] sm:$0xff]   ;;  %v1775_v8 = vld [vmem:[%s2472_s1 + $0x68] sm:$0xff]  }
   0x2   :  { %v1768_v1 = vld [vmem:[%s2472_s1 + $0xf8] sm:$0xff]   ;;  %1486 = vmatprep.subr.bf16.mxu0 %v1767_v0  ;;  %v1772_v5 = vld [vmem:[%s2472_s1 + $0xf0] sm:$0xff]   ;;  %v1776_v9 = vld [vmem:[%s2472_s1 + $0xe8] sm:$0xff]  }
   0x3   :  { %v1769_v2 = vld [vmem:[%s2472_s1 + $0x38] sm:$0xff]   ;;  %1556 = vmatprep.subr.bf16.mxu1 %v1768_v1  ;;  %v1773_v6 = vld [vmem:[%s2472_s1 + $0x30] sm:$0xff]   ;;  %v1777_v10 = vld [vmem:[%s2472_s1 + $0x28] sm:$0xff]  }
   0x4   :  { %v1770_v3 = vld [vmem:[%s2472_s1 + $0xb8] sm:$0xff]   ;;  %1487 = vmatpush3.bf16.msra.mxu0 %v1769_v2  ;;  %v1774_v7 = vld [vmem:[%s2472_s1 + $0xb0] sm:$0xff]   ;;  %v1778_v11 = vld [vmem:[%s2472_s1 + $0xa8] sm:$0xff]  }
   0x5   :  { %1557 = vmatpush3.bf16.msra.mxu1 %v1770_v3  ;;  %1488 = vmatprep.subr.bf16.mxu0 %v1771_v4  ;;  %v1779_v12 = vld [vmem:[%s2472_s1 + $0x60] sm:$0xff]   ;;  %v1783_v16 = vld [vmem:[%s2472_s1 + $0x58] sm:$0xff]   ;;  %v1787_v20 = vld [vmem:[%s2472_s1 + $0x50] sm:$0xff]  }
   0x6   :  { %1558 = vmatprep.subr.bf16.mxu1 %v1772_v5  ;;  %v1780_v13 = vld [vmem:[%s2472_s1 + $0xe0] sm:$0xff]   ;;  %v1784_v17 = vld [vmem:[%s2472_s1 + $0xd8] sm:$0xff]   ;;  %v1788_v21 = vld [vmem:[%s2472_s1 + $0xd0] sm:$0xff]  }
   0x7   :  { %v1781_v14 = vld [vmem:[%s2472_s1 + $0x20] sm:$0xff]   ;;  %v1785_v18 = vld [vmem:[%s2472_s1 + $0x18] sm:$0xff]   ;;  %v1789_v22 = vld [vmem:[%s2472_s1 + $0x10] sm:$0xff]  }
   0x8   :  { %1489 = vmatpush3.bf16.msra.mxu0 %v1773_v6  ;;  %v1782_v15 = vld [vmem:[%s2472_s1 + $0xa0] sm:$0xff]   ;;  %v1786_v19 = vld [vmem:[%s2472_s1 + $0x98] sm:$0xff]   ;;  %v1790_v23 = vld [vmem:[%s2472_s1 + $0x90] sm:$0xff]  }
   0x9   :  { %1559 = vmatpush3.bf16.msra.mxu1 %v1774_v7  ;;  %1490 = vmatprep.subr.bf16.mxu0 %v1775_v8  ;;  %v1791_v24 = vld [vmem:[%s2472_s1 + $0x48] sm:$0xff]   ;;  %v1795_v28 = vld [vmem:[%s2472_s1 + $0x40] sm:$0xff]   ;;  %v1805_v37 = vld [vmem:[%s2472_s1 + $0x178] sm:$0xff]  }
   0xa   :  { %1560 = vmatprep.subr.bf16.mxu1 %v1776_v9  ;;  %v1792_v25 = vld [vmem:[%s2472_s1 + $0xc8] sm:$0xff]   ;;  %v1796_v29 = vld [vmem:[%s2472_s1 + $0xc0] sm:$0xff]   ;;  %v1806_v38 = vld [vmem:[%s2472_s1 + $0x138] sm:$0xff]  }
   0xb   :  { %v1793_v26 = vld [vmem:[%s2472_s1 + $0x8] sm:$0xff]   ;;  %v1797_v30 = vld [vmem:[%s2472_s1] sm:$0xff]   ;;  %v1807_v39 = vld [vmem:[%s2473_s0 + $0x3c] ss:$28 sps:$4 sm:$0xff]  }
   0xc   :  { %1491 = vmatpush3.bf16.msra.mxu0 %v1777_v10  ;;  %v1794_v27 = vld [vmem:[%s2472_s1 + $0x88] sm:$0xff]   ;;  %v1798_v31 = vld [vmem:[%s2472_s1 + $0x80] sm:$0xff]   ;;  %v1811_v41 = vld [vmem:[%s2472_s1 + $0x1b8] sm:$0xff]  }
   0xd   :  { %1561 = vmatpush3.bf16.msra.mxu1 %v1778_v11  ;;  %1492 = vmatprep.subr.bf16.mxu0 %v1779_v12  ;;  %v1799_v32 = vld [vmem:[%s2473_s0] ss:$28 sps:$4 sm:$0xff]   ;;  %v1802_v34 = vld [vmem:[%s2473_s0 + $0x8] ss:$28 sps:$4 sm:$0xff]   ;;  %v1812_v42 = vld [vmem:[%s2473_s0 + $0x38] ss:$28 sps:$4 sm:$0xff]  }
   0xe   :  { %1562 = vmatprep.subr.bf16.mxu1 %v1780_v13  ;;  %v1801_v33 = vld [vmem:[%s2473_s0 + $0x4] ss:$28 sps:$4 sm:$0xff]   ;;  %v1804_v35 = vld [vmem:[%s2473_s0 + $0xc] ss:$28 sps:$4 sm:$0xff]   ;;  %v1814_v44 = vld [vmem:[%s2472_s1 + $0x170] sm:$0xff]  }
   0xf   :  { %891 = vmatprep.mubr.bf16.mxu0 %v1801_v33  ;;  %996 = vmatprep.mubr.bf16.mxu1 %v1804_v35  ;;  %v1809_v40 = vld [vmem:[%s2473_s0 + $0x44] ss:$28 sps:$4 sm:$0xff]   ;;  %v1815_v45 = vld [vmem:[%s2472_s1 + $0x130] sm:$0xff]   ;;  %v1818_v47 = vld [vmem:[%s2473_s0 + $0x7c] ss:$28 sps:$4 sm:$0xff]  }
  0x10   :  { %1493 = vmatpush3.bf16.msra.mxu0 %v1781_v14  ;;  %v1813_v43 = vld [vmem:[%s2473_s0 + $0x40] ss:$28 sps:$4 sm:$0xff]   ;;  %v1816_v46 = vld [vmem:[%s2473_s0 + $0x74] ss:$28 sps:$4 sm:$0xff]   ;;  %v1823_v50 = vld [vmem:[%s2472_s1 + $0x168] sm:$0xff]  }
  0x11   :  { %1563 = vmatpush3.bf16.msra.mxu1 %v1782_v15  ;;  %1494 = vmatprep.subr.bf16.mxu0 %v1783_v16  ;;  %v1822_v48 = vld [vmem:[%s2472_s1 + $0x1b0] sm:$0xff]   ;;  %v1824_v51 = vld [vmem:[%s2472_s1 + $0x128] sm:$0xff]   ;;  %v1832_v56 = vld [vmem:[%s2472_s1 + $0x160] sm:$0xff]  }
  0x12   :  { %1564 = vmatprep.subr.bf16.mxu1 %v1784_v17  ;;  %v1820_v49 = vld [vmem:[%s2473_s0 + $0x70] ss:$28 sps:$4 sm:$0xff]   ;;  %v1821_v52 = vld [vmem:[%s2473_s0 + $0x78] ss:$28 sps:$4 sm:$0xff]   ;;  %v1833_v57 = vld [vmem:[%s2472_s1 + $0x120] sm:$0xff]  }
  0x13   :  { %v1825_v53 = vld [vmem:[%s2473_s0 + $0xac] ss:$28 sps:$4 sm:$0xff]   ;;  %v1827_v54 = vld [vmem:[%s2473_s0 + $0xb4] ss:$28 sps:$4 sm:$0xff]   ;;  %v1834_v60 = vld [vmem:[%s2473_s0 + $0xe4] ss:$28 sps:$4 sm:$0xff]  }
  0x14   :  { %1495 = vmatpush3.bf16.msra.mxu0 %v1785_v18  ;;  %v1831_v55 = vld [vmem:[%s2472_s1 + $0x1a8] sm:$0xff]   ;;  %v1840_v62 = vld [vmem:[%s2472_s1 + $0x1a0] sm:$0xff]   ;;  %v1841_v63 = vld [vmem:[%s2472_s1 + $0x158] sm:$0xff]  }
  0x15   :  { %1565 = vmatpush3.bf16.msra.mxu1 %v1786_v19  ;;  %1496 = vmatprep.subr.bf16.mxu0 %v1787_v20  ;;  %v1829_v58 = vld [vmem:[%s2473_s0 + $0xa8] ss:$28 sps:$4 sm:$0xff]   ;;  %v1830_v59 = vld [vmem:[%s2473_s0 + $0xb0] ss:$28 sps:$4 sm:$0xff]   ;;  %v1842_v0 = vld [vmem:[%s2472_s1 + $0x118] sm:$0xff]  }
  0x16   :  { %1566 = vmatprep.subr.bf16.mxu1 %v1788_v21  ;;  %v1836_v61 = vld [vmem:[%s2473_s0 + $0xec] ss:$28 sps:$4 sm:$0xff]   ;;  %v1838_v1 = vld [vmem:[%s2473_s0 + $0xe0] ss:$28 sps:$4 sm:$0xff]   ;;  %v1850_v4 = vld [vmem:[%s2472_s1 + $0x150] sm:$0xff]  }
  0x17   :  { %v1849_v2 = vld [vmem:[%s2472_s1 + $0x198] sm:$0xff]   ;;  %v1839_v3 = vld [vmem:[%s2473_s0 + $0xe8] ss:$28 sps:$4 sm:$0xff]   ;;  %v1851_v5 = vld [vmem:[%s2472_s1 + $0x110] sm:$0xff]  }
  0x18   :  { %1497 = vmatpush3.bf16.msra.mxu0 %v1789_v22  ;;  %v1843_v6 = vld [vmem:[%s2473_s0 + $0x11c] ss:$28 sps:$4 sm:$0xff]   ;;  %v1845_v7 = vld [vmem:[%s2473_s0 + $0x124] ss:$28 sps:$4 sm:$0xff]   ;;  %v1858_v8 = vld [vmem:[%s2472_s1 + $0x190] sm:$0xff]  }
  0x19   :  { %1567 = vmatpush3.bf16.msra.mxu1 %v1790_v23  ;;  %1498 = vmatprep.subr.bf16.mxu0 %v1791_v24  ;;  %v1859_v9 = vld [vmem:[%s2472_s1 + $0x148] sm:$0xff]   ;;  %v1847_v10 = vld [vmem:[%s2473_s0 + $0x118] ss:$28 sps:$4 sm:$0xff]   ;;  %v1848_v11 = vld [vmem:[%s2473_s0 + $0x120] ss:$28 sps:$4 sm:$0xff]  }
  0x1a   :  { %1568 = vmatprep.subr.bf16.mxu1 %v1792_v25  ;;  %v1852_v12 = vld [vmem:[%s2473_s0 + $0x154] ss:$28 sps:$4 sm:$0xff]   ;;  %v1864_v13 = vld [vmem:[%s2472_s1 + $0x108] sm:$0xff]   ;;  %v1854_v14 = vld [vmem:[%s2473_s0 + $0x15c] ss:$28 sps:$4 sm:$0xff]  }
  0x1b   :  { %v1867_v15 = vld [vmem:[%s2472_s1 + $0x188] sm:$0xff]   ;;  %v1872_v16 = vld [vmem:[%s2472_s1 + $0x140] sm:$0xff]   ;;  %v1857_v20 = vld [vmem:[%s2473_s0 + $0x158] ss:$28 sps:$4 sm:$0xff]  }
  0x1c   :  { %1499 = vmatpush3.bf16.msra.mxu0 %v1793_v26  ;;  %v1856_v17 = vld [vmem:[%s2473_s0 + $0x150] ss:$28 sps:$4 sm:$0xff]   ;;  %v1875_v18 = vld [vmem:[%s2472_s1 + $0x100] sm:$0xff]  }
  0x1d   :  { %1569 = vmatpush3.bf16.msra.mxu1 %v1794_v27  ;;  %1500 = vmatprep.subr.bf16.mxu0 %v1795_v28  ;;  %v1876_v19 = vld [vmem:[%s2472_s1 + $0x180] sm:$0xff]   ;;  %v1860_v21 = vld [vmem:[%s2473_s0 + $0x18c] ss:$28 sps:$4 sm:$0xff]   ;;  %v1862_v22 = vld [vmem:[%s2473_s0 + $0x194] ss:$28 sps:$4 sm:$0xff]  }
  0x1e   :  { %1570 = vmatprep.subr.bf16.mxu1 %v1796_v29  ;;  %v1865_v23 = vld [vmem:[%s2473_s0 + $0x188] ss:$28 sps:$4 sm:$0xff]   ;;  %v1866_v24 = vld [vmem:[%s2473_s0 + $0x190] ss:$28 sps:$4 sm:$0xff]   ;;  %v1873_v27 = vld [vmem:[%s2473_s0 + $0x1c0] ss:$28 sps:$4 sm:$0xff]  }
  0x1f   :  { %v1868_v25 = vld [vmem:[%s2473_s0 + $0x1c4] ss:$28 sps:$4 sm:$0xff]   ;;  %v1870_v26 = vld [vmem:[%s2473_s0 + $0x1cc] ss:$28 sps:$4 sm:$0xff]   ;;  %v1879_v29 = vld [vmem:[%s2473_s0 + $0x14] ss:$28 sps:$4 sm:$0xff]  }
  0x20   :  { %1501 = vmatpush3.bf16.msra.mxu0 %v1797_v30  ;;  %v1874_v28 = vld [vmem:[%s2473_s0 + $0x1c8] ss:$28 sps:$4 sm:$0xff]   ;;  %v1877_v30 = vld [vmem:[%s2473_s0 + $0x10] ss:$28 sps:$4 sm:$0xff]  }
  0x21   :  { %1571 = vmatpush3.bf16.msra.mxu1 %v1798_v31  ;;  %1626 = vmatprep.subr.bf16.mxu0 %v1805_v37  ;;  %v1880_v31 = vld [vmem:[%s2473_s0 + $0x18] ss:$28 sps:$4 sm:$0xff]   ;;  %v1883_v33 = vld [vmem:[%s2473_s0 + $0x48] ss:$28 sps:$4 sm:$0xff]   ;;  %v1887_v37 = vld [vmem:[%s2473_s0 + $0x80] ss:$28 sps:$4 sm:$0xff]  }
  0x22   :  { %1713 = vmatprep.subr.bf16.mxu1 %v1913_v36  ;;  %v1885_v35 = vld [vmem:[%s2473_s0 + $0x84] ss:$28 sps:$4 sm:$0xff]  }
  0x23   :  { %892 = vmatmul.mubr.bf16.vlgmr.msra.gmra.mxu0 %v1799_v32  ;;  %v1881_v32 = vld [vmem:[%s2473_s0 + $0x4c] ss:$28 sps:$4 sm:$0xff]  }
  0x24   :  { %997 = vmatmul.mubr.bf16.vlgmr.msra.gmra.mxu1 %v1802_v34  ;;  %1627 = vmatpush3.bf16.msra.mxu0 %v1806_v38  ;;  %v1884_v34 = vld [vmem:[%s2473_s0 + $0x50] ss:$28 sps:$4 sm:$0xff]   ;;  %v1888_v38 = vld [vmem:[%s2473_s0 + $0x88] ss:$28 sps:$4 sm:$0xff]  }
  0x25   :  { %899 = vmatprep.mubr.bf16.mxu0 %v1807_v39  ;;  %1004 = vmatprep.mubr.bf16.mxu1 %v1809_v40  ;;  %v1889_v39 = vld [vmem:[%s2473_s0 + $0xbc] ss:$28 sps:$4 sm:$0xff]  }
  0x26   :  { %1714 = vmatpush3.bf16.msra.mxu1 %v1811_v41  ;;  %1628 = vmatprep.subr.bf16.mxu0 %v1814_v44  ;;  %v1891_v40 = vld [vmem:[%s2473_s0 + $0xb8] ss:$28 sps:$4 sm:$0xff]   ;;  %v1892_v41 = vld [vmem:[%s2473_s0 + $0xc0] ss:$28 sps:$4 sm:$0xff]  }
  0x27   :  { %1715 = vmatprep.subr.bf16.mxu1 %v1913_v36  ;;  %v1896_v44 = vld [vmem:[%s2473_s0 + $0xf8] ss:$28 sps:$4 sm:$0xff]  }
  0x28   :  { %1629 = vmatpush3.bf16.msra.mxu0 %v1815_v45  ;;  %v1897_v45 = vld [vmem:[%s2473_s0 + $0x12c] ss:$28 sps:$4 sm:$0xff]  }
  0x29   :  { %1630 = vmatprep.subr.bf16.mxu0 %v1823_v50  ;;  %v1904_v50 = vld [vmem:[%s2473_s0 + $0x168] ss:$28 sps:$4 sm:$0xff]  }
  0x2a   :  { %1716 = vmatpush3.bf16.msra.mxu1 %v1822_v48  ;;  %v1901_v48 = vld [vmem:[%s2473_s0 + $0x164] ss:$28 sps:$4 sm:$0xff]  }
  0x2b   :  { %900 = vmatmul.mubr.bf16.gmra.mxu0 %v1812_v42  ;;  %1717 = vmatprep.subr.bf16.mxu1 %v1913_v36  ;;  %v1893_v42 = vld [vmem:[%s2473_s0 + $0xf4] ss:$28 sps:$4 sm:$0xff]  }
  0x2c   :  { %1005 = vmatmul.mubr.bf16.gmra.mxu1 %v1813_v43  ;;  %907 = vmatprep.mubr.bf16.mxu0 %v1816_v46  ;;  %v1895_v43 = vld [vmem:[%s2473_s0 + $0xf0] ss:$28 sps:$4 sm:$0xff]   ;;  %v1899_v46 = vld [vmem:[%s2473_s0 + $0x128] ss:$28 sps:$4 sm:$0xff]  }
  0x2d   :  { %1012 = vmatprep.mubr.bf16.mxu1 %v1818_v47  ;;  %1631 = vmatpush3.bf16.msra.mxu0 %v1824_v51  ;;  %v1900_v47 = vld [vmem:[%s2473_s0 + $0x130] ss:$28 sps:$4 sm:$0xff]   ;;  %v1905_v51 = vld [vmem:[%s2473_s0 + $0x19c] ss:$28 sps:$4 sm:$0xff]  }
  0x2e   :  { %1718 = vmatpush3.bf16.msra.mxu1 %v1831_v55  ;;  %1632 = vmatprep.subr.bf16.mxu0 %v1832_v56  ;;  %v1911_v55 = vld [vmem:[%s2473_s0 + $0x1d0] ss:$28 sps:$4 sm:$0xff]   ;;  %v1912_v56 = vld [vmem:[%s2473_s0 + $0x1d8] ss:$28 sps:$4 sm:$0xff]  }
  0x2f   :  { %1719 = vmatprep.subr.bf16.mxu1 %v1913_v36 }
  0x31   :  { %1633 = vmatpush3.bf16.msra.mxu0 %v1833_v57 }
  0x32   :  { %1720 = vmatpush3.bf16.msra.mxu1 %v1840_v62  ;;  %1634 = vmatprep.subr.bf16.mxu0 %v1841_v63 }
  0x33   :  { %908 = vmatmul.mubr.bf16.gmra.mxu0 %v1820_v49  ;;  %1721 = vmatprep.subr.bf16.mxu1 %v1913_v36  ;;  %v1903_v49 = vld [vmem:[%s2473_s0 + $0x160] ss:$28 sps:$4 sm:$0xff]  }
  0x34   :  { %1013 = vmatmul.mubr.bf16.gmra.mxu1 %v1821_v52  ;;  %915 = vmatprep.mubr.bf16.mxu0 %v1825_v53  ;;  %v1907_v52 = vld [vmem:[%s2473_s0 + $0x198] ss:$28 sps:$4 sm:$0xff]   ;;  %v1908_v53 = vld [vmem:[%s2473_s0 + $0x1a0] ss:$28 sps:$4 sm:$0xff]  }
  0x35   :  { %1020 = vmatprep.mubr.bf16.mxu1 %v1827_v54  ;;  %1635 = vmatpush3.bf16.msra.mxu0 %v1842_v0  ;;  %v1909_v54 = vld [vmem:[%s2473_s0 + $0x1d4] ss:$28 sps:$4 sm:$0xff]  }
  0x36   :  { %1722 = vmatpush3.bf16.msra.mxu1 %v1849_v2  ;;  %1636 = vmatprep.subr.bf16.mxu0 %v1850_v4 }
  0x37   :  { %1723 = vmatprep.subr.bf16.mxu1 %v1913_v36 }
  0x39   :  { %1637 = vmatpush3.bf16.msra.mxu0 %v1851_v5 }
  0x3a   :  { %1724 = vmatpush3.bf16.msra.mxu1 %v1858_v8  ;;  %1638 = vmatprep.subr.bf16.mxu0 %v1859_v9 }
  0x3b   :  { %916 = vmatmul.mubr.bf16.gmra.mxu0 %v1829_v58  ;;  %1725 = vmatprep.subr.bf16.mxu1 %v1913_v36 }
  0x3c   :  { %1021 = vmatmul.mubr.bf16.gmra.mxu1 %v1830_v59  ;;  %923 = vmatprep.mubr.bf16.mxu0 %v1834_v60 }
  0x3d   :  { %1028 = vmatprep.mubr.bf16.mxu1 %v1836_v61  ;;  %1639 = vmatpush3.bf16.msra.mxu0 %v1864_v13 }
  0x3e   :  { %1726 = vmatpush3.bf16.msra.mxu1 %v1867_v15  ;;  %1640 = vmatprep.subr.bf16.mxu0 %v1872_v16 }
  0x3f   :  { %1727 = vmatprep.subr.bf16.mxu1 %v1913_v36 }
  0x41   :  { %1641 = vmatpush3.bf16.msra.mxu0 %v1875_v18 }
  0x42   :  { %1728 = vmatpush3.bf16.msra.mxu1 %v1876_v19 }
  0x43   :  { %924 = vmatmul.mubr.bf16.gmra.mxu0 %v1838_v1 }
  0x44   :  { %1029 = vmatmul.mubr.bf16.gmra.mxu1 %v1839_v3  ;;  %931 = vmatprep.mubr.bf16.mxu0 %v1843_v6 }
  0x45   :  { %1036 = vmatprep.mubr.bf16.mxu1 %v1845_v7 }
  0x4b   :  { %932 = vmatmul.mubr.bf16.gmra.mxu0 %v1847_v10 }
  0x4c   :  { %1037 = vmatmul.mubr.bf16.gmra.mxu1 %v1848_v11  ;;  %939 = vmatprep.mubr.bf16.mxu0 %v1852_v12 }
  0x4d   :  { %1044 = vmatprep.mubr.bf16.mxu1 %v1854_v14 }
  0x53   :  { %940 = vmatmul.mubr.bf16.gmra.mxu0 %v1856_v17 }
  0x54   :  { %1045 = vmatmul.mubr.bf16.gmra.mxu1 %v1857_v20  ;;  %947 = vmatprep.mubr.bf16.mxu0 %v1860_v21 }
  0x55   :  { %1052 = vmatprep.mubr.bf16.mxu1 %v1862_v22 }
  0x5b   :  { %948 = vmatmul.mubr.bf16.gmra.mxu0 %v1865_v23 }
  0x5c   :  { %1053 = vmatmul.mubr.bf16.gmra.mxu1 %v1866_v24  ;;  %955 = vmatprep.mubr.bf16.mxu0 %v1868_v25 }
  0x5d   :  { %1060 = vmatprep.mubr.bf16.mxu1 %v1870_v26 }
  0x63   :  { %956 = vmatmul.mubr.bf16.gmra.mxu0 %v1873_v27 }
  0x64   :  { %1061 = vmatmul.mubr.bf16.gmra.mxu1 %v1874_v28  ;;  %1101 = vmatprep.mubr.bf16.mxu0 %v1879_v29 }
  0x65   :  { %1729 = vmatprep.mubr.msk.bf16.mxu1 %vm1914_vm0, %v1913_v36 }
  0x6b   :  { %1102 = vmatmul.mubr.bf16.vlgmr.msra.gmra.mxu0 %v1877_v30 }
  0x6c   :  { %1730 = vmatmul.mubr.bf16.vlgmr.msra.gmra.mxu1 %v1880_v31  ;;  %1109 = vmatprep.mubr.bf16.mxu0 %v1881_v32 }
  0x6d   :  { %1733 = vmatprep.mubr.msk.bf16.mxu1 %vm1914_vm0, %v1913_v36 }
  0x73   :  { %1110 = vmatmul.mubr.bf16.gmra.mxu0 %v1883_v33 }
  0x74   :  { %1734 = vmatmul.mubr.bf16.gmra.mxu1 %v1884_v34  ;;  %1117 = vmatprep.mubr.bf16.mxu0 %v1885_v35 }
  0x75   :  { %1737 = vmatprep.mubr.msk.bf16.mxu1 %vm1914_vm0, %v1913_v36 }
  0x7b   :  { %1118 = vmatmul.mubr.bf16.gmra.mxu0 %v1887_v37 }
  0x7c   :  { %1738 = vmatmul.mubr.bf16.gmra.mxu1 %v1888_v38  ;;  %1125 = vmatprep.mubr.bf16.mxu0 %v1889_v39 }
  0x7d   :  { %1741 = vmatprep.mubr.msk.bf16.mxu1 %vm1914_vm0, %v1913_v36 }
  0x83   :  { %1126 = vmatmul.mubr.bf16.gmra.mxu0 %v1891_v40 }
  0x84   :  { %1742 = vmatmul.mubr.bf16.gmra.mxu1 %v1892_v41  ;;  %1133 = vmatprep.mubr.bf16.mxu0 %v1893_v42 }
  0x85   :  { %1745 = vmatprep.mubr.msk.bf16.mxu1 %vm1914_vm0, %v1913_v36 }
  0x8b   :  { %1134 = vmatmul.mubr.bf16.gmra.mxu0 %v1895_v43 }
  0x8c   :  { %1746 = vmatmul.mubr.bf16.gmra.mxu1 %v1896_v44  ;;  %1141 = vmatprep.mubr.bf16.mxu0 %v1897_v45 }
  0x8d   :  { %1749 = vmatprep.mubr.msk.bf16.mxu1 %vm1914_vm0, %v1913_v36 }
  0x93   :  { %1142 = vmatmul.mubr.bf16.gmra.mxu0 %v1899_v46 }
  0x94   :  { %1750 = vmatmul.mubr.bf16.gmra.mxu1 %v1900_v47  ;;  %1149 = vmatprep.mubr.bf16.mxu0 %v1901_v48 }
  0x95   :  { %1753 = vmatprep.mubr.msk.bf16.mxu1 %vm1914_vm0, %v1913_v36 }
  0x9b   :  { %1150 = vmatmul.mubr.bf16.gmra.mxu0 %v1903_v49 }
  0x9c   :  { %1754 = vmatmul.mubr.bf16.gmra.mxu1 %v1904_v50  ;;  %1157 = vmatprep.mubr.bf16.mxu0 %v1905_v51 }
  0x9d   :  { %1757 = vmatprep.mubr.msk.bf16.mxu1 %vm1914_vm0, %v1913_v36 }
  0xa3   :  { %1158 = vmatmul.mubr.bf16.gmra.mxu0 %v1907_v52 }
  0xa4   :  { %1758 = vmatmul.mubr.bf16.gmra.mxu1 %v1908_v53  ;;  %1165 = vmatprep.mubr.bf16.mxu0 %v1909_v54 }
  0xa5   :  { %1761 = vmatprep.mubr.msk.bf16.mxu1 %vm1914_vm0, %v1913_v36 }
  0xab   :  { %1166 = vmatmul.mubr.bf16.gmra.mxu0 %v1911_v55 }
  0xac   :  { %1762 = vmatmul.mubr.bf16.gmra.mxu1 %v1912_v56 }
  0xe3   :  { %v1502_v57 = vpop.f32.mrf.mxu0 }
  0xe4   :  { %v1572_v58 = vpop.f32.mrf.mxu1 }
  0xe5   :  { %v1503_v59 = vpop.f32.mrf.mxu0 }
  0xe6   :  { %v1504_v60 = vadd.f32 %v1503_v59, %v1502_v57  ;;  %v1573_v61 = vpop.f32.mrf.mxu1 }
  0xe7   :  { %v1574_v62 = vadd.f32 %v1573_v61, %v1572_v58  ;;  %v1505_v63 = vpop.f32.mrf.mxu0 }
  0xe8   :  { %v1575_v0 = vpop.f32.mrf.mxu1 }
  0xe9   :  { %v2318_v1 = vadd.f32 %v1574_v62, %v1504_v60  ;;  %v1506_v36 = vpop.f32.mrf.mxu0 }
  0xea   :  { %v1507_v2 = vadd.f32 %v1506_v36, %v1505_v63  ;;  %v1576_v3 = vpop.f32.mrf.mxu1 }
  0xeb   :  { %v1577_v4 = vadd.f32 %v1576_v3, %v1575_v0  ;;  %v1508_v5 = vpop.f32.mrf.mxu0 }
  0xec   :  { %v1578_v6 = vpop.f32.mrf.mxu1 }
  0xed   :  { %v2320_v7 = vadd.f32 %v1577_v4, %v1507_v2  ;;  %v1509_v8 = vpop.f32.mrf.mxu0 }
  0xee   :  { %v1510_v9 = vadd.f32 %v1509_v8, %v1508_v5  ;;  %v1579_v10 = vpop.f32.mrf.mxu1 }
  0xef   :  { %v1580_v11 = vadd.f32 %v1579_v10, %v1578_v6  ;;  %v1511_v12 = vpop.f32.mrf.mxu0 }
  0xf0   :  { %v1581_v13 = vpop.f32.mrf.mxu1 }
  0xf1   :  { %v2322_v14 = vadd.f32 %v1580_v11, %v1510_v9  ;;  %v1512_v15 = vpop.f32.mrf.mxu0 }
  0xf2   :  { %v1513_v16 = vadd.f32 %v1512_v15, %v1511_v12  ;;  %v1582_v17 = vpop.f32.mrf.mxu1 }
  0xf3   :  { %v1583_v18 = vadd.f32 %v1582_v17, %v1581_v13  ;;  %v1514_v19 = vpop.f32.mrf.mxu0 }
  0xf4   :  { %v1584_v20 = vpop.f32.mrf.mxu1 }
  0xf5   :  { %v2324_v21 = vadd.f32 %v1583_v18, %v1513_v16  ;;  %v1515_v22 = vpop.f32.mrf.mxu0 }
  0xf6   :  { %v1516_v23 = vadd.f32 %v1515_v22, %v1514_v19  ;;  %v1585_v24 = vpop.f32.mrf.mxu1 }
  0xf7   :  { %v1586_v25 = vadd.f32 %v1585_v24, %v1584_v20  ;;  %v1517_v26 = vpop.f32.mrf.mxu0 }
  0xf8   :  { %v1587_v27 = vpop.f32.mrf.mxu1 }
  0xf9   :  { %v2326_v28 = vadd.f32 %v1586_v25, %v1516_v23  ;;  %v1518_v29 = vpop.f32.mrf.mxu0 }
  0xfa   :  { %v1519_v30 = vadd.f32 %v1518_v29, %v1517_v26  ;;  %v1588_v31 = vpop.f32.mrf.mxu1 }
  0xfb   :  { %v1589_v32 = vadd.f32 %v1588_v31, %v1587_v27  ;;  %v1520_v33 = vpop.f32.mrf.mxu0 }
  0xfc   :  { %v1590_v34 = vpop.f32.mrf.mxu1 }
  0xfd   :  { %v2328_v35 = vadd.f32 %v1589_v32, %v1519_v30  ;;  %v1521_v37 = vpop.f32.mrf.mxu0 }
  0xfe   :  { %v1522_v38 = vadd.f32 %v1521_v37, %v1520_v33  ;;  %v1591_v39 = vpop.f32.mrf.mxu1 }
  0xff   :  { %v1592_v40 = vadd.f32 %v1591_v39, %v1590_v34  ;;  %v1523_v41 = vpop.f32.mrf.mxu0 }
 0x100   :  { %v1593_v42 = vpop.f32.mrf.mxu1 }
 0x101   :  { %v2330_v43 = vadd.f32 %v1592_v40, %v1522_v38  ;;  %v1524_v44 = vpop.f32.mrf.mxu0 }
 0x102   :  { %v1525_v45 = vadd.f32 %v1524_v44, %v1523_v41  ;;  %v1594_v46 = vpop.f32.mrf.mxu1 }
 0x103   :  { %v1595_v47 = vadd.f32 %v1594_v46, %v1593_v42  ;;  %v1526_v48 = vpop.f32.mrf.mxu0 }
 0x104   :  { %v1596_v49 = vpop.f32.mrf.mxu1 }
 0x105   :  { %v2332_v50 = vadd.f32 %v1595_v47, %v1525_v45  ;;  %v1527_v51 = vpop.f32.mrf.mxu0 }
 0x106   :  { %v1528_v52 = vadd.f32 %v1527_v51, %v1526_v48  ;;  %v1597_v53 = vpop.f32.mrf.mxu1 }
 0x107   :  { %v1598_v54 = vadd.f32 %v1597_v53, %v1596_v49  ;;  %v1529_v55 = vpop.f32.mrf.mxu0 }
 0x108   :  { %v1599_v56 = vpop.f32.mrf.mxu1 }
 0x109   :  { %v2334_v57 = vadd.f32 %v1598_v54, %v1528_v52  ;;  %v1530_v58 = vpop.f32.mrf.mxu0 }
 0x10a   :  { %v1531_v59 = vadd.f32 %v1530_v58, %v1529_v55  ;;  %v1600_v60 = vpop.f32.mrf.mxu1 }
 0x10b   :  { %v1601_v61 = vadd.f32 %v1600_v60, %v1599_v56  ;;  %v1532_v62 = vpop.f32.mrf.mxu0 }
 0x10c   :  { %v1602_v63 = vpop.f32.mrf.mxu1 }
 0x10d   :  { %v2336_v0 = vadd.f32 %v1601_v61, %v1531_v59  ;;  %v1533_v36 = vpop.f32.mrf.mxu0 }
 0x10e   :  { %v1534_v2 = vadd.f32 %v1533_v36, %v1532_v62  ;;  %v1603_v3 = vpop.f32.mrf.mxu1 }
 0x10f   :  { %v1604_v4 = vadd.f32 %v1603_v3, %v1602_v63  ;;  %v1535_v5 = vpop.f32.mrf.mxu0 }
 0x110   :  { %v1605_v6 = vpop.f32.mrf.mxu1 }
 0x111   :  { %v2338_v8 = vadd.f32 %v1604_v4, %v1534_v2  ;;  %v1536_v9 = vpop.f32.mrf.mxu0 }
 0x112   :  { %v1537_v10 = vadd.f32 %v1536_v9, %v1535_v5  ;;  %v1606_v11 = vpop.f32.mrf.mxu1 }
 0x113   :  { %v1607_v12 = vadd.f32 %v1606_v11, %v1605_v6  ;;  %v1538_v13 = vpop.f32.mrf.mxu0  ;;  %v2358_v11 = vld [vmem:[%s2474_s2] ss:$0 sm:$0xff] }
 0x114   :  { %v1608_v15 = vpop.f32.mrf.mxu1 }
 0x115   :  { %v2340_v16 = vadd.f32 %v1607_v12, %v1537_v10  ;;  %v1539_v17 = vpop.f32.mrf.mxu0 }
 0x116   :  { %v1540_v18 = vadd.f32 %v1539_v17, %v1538_v13  ;;  %v1609_v19 = vpop.f32.mrf.mxu1 }
 0x117   :  { %v1610_v20 = vadd.f32 %v1609_v19, %v1608_v15  ;;  %v1541_v22 = vpop.f32.mrf.mxu0 }
 0x118   :  { %v1611_v23 = vpop.f32.mrf.mxu1 }
 0x119   :  { %v2342_v24 = vadd.f32 %v1610_v20, %v1540_v18  ;;  %v1542_v25 = vpop.f32.mrf.mxu0  ;;  %v2363_v18 = vld [vmem:[%s2474_s2 + $0x1] ss:$0 sm:$0xff] }
 0x11a   :  { %v1543_v26 = vadd.f32 %v1542_v25, %v1541_v22  ;;  %v1612_v27 = vpop.f32.mrf.mxu1 }
 0x11b   :  { %v1613_v29 = vadd.f32 %v1612_v27, %v1611_v23  ;;  %v1544_v30 = vpop.f32.mrf.mxu0 }
 0x11c   :  { %v1614_v31 = vpop.f32.mrf.mxu1 }
 0x11d   :  { %v2344_v32 = vadd.f32 %v1613_v29, %v1543_v26  ;;  %v1545_v33 = vpop.f32.mrf.mxu0 }
 0x11e   :  { %v1546_v34 = vadd.f32 %v1545_v33, %v1544_v30  ;;  %v1615_v37 = vpop.f32.mrf.mxu1 }
 0x11f   :  { %v1616_v38 = vadd.f32 %v1615_v37, %v1614_v31  ;;  %v1547_v39 = vpop.f32.mrf.mxu0 }
 0x120   :  { %v1617_v40 = vpop.f32.mrf.mxu1 }
 0x121   :  { %v2346_v41 = vadd.f32 %v1616_v38, %v1546_v34  ;;  %v1548_v42 = vpop.f32.mrf.mxu0 }
 0x122   :  { %v1549_v44 = vadd.f32 %v1548_v42, %v1547_v39  ;;  %v1618_v45 = vpop.f32.mrf.mxu1 }
 0x123   :  { %v1619_v46 = vadd.f32 %v1618_v45, %v1617_v40  ;;  %v1550_v47 = vpop.f32.mrf.mxu0 }
 0x124   :  { %v1620_v48 = vpop.f32.mrf.mxu1 }
 0x125   :  { %v2348_v49 = vadd.f32 %v1619_v46, %v1549_v44  ;;  %v1551_v51 = vpop.f32.mrf.mxu0 }
 0x126   :  { %v1552_v52 = vadd.f32 %v1551_v51, %v1550_v47  ;;  %v1621_v53 = vpop.f32.mrf.mxu1 }
 0x127   :  { %v1622_v54 = vadd.f32 %v1621_v53, %v1620_v48  ;;  %v1553_v55 = vpop.f32.mrf.mxu0 }
 0x128   :  { %v1623_v56 = vpop.f32.mrf.mxu1 }
 0x129   :  { %v2350_v58 = vadd.f32 %v1622_v54, %v1552_v52  ;;  %v1554_v59 = vpop.f32.mrf.mxu0 }
 0x12a   :  { %v1555_v60 = vadd.f32 %v1554_v59, %v1553_v55  ;;  %v1624_v61 = vpop.f32.mrf.mxu1 }
 0x12b   :  { %v1625_v62 = vadd.f32 %v1624_v61, %v1623_v56  ;;  %v1642_v63 = vpop.f32.mrf.mxu0 }
 0x12c   :  { %v1208_v36 = vpop.f32.mrf.mxu1 }
 0x12d   :  { %v2352_v2 = vadd.f32 %v1625_v62, %v1555_v60  ;;  %v1643_v3 = vpop.f32.mrf.mxu0 }
 0x12e   :  { %v1644_v4 = vadd.f32 %v1643_v3, %v1642_v63  ;;  %v1731_v5 = vpop.f32.mrf.mxu1 }
 0x12f   :  { %v1645_v6 = vpop.f32.mrf.mxu0 }
 0x130   :  { %v1104_v9 = vadd.f32 %v1644_v4, %v2318_v1  ;;  %v1211_v10 = vpop.f32.mrf.mxu1 }
 0x131   :  { %v1646_v12 = vpop.f32.mrf.mxu0 }
 0x132   :  { %v1209_v13 = vadd.f32 %v1208_v36, %v1104_v9  ;;  %v1647_v15 = vadd.f32 %v1646_v12, %v1645_v6  ;;  %v1732_v17 = vpop.f32.mrf.mxu1 }
 0x133   :  { %v1648_v19 = vpop.f32.mrf.mxu0 }
 0x134   :  { %v1284_v20 = vmul.f32 %v2358_v11, %v1209_v13  ;;  %v1107_v1 = vadd.f32 %v1647_v15, %v2320_v7  ;;  %v1216_v22 = vpop.f32.mrf.mxu1 }
 0x135   :  { %v1649_v23 = vpop.f32.mrf.mxu0 }
 0x136   :  { %v1307_v25 = vadd.f32 %v2363_v18, %v1284_v20  ;;  %v1212_v26 = vadd.f32 %v1211_v10, %v1107_v1  ;;  %v1650_v27 = vadd.f32 %v1649_v23, %v1648_v19  ;;  %v1735_v29 = vpop.f32.mrf.mxu1 }
 0x137   :  { %v1651_v30 = vpop.f32.mrf.mxu0 }
 0x138   :  { %v1325_v31 = vmax.f32 %v1307_v25, 0.0  ;;  %v1285_v33 = vmul.f32 %v2358_v11, %v1212_v26  ;;  %v1112_v34 = vadd.f32 %v1650_v27, %v2322_v14  ;;  %v1219_v37 = vpop.f32.mrf.mxu1 }
 0x139   :  { %v1652_v38 = vpop.f32.mrf.mxu0 }
 0x13a   :  { %1343 = vst [vmem:[%s2475_s3] sm:$0xff] %v1325_v31  ;;  %v1308_v7 = vadd.f32 %v2363_v18, %v1285_v33  ;;  %v1217_v39 = vadd.f32 %v1216_v22, %v1112_v34  ;;  %v1653_v40 = vadd.f32 %v1652_v38, %v1651_v30  ;;  %v1736_v42 = vpop.f32.mrf.mxu1 }
 0x13b   :  { %v1654_v44 = vpop.f32.mrf.mxu0 }
 0x13c   :  { %v1326_v45 = vmax.f32 %v1308_v7, 0.0  ;;  %v1286_v46 = vmul.f32 %v2358_v11, %v1217_v39  ;;  %v1115_v47 = vadd.f32 %v1653_v40, %v2324_v21  ;;  %v1224_v48 = vpop.f32.mrf.mxu1 }
 0x13d   :  { %v1655_v51 = vpop.f32.mrf.mxu0 }
 0x13e   :  { %1344 = vst [vmem:[%s2475_s3 + $0x8] sm:$0xff] %v1326_v45  ;;  %v1309_v14 = vadd.f32 %v2363_v18, %v1286_v46  ;;  %v1220_v52 = vadd.f32 %v1219_v37, %v1115_v47  ;;  %v1656_v53 = vadd.f32 %v1655_v51, %v1654_v44  ;;  %v1739_v54 = vpop.f32.mrf.mxu1 }
 0x13f   :  { %v1657_v55 = vpop.f32.mrf.mxu0 }
 0x140   :  { %v1327_v56 = vmax.f32 %v1309_v14, 0.0  ;;  %v1287_v59 = vmul.f32 %v2358_v11, %v1220_v52  ;;  %v1120_v60 = vadd.f32 %v1656_v53, %v2326_v28  ;;  %v1227_v61 = vpop.f32.mrf.mxu1 }
 0x141   :  { %v1658_v62 = vpop.f32.mrf.mxu0 }
 0x142   :  { %1345 = vst [vmem:[%s2475_s3 + $0x10] sm:$0xff] %v1327_v56  ;;  %v1310_v21 = vadd.f32 %v2363_v18, %v1287_v59  ;;  %v1225_v63 = vadd.f32 %v1224_v48, %v1120_v60  ;;  %v1659_v36 = vadd.f32 %v1658_v62, %v1657_v55  ;;  %v1740_v3 = vpop.f32.mrf.mxu1 }
 0x143   :  { %v1660_v4 = vpop.f32.mrf.mxu0 }
 0x144   :  { %v1328_v5 = vmax.f32 %v1310_v21, 0.0  ;;  %v1288_v6 = vmul.f32 %v2358_v11, %v1225_v63  ;;  %v1123_v9 = vadd.f32 %v1659_v36, %v2328_v35  ;;  %v1232_v10 = vpop.f32.mrf.mxu1 }
 0x145   :  { %v1661_v12 = vpop.f32.mrf.mxu0 }
 0x146   :  { %1346 = vst [vmem:[%s2475_s3 + $0x18] sm:$0xff] %v1328_v5  ;;  %v1311_v28 = vadd.f32 %v2363_v18, %v1288_v6  ;;  %v1228_v13 = vadd.f32 %v1227_v61, %v1123_v9  ;;  %v1662_v15 = vadd.f32 %v1661_v12, %v1660_v4  ;;  %v1743_v17 = vpop.f32.mrf.mxu1 }
 0x147   :  { %v1663_v19 = vpop.f32.mrf.mxu0 }
 0x148   :  { %v1329_v20 = vmax.f32 %v1311_v28, 0.0  ;;  %v1289_v1 = vmul.f32 %v2358_v11, %v1228_v13  ;;  %v1128_v22 = vadd.f32 %v1662_v15, %v2330_v43  ;;  %v1235_v23 = vpop.f32.mrf.mxu1 }
 0x149   :  { %v1664_v25 = vpop.f32.mrf.mxu0 }
 0x14a   :  { %1347 = vst [vmem:[%s2475_s3 + $0x20] sm:$0xff] %v1329_v20  ;;  %v1312_v35 = vadd.f32 %v2363_v18, %v1289_v1  ;;  %v1233_v26 = vadd.f32 %v1232_v10, %v1128_v22  ;;  %v1665_v27 = vadd.f32 %v1664_v25, %v1663_v19  ;;  %v1744_v29 = vpop.f32.mrf.mxu1 }
 0x14b   :  { %v1666_v30 = vpop.f32.mrf.mxu0 }
 0x14c   :  { %v1330_v31 = vmax.f32 %v1312_v35, 0.0  ;;  %v1290_v33 = vmul.f32 %v2358_v11, %v1233_v26  ;;  %v1131_v34 = vadd.f32 %v1665_v27, %v2332_v50  ;;  %v1240_v37 = vpop.f32.mrf.mxu1 }
 0x14d   :  { %v1667_v38 = vpop.f32.mrf.mxu0 }
 0x14e   :  { %1348 = vst [vmem:[%s2475_s3 + $0x28] sm:$0xff] %v1330_v31  ;;  %v1313_v43 = vadd.f32 %v2363_v18, %v1290_v33  ;;  %v1236_v7 = vadd.f32 %v1235_v23, %v1131_v34  ;;  %v1668_v39 = vadd.f32 %v1667_v38, %v1666_v30  ;;  %v1747_v40 = vpop.f32.mrf.mxu1 }
 0x14f   :  { %v1669_v42 = vpop.f32.mrf.mxu0 }
 0x150   :  { %v1331_v44 = vmax.f32 %v1313_v43, 0.0  ;;  %v1291_v45 = vmul.f32 %v2358_v11, %v1236_v7  ;;  %v1136_v46 = vadd.f32 %v1668_v39, %v2334_v57  ;;  %v1243_v47 = vpop.f32.mrf.mxu1 }
 0x151   :  { %v1670_v48 = vpop.f32.mrf.mxu0 }
 0x152   :  { %1349 = vst [vmem:[%s2475_s3 + $0x30] sm:$0xff] %v1331_v44  ;;  %v1314_v50 = vadd.f32 %v2363_v18, %v1291_v45  ;;  %v1241_v51 = vadd.f32 %v1240_v37, %v1136_v46  ;;  %v1671_v14 = vadd.f32 %v1670_v48, %v1669_v42  ;;  %v1748_v52 = vpop.f32.mrf.mxu1 }
 0x153   :  { %v1672_v53 = vpop.f32.mrf.mxu0 }
 0x154   :  { %v1332_v54 = vmax.f32 %v1314_v50, 0.0  ;;  %v1292_v55 = vmul.f32 %v2358_v11, %v1241_v51  ;;  %v1139_v56 = vadd.f32 %v1671_v14, %v2336_v0  ;;  %v1248_v59 = vpop.f32.mrf.mxu1 }
 0x155   :  { %v1673_v60 = vpop.f32.mrf.mxu0 }
 0x156   :  { %1350 = vst [vmem:[%s2475_s3 + $0x38] sm:$0xff] %v1332_v54  ;;  %v1315_v57 = vadd.f32 %v2363_v18, %v1292_v55  ;;  %v1244_v61 = vadd.f32 %v1243_v47, %v1139_v56  ;;  %v1674_v62 = vadd.f32 %v1673_v60, %v1672_v53  ;;  %v1751_v21 = vpop.f32.mrf.mxu1 }
 0x157   :  { %v1675_v63 = vpop.f32.mrf.mxu0 }
 0x158   :  { %v1333_v36 = vmax.f32 %v1315_v57, 0.0  ;;  %v1293_v3 = vmul.f32 %v2358_v11, %v1244_v61  ;;  %v1144_v4 = vadd.f32 %v1674_v62, %v2338_v8  ;;  %v1251_v5 = vpop.f32.mrf.mxu1 }
 0x159   :  { %v1676_v6 = vpop.f32.mrf.mxu0 }
 0x15a   :  { %1351 = vst [vmem:[%s2475_s3 + $0x40] sm:$0xff] %v1333_v36  ;;  %v1316_v0 = vadd.f32 %v2363_v18, %v1293_v3  ;;  %v1249_v9 = vadd.f32 %v1248_v59, %v1144_v4  ;;  %v1677_v10 = vadd.f32 %v1676_v6, %v1675_v63  ;;  %v1752_v12 = vpop.f32.mrf.mxu1 }
 0x15b   :  { %v1678_v28 = vpop.f32.mrf.mxu0 }
 0x15c   :  { %v1334_v13 = vmax.f32 %v1316_v0, 0.0  ;;  %v1294_v15 = vmul.f32 %v2358_v11, %v1249_v9  ;;  %v1147_v17 = vadd.f32 %v1677_v10, %v2340_v16  ;;  %v1256_v19 = vpop.f32.mrf.mxu1 }
 0x15d   :  { %v1679_v20 = vpop.f32.mrf.mxu0 }
 0x15e   :  { %1352 = vst [vmem:[%s2475_s3 + $0x48] sm:$0xff] %v1334_v13  ;;  %v1317_v8 = vadd.f32 %v2363_v18, %v1294_v15  ;;  %v1252_v1 = vadd.f32 %v1251_v5, %v1147_v17  ;;  %v1680_v22 = vadd.f32 %v1679_v20, %v1678_v28  ;;  %v1755_v23 = vpop.f32.mrf.mxu1 }
 0x15f   :  { %v1681_v25 = vpop.f32.mrf.mxu0 }
 0x160   :  { %v1335_v35 = vmax.f32 %v1317_v8, 0.0  ;;  %v1295_v26 = vmul.f32 %v2358_v11, %v1252_v1  ;;  %v1152_v27 = vadd.f32 %v1680_v22, %v2342_v24  ;;  %v1259_v29 = vpop.f32.mrf.mxu1 }
 0x161   :  { %v1682_v30 = vpop.f32.mrf.mxu0 }
 0x162   :  { %1353 = vst [vmem:[%s2475_s3 + $0x50] sm:$0xff] %v1335_v35  ;;  %v1318_v16 = vadd.f32 %v2363_v18, %v1295_v26  ;;  %v1257_v31 = vadd.f32 %v1256_v19, %v1152_v27  ;;  %v1683_v33 = vadd.f32 %v1682_v30, %v1681_v25  ;;  %v1756_v34 = vpop.f32.mrf.mxu1 }
 0x163   :  { %v1684_v37 = vpop.f32.mrf.mxu0 }
 0x164   :  { %v1336_v38 = vmax.f32 %v1318_v16, 0.0  ;;  %v1296_v43 = vmul.f32 %v2358_v11, %v1257_v31  ;;  %v1155_v7 = vadd.f32 %v1683_v33, %v2344_v32  ;;  %v1264_v39 = vpop.f32.mrf.mxu1 }
 0x165   :  { %v1685_v40 = vpop.f32.mrf.mxu0 }
 0x166   :  { %1354 = vst [vmem:[%s2475_s3 + $0x58] sm:$0xff] %v1336_v38  ;;  %v1319_v24 = vadd.f32 %v2363_v18, %v1296_v43  ;;  %v1260_v42 = vadd.f32 %v1259_v29, %v1155_v7  ;;  %v1686_v44 = vadd.f32 %v1685_v40, %v1684_v37  ;;  %v1759_v45 = vpop.f32.mrf.mxu1 }
 0x167   :  { %v1687_v46 = vpop.f32.mrf.mxu0 }
 0x168   :  { %v1337_v47 = vmax.f32 %v1319_v24, 0.0  ;;  %v1297_v48 = vmul.f32 %v2358_v11, %v1260_v42  ;;  %v1160_v50 = vadd.f32 %v1686_v44, %v2346_v41  ;;  %v1267_v51 = vpop.f32.mrf.mxu1 }
 0x169   :  { %v1688_v14 = vpop.f32.mrf.mxu0 }
 0x16a   :  { %1355 = vst [vmem:[%s2475_s3 + $0x60] sm:$0xff] %v1337_v47  ;;  %v1320_v32 = vadd.f32 %v2363_v18, %v1297_v48  ;;  %v1265_v52 = vadd.f32 %v1264_v39, %v1160_v50  ;;  %v1689_v53 = vadd.f32 %v1688_v14, %v1687_v46  ;;  %v1760_v54 = vpop.f32.mrf.mxu1 }
 0x16b   :  { %v1690_v55 = vpop.f32.mrf.mxu0 }
 0x16c   :  { %v1338_v56 = vmax.f32 %v1320_v32, 0.0  ;;  %v1298_v59 = vmul.f32 %v2358_v11, %v1265_v52  ;;  %v1163_v60 = vadd.f32 %v1689_v53, %v2348_v49  ;;  %v1272_v57 = vpop.f32.mrf.mxu1 }
 0x16d   :  { %v1691_v61 = vpop.f32.mrf.mxu0 }
 0x16e   :  { %1356 = vst [vmem:[%s2475_s3 + $0x68] sm:$0xff] %v1338_v56  ;;  %v1321_v41 = vadd.f32 %v2363_v18, %v1298_v59  ;;  %v1268_v62 = vadd.f32 %v1267_v51, %v1163_v60  ;;  %v1692_v21 = vadd.f32 %v1691_v61, %v1690_v55  ;;  %v1763_v63 = vpop.f32.mrf.mxu1 }
 0x16f   :  { %v1693_v36 = vpop.f32.mrf.mxu0 }
 0x170   :  { %v1339_v3 = vmax.f32 %v1321_v41, 0.0  ;;  %v1299_v4 = vmul.f32 %v2358_v11, %v1268_v62  ;;  %v1168_v5 = vadd.f32 %v1692_v21, %v2350_v58  ;;  %v1275_v6 = vpop.f32.mrf.mxu1 }
 0x171   :  { %v1694_v0 = vpop.f32.mrf.mxu0 }
 0x172   :  { %1357 = vst [vmem:[%s2475_s3 + $0x70] sm:$0xff] %v1339_v3  ;;  %v1322_v49 = vadd.f32 %v2363_v18, %v1299_v4  ;;  %v1273_v9 = vadd.f32 %v1272_v57, %v1168_v5  ;;  %v1695_v10 = vadd.f32 %v1694_v0, %v1693_v36  ;;  %v1764_v12 = vpop.f32.mrf.mxu1 }
 0x174   :  { %v1340_v28 = vmax.f32 %v1322_v49, 0.0  ;;  %v1300_v13 = vmul.f32 %v2358_v11, %v1273_v9  ;;  %v1171_v15 = vadd.f32 %v1695_v10, %v2352_v2 }
 0x176   :  { %1358 = vst [vmem:[%s2475_s3 + $0x78] sm:$0xff] %v1340_v28  ;;  %v1323_v58 = vadd.f32 %v2363_v18, %v1300_v13  ;;  %v1276_v17 = vadd.f32 %v1275_v6, %v1171_v15 }
 0x178   :  { %v1341_v19 = vmax.f32 %v1323_v58, 0.0  ;;  %v1301_v20 = vmul.f32 %v2358_v11, %v1276_v17 }
 0x17a   :  { %1359 = vst [vmem:[%s2475_s3 + $0x80] sm:$0xff] %v1341_v19  ;;  %v1324_v8 = vadd.f32 %v2363_v18, %v1301_v20 }
 0x17c   :  { %v1342_v1 = vmax.f32 %v1324_v8, 0.0 }
 0x17e   :  { %1360 = vst [vmem:[%s2475_s3 + $0x88] sm:$0xff] %v1342_v1 }

// kernel: cnn3d_forward.5
= control target key start
LH: loop header
LB: loop body
LE: loop exit
PB: predicated region body
PF: predicated region fallthrough
CT: control target
= control target key end

     0   :  { %vm4839_vm0 = vmmov 0   ;;  %s6427_s1 = inlined_call_operand.vmem [shape: bf16[3456,256], index: 1, kind: input, shape index: {}]   ;;  %s6428_s0 = inlined_call_operand.vmem [shape: bf16[8,3456], index: 0, kind: input, shape index: {}]   ;;  %s6429_s2 = inlined_call_operand.vmem [shape: f32[1,256], index: 2, kind: input, shape index: {}]   ;;  %s6430_s3 = inlined_call_operand.vmem [shape: bf16[256,128], index: 3, kind: input, shape index: {}]   ;;  %s6431_s5 = inlined_call_operand.vmem [shape: f32[128,128], index: 5, kind: input, shape index: {}]   ;;  %s6432_s4 = inlined_call_operand.vmem [shape: f32[1,128], index: 4, kind: input, shape index: {}]   ;;  %s6433_s6 = inlined_call_operand.vmem [shape: f32[1,128], index: 6, kind: input, shape index: {}]   ;;  %s6434_s7 = inlined_call_operand.vmem [shape: f32[8,128], index: 7, kind: output, shape index: {}]  }
   0x1   :  { %v4146_v0 = vld [vmem:[%s6427_s1 + $0x74] ss:$8 sps:$4 sm:$0xff]   ;;  %v4148_v1 = vld [vmem:[%s6427_s1 + $0x70] ss:$8 sps:$4 sm:$0xff]   ;;  %v4152_v4 = vld [vmem:[%s6427_s1 + $0x64] ss:$8 sps:$4 sm:$0xff]  }
   0x2   :  { %2740 = vmatprep.subr.bf16.mxu0 %v4146_v0  ;;  %v4149_v2 = vld [vmem:[%s6427_s1 + $0x174] ss:$8 sps:$4 sm:$0xff]   ;;  %v4151_v3 = vld [vmem:[%s6427_s1 + $0x170] ss:$8 sps:$4 sm:$0xff]   ;;  %v4154_v5 = vld [vmem:[%s6427_s1 + $0x60] ss:$8 sps:$4 sm:$0xff]  }
   0x3   :  { %2741 = vmatpush1.bf16.msra.mxu0 %v4148_v1  ;;  %2781 = vmatprep.subr.bf16.mxu1 %v4149_v2  ;;  %v4155_v6 = vld [vmem:[%s6427_s1 + $0x164] ss:$8 sps:$4 sm:$0xff]   ;;  %v4157_v7 = vld [vmem:[%s6427_s1 + $0x160] ss:$8 sps:$4 sm:$0xff]   ;;  %v4158_v8 = vld [vmem:[%s6427_s1 + $0x54] ss:$8 sps:$4 sm:$0xff]  }
   0x4   :  { %2782 = vmatpush1.bf16.msra.mxu1 %v4151_v3  ;;  %2742 = vmatprep.subr.bf16.mxu0 %v4152_v4  ;;  %v4160_v9 = vld [vmem:[%s6427_s1 + $0x50] ss:$8 sps:$4 sm:$0xff]   ;;  %v4161_v10 = vld [vmem:[%s6427_s1 + $0x154] ss:$8 sps:$4 sm:$0xff]   ;;  %v4164_v11 = vld [vmem:[%s6427_s1 + $0x44] ss:$8 sps:$4 sm:$0xff]  }
   0x5   :  { %2783 = vmatprep.subr.bf16.mxu1 %v4155_v6  ;;  %v4163_v12 = vld [vmem:[%s6427_s1 + $0x150] ss:$8 sps:$4 sm:$0xff]   ;;  %v4167_v13 = vld [vmem:[%s6427_s1 + $0x144] ss:$8 sps:$4 sm:$0xff]   ;;  %v4166_v14 = vld [vmem:[%s6427_s1 + $0x40] ss:$8 sps:$4 sm:$0xff]  }
   0x6   :  { %v4170_v15 = vld [vmem:[%s6427_s1 + $0x34] ss:$8 sps:$4 sm:$0xff]   ;;  %v4169_v16 = vld [vmem:[%s6427_s1 + $0x140] ss:$8 sps:$4 sm:$0xff]   ;;  %v4172_v18 = vld [vmem:[%s6427_s1 + $0x30] ss:$8 sps:$4 sm:$0xff]  }
   0x7   :  { %2743 = vmatpush1.bf16.msra.mxu0 %v4154_v5  ;;  %v4173_v17 = vld [vmem:[%s6427_s1 + $0x134] ss:$8 sps:$4 sm:$0xff]   ;;  %v4176_v19 = vld [vmem:[%s6427_s1 + $0x24] ss:$8 sps:$4 sm:$0xff]   ;;  %v4175_v20 = vld [vmem:[%s6427_s1 + $0x130] ss:$8 sps:$4 sm:$0xff]  }
   0x8   :  { %2744 = vmatprep.subr.bf16.mxu0 %v4158_v8  ;;  %2784 = vmatpush1.bf16.msra.mxu1 %v4157_v7  ;;  %v4179_v21 = vld [vmem:[%s6427_s1 + $0x124] ss:$8 sps:$4 sm:$0xff]   ;;  %v4178_v22 = vld [vmem:[%s6427_s1 + $0x20] ss:$8 sps:$4 sm:$0xff]   ;;  %v4182_v23 = vld [vmem:[%s6427_s1 + $0x14] ss:$8 sps:$4 sm:$0xff]  }
   0x9   :  { %2785 = vmatprep.subr.bf16.mxu1 %v4161_v10  ;;  %v4181_v24 = vld [vmem:[%s6427_s1 + $0x120] ss:$8 sps:$4 sm:$0xff]   ;;  %v4185_v25 = vld [vmem:[%s6427_s1 + $0x114] ss:$8 sps:$4 sm:$0xff]   ;;  %v4184_v26 = vld [vmem:[%s6427_s1 + $0x10] ss:$8 sps:$4 sm:$0xff]  }
   0xa   :  { %v4188_v27 = vld [vmem:[%s6427_s1 + $0x4] ss:$8 sps:$4 sm:$0xff]   ;;  %v4187_v28 = vld [vmem:[%s6427_s1 + $0x110] ss:$8 sps:$4 sm:$0xff]   ;;  %v4190_v30 = vld [vmem:[%s6427_s1] ss:$8 sps:$4 sm:$0xff]  }
   0xb   :  { %2745 = vmatpush1.bf16.msra.mxu0 %v4160_v9  ;;  %v4191_v29 = vld [vmem:[%s6427_s1 + $0x104] ss:$8 sps:$4 sm:$0xff]   ;;  %v4194_v31 = vld [vmem:[%s6427_s1 + $0xf4] ss:$8 sps:$4 sm:$0xff]   ;;  %v4193_v32 = vld [vmem:[%s6427_s1 + $0x100] ss:$8 sps:$4 sm:$0xff]  }
   0xc   :  { %2746 = vmatprep.subr.bf16.mxu0 %v4164_v11  ;;  %2786 = vmatpush1.bf16.msra.mxu1 %v4163_v12  ;;  %v4197_v33 = vld [vmem:[%s6427_s1 + $0x1f4] ss:$8 sps:$4 sm:$0xff]   ;;  %v4196_v34 = vld [vmem:[%s6427_s1 + $0xf0] ss:$8 sps:$4 sm:$0xff]   ;;  %v4200_v35 = vld [vmem:[%s6427_s1 + $0xe4] ss:$8 sps:$4 sm:$0xff]  }
   0xd   :  { %2787 = vmatprep.subr.bf16.mxu1 %v4167_v13  ;;  %v4199_v36 = vld [vmem:[%s6427_s1 + $0x1f0] ss:$8 sps:$4 sm:$0xff]   ;;  %v4203_v37 = vld [vmem:[%s6427_s1 + $0x1e4] ss:$8 sps:$4 sm:$0xff]   ;;  %v4202_v38 = vld [vmem:[%s6427_s1 + $0xe0] ss:$8 sps:$4 sm:$0xff]  }
   0xe   :  { %v4206_v39 = vld [vmem:[%s6427_s1 + $0xd4] ss:$8 sps:$4 sm:$0xff]   ;;  %v4205_v40 = vld [vmem:[%s6427_s1 + $0x1e0] ss:$8 sps:$4 sm:$0xff]   ;;  %v4208_v42 = vld [vmem:[%s6427_s1 + $0xd0] ss:$8 sps:$4 sm:$0xff]  }
   0xf   :  { %2747 = vmatpush1.bf16.msra.mxu0 %v4166_v14  ;;  %v4209_v41 = vld [vmem:[%s6427_s1 + $0x1d4] ss:$8 sps:$4 sm:$0xff]   ;;  %v4212_v43 = vld [vmem:[%s6427_s1 + $0xc4] ss:$8 sps:$4 sm:$0xff]   ;;  %v4211_v44 = vld [vmem:[%s6427_s1 + $0x1d0] ss:$8 sps:$4 sm:$0xff]  }
  0x10   :  { %2748 = vmatprep.subr.bf16.mxu0 %v4170_v15  ;;  %2788 = vmatpush1.bf16.msra.mxu1 %v4169_v16  ;;  %v4215_v45 = vld [vmem:[%s6427_s1 + $0x1c4] ss:$8 sps:$4 sm:$0xff]   ;;  %v4214_v47 = vld [vmem:[%s6427_s1 + $0xc0] ss:$8 sps:$4 sm:$0xff]   ;;  %v4218_v49 = vld [vmem:[%s6427_s1 + $0xb4] ss:$8 sps:$4 sm:$0xff]  }
  0x11   :  { %2789 = vmatprep.subr.bf16.mxu1 %v4173_v17  ;;  %v27_v46 = vld [vmem:[%s6428_s0] sm:$0xff]  ;;  %v28_v50 = vld [vmem:[%s6428_s0 + $0x8] sm:$0xff]  ;;  %v4221_v53 = vld [vmem:[%s6427_s1 + $0x1b4] ss:$8 sps:$4 sm:$0xff]  }
  0x12   :  { %v3593_v48 = vcombine.high %v27_v46, %v27_v46  ;;  %v4217_v51 = vld [vmem:[%s6427_s1 + $0x1c0] ss:$8 sps:$4 sm:$0xff]   ;;  %v3595_v52 = vcombine.high %v28_v50, %v28_v50  ;;  %v4220_v54 = vld [vmem:[%s6427_s1 + $0xb0] ss:$8 sps:$4 sm:$0xff]   ;;  %v4224_v55 = vld [vmem:[%s6427_s1 + $0xa4] ss:$8 sps:$4 sm:$0xff]   ;;  %v3592_v5 = vcombine.low %v27_v46, %v27_v46  ;;  %v3594_v8 = vcombine.low %v28_v50, %v28_v50 }
  0x13   :  { %2749 = vmatpush1.bf16.msra.mxu0 %v4172_v18  ;;  %v4223_v56 = vld [vmem:[%s6427_s1 + $0x1b0] ss:$8 sps:$4 sm:$0xff]   ;;  %v4227_v57 = vld [vmem:[%s6427_s1 + $0x1a4] ss:$8 sps:$4 sm:$0xff]   ;;  %v4226_v58 = vld [vmem:[%s6427_s1 + $0xa0] ss:$8 sps:$4 sm:$0xff]  }
  0x14   :  { %2750 = vmatprep.subr.bf16.mxu0 %v4176_v19  ;;  %2790 = vmatpush1.bf16.msra.mxu1 %v4175_v20  ;;  %v4230_v59 = vld [vmem:[%s6427_s1 + $0x94] ss:$8 sps:$4 sm:$0xff]   ;;  %v4229_v60 = vld [vmem:[%s6427_s1 + $0x1a0] ss:$8 sps:$4 sm:$0xff]   ;;  %v4232_v62 = vld [vmem:[%s6427_s1 + $0x90] ss:$8 sps:$4 sm:$0xff]  }
  0x15   :  { %2791 = vmatprep.subr.bf16.mxu1 %v4179_v21  ;;  %2772 = vmatprep.mubr.bf16.mxu0 %v3593_v48  ;;  %v4233_v61 = vld [vmem:[%s6427_s1 + $0x194] ss:$8 sps:$4 sm:$0xff]   ;;  %v4236_v63 = vld [vmem:[%s6427_s1 + $0x84] ss:$8 sps:$4 sm:$0xff]   ;;  %v4235_v0 = vld [vmem:[%s6427_s1 + $0x190] ss:$8 sps:$4 sm:$0xff]  }
  0x16   :  { %2813 = vmatprep.mubr.bf16.mxu1 %v3595_v52  ;;  %v4239_v1 = vld [vmem:[%s6427_s1 + $0x184] ss:$8 sps:$4 sm:$0xff]   ;;  %v4238_v2 = vld [vmem:[%s6427_s1 + $0x80] ss:$8 sps:$4 sm:$0xff]   ;;  %v4246_v3 = vld [vmem:[%s6427_s1 + $0x274] ss:$8 sps:$4 sm:$0xff]  }
  0x17   :  { %2751 = vmatpush1.bf16.msra.mxu0 %v4178_v22  ;;  %v4243_v4 = vld [vmem:[%s6427_s1 + $0x180] ss:$8 sps:$4 sm:$0xff]   ;;  %v4251_v6 = vld [vmem:[%s6427_s1 + $0x374] ss:$8 sps:$4 sm:$0xff]   ;;  %v4244_v7 = vld [vmem:[%s6427_s1 + $0x270] ss:$8 sps:$4 sm:$0xff]  }
  0x18   :  { %2752 = vmatprep.subr.bf16.mxu0 %v4182_v23  ;;  %2792 = vmatpush1.bf16.msra.mxu1 %v4181_v24  ;;  %v4254_v9 = vld [vmem:[%s6427_s1 + $0x264] ss:$8 sps:$4 sm:$0xff]   ;;  %v4249_v10 = vld [vmem:[%s6427_s1 + $0x370] ss:$8 sps:$4 sm:$0xff]   ;;  %v4252_v12 = vld [vmem:[%s6427_s1 + $0x260] ss:$8 sps:$4 sm:$0xff]  }
  0x19   :  { %2793 = vmatprep.subr.bf16.mxu1 %v4185_v25  ;;  %v4257_v11 = vld [vmem:[%s6427_s1 + $0x364] ss:$8 sps:$4 sm:$0xff]   ;;  %v4260_v13 = vld [vmem:[%s6427_s1 + $0x254] ss:$8 sps:$4 sm:$0xff]   ;;  %v4255_v14 = vld [vmem:[%s6427_s1 + $0x360] ss:$8 sps:$4 sm:$0xff]  }
  0x1a   :  { %v4263_v15 = vld [vmem:[%s6427_s1 + $0x354] ss:$8 sps:$4 sm:$0xff]   ;;  %v4258_v16 = vld [vmem:[%s6427_s1 + $0x250] ss:$8 sps:$4 sm:$0xff]   ;;  %v4266_v17 = vld [vmem:[%s6427_s1 + $0x244] ss:$8 sps:$4 sm:$0xff]  }
  0x1b   :  { %2753 = vmatpush1.bf16.msra.mxu0 %v4184_v26  ;;  %v4261_v18 = vld [vmem:[%s6427_s1 + $0x350] ss:$8 sps:$4 sm:$0xff]   ;;  %v4269_v19 = vld [vmem:[%s6427_s1 + $0x344] ss:$8 sps:$4 sm:$0xff]   ;;  %v4264_v20 = vld [vmem:[%s6427_s1 + $0x240] ss:$8 sps:$4 sm:$0xff]  }
  0x1c   :  { %2754 = vmatprep.subr.bf16.mxu0 %v4188_v27  ;;  %2794 = vmatpush1.bf16.msra.mxu1 %v4187_v28  ;;  %v4272_v21 = vld [vmem:[%s6427_s1 + $0x234] ss:$8 sps:$4 sm:$0xff]   ;;  %v4267_v22 = vld [vmem:[%s6427_s1 + $0x340] ss:$8 sps:$4 sm:$0xff]   ;;  %v4270_v24 = vld [vmem:[%s6427_s1 + $0x230] ss:$8 sps:$4 sm:$0xff]  }
  0x1d   :  { %2795 = vmatprep.subr.bf16.mxu1 %v4191_v29  ;;  %v4275_v23 = vld [vmem:[%s6427_s1 + $0x334] ss:$8 sps:$4 sm:$0xff]   ;;  %v4278_v25 = vld [vmem:[%s6427_s1 + $0x224] ss:$8 sps:$4 sm:$0xff]   ;;  %v4273_v26 = vld [vmem:[%s6427_s1 + $0x330] ss:$8 sps:$4 sm:$0xff]  }
  0x1e   :  { %v4281_v27 = vld [vmem:[%s6427_s1 + $0x324] ss:$8 sps:$4 sm:$0xff]   ;;  %v4276_v28 = vld [vmem:[%s6427_s1 + $0x220] ss:$8 sps:$4 sm:$0xff]   ;;  %v4284_v29 = vld [vmem:[%s6427_s1 + $0x214] ss:$8 sps:$4 sm:$0xff]  }
  0x1f   :  { %2755 = vmatpush1.bf16.msra.mxu0 %v4190_v30  ;;  %v4279_v30 = vld [vmem:[%s6427_s1 + $0x320] ss:$8 sps:$4 sm:$0xff]   ;;  %v4297_v46 = vld [vmem:[%s6427_s1 + $0x3f0] ss:$8 sps:$4 sm:$0xff]  }
  0x20   :  { %2756 = vmatprep.subr.bf16.mxu0 %v4194_v31  ;;  %2796 = vmatpush1.bf16.msra.mxu1 %v4193_v32  ;;  %v4287_v31 = vld [vmem:[%s6427_s1 + $0x314] ss:$8 sps:$4 sm:$0xff]   ;;  %v4300_v48 = vld [vmem:[%s6427_s1 + $0x2e0] ss:$8 sps:$4 sm:$0xff]   ;;  %v4306_v52 = vld [vmem:[%s6427_s1 + $0x2d0] ss:$8 sps:$4 sm:$0xff]  }
  0x21   :  { %2797 = vmatprep.subr.bf16.mxu1 %v4197_v33  ;;  %v5159_v32 = vld [vmem:[%s6428_s0 + $0x10] sm:$0xff]  ;;  %v4303_v50 = vld [vmem:[%s6427_s1 + $0x3e0] ss:$8 sps:$4 sm:$0xff]  }
  0x22   :  { %v4282_v33 = vld [vmem:[%s6427_s1 + $0x210] ss:$8 sps:$4 sm:$0xff]  }
  0x23   :  { %2757 = vmatpush2.bf16.msra.mxu0 %v4196_v34  ;;  %v3597_v34 = vcombine.high %v5159_v32, %v5159_v32 }
  0x24   :  { %2758 = vmatprep.subr.bf16.mxu0 %v4200_v35  ;;  %2798 = vmatpush2.bf16.msra.mxu1 %v4199_v36  ;;  %v5169_v35 = vld [vmem:[%s6428_s0 + $0x18] sm:$0xff]  ;;  %v4290_v36 = vld [vmem:[%s6427_s1 + $0x204] ss:$8 sps:$4 sm:$0xff]  }
  0x25   :  { %2799 = vmatprep.subr.bf16.mxu1 %v4203_v37  ;;  %v3599_v37 = vcombine.high %v5169_v35, %v5169_v35 }
  0x27   :  { %2759 = vmatpush2.bf16.msra.mxu0 %v4202_v38  ;;  %v4285_v38 = vld [vmem:[%s6427_s1 + $0x310] ss:$8 sps:$4 sm:$0xff]  }
  0x28   :  { %2760 = vmatprep.subr.bf16.mxu0 %v4206_v39  ;;  %2800 = vmatpush2.bf16.msra.mxu1 %v4205_v40  ;;  %v4293_v39 = vld [vmem:[%s6427_s1 + $0x304] ss:$8 sps:$4 sm:$0xff]   ;;  %v4288_v40 = vld [vmem:[%s6427_s1 + $0x200] ss:$8 sps:$4 sm:$0xff]  }
  0x29   :  { %2801 = vmatprep.subr.bf16.mxu1 %v4209_v41  ;;  %v4296_v41 = vld [vmem:[%s6427_s1 + $0x2f4] ss:$8 sps:$4 sm:$0xff]  }
  0x2b   :  { %2761 = vmatpush2.bf16.msra.mxu0 %v4208_v42  ;;  %v4291_v42 = vld [vmem:[%s6427_s1 + $0x300] ss:$8 sps:$4 sm:$0xff]  }
  0x2c   :  { %2762 = vmatprep.subr.bf16.mxu0 %v4212_v43  ;;  %2802 = vmatpush2.bf16.msra.mxu1 %v4211_v44  ;;  %v4299_v43 = vld [vmem:[%s6427_s1 + $0x3f4] ss:$8 sps:$4 sm:$0xff]   ;;  %v4294_v44 = vld [vmem:[%s6427_s1 + $0x2f0] ss:$8 sps:$4 sm:$0xff]  }
  0x2d   :  { %2803 = vmatprep.subr.bf16.mxu1 %v4215_v45  ;;  %v4302_v45 = vld [vmem:[%s6427_s1 + $0x2e4] ss:$8 sps:$4 sm:$0xff]  }
  0x2f   :  { %2763 = vmatpush2.bf16.msra.mxu0 %v4214_v47  ;;  %v4305_v47 = vld [vmem:[%s6427_s1 + $0x3e4] ss:$8 sps:$4 sm:$0xff]  }
  0x30   :  { %2764 = vmatprep.subr.bf16.mxu0 %v4218_v49  ;;  %2804 = vmatpush2.bf16.msra.mxu1 %v4217_v51  ;;  %v4308_v49 = vld [vmem:[%s6427_s1 + $0x2d4] ss:$8 sps:$4 sm:$0xff]  }
  0x31   :  { %2805 = vmatprep.subr.bf16.mxu1 %v4221_v53  ;;  %v4311_v51 = vld [vmem:[%s6427_s1 + $0x3d4] ss:$8 sps:$4 sm:$0xff]   ;;  %v4314_v53 = vld [vmem:[%s6427_s1 + $0x2c4] ss:$8 sps:$4 sm:$0xff]  }
  0x33   :  { %2765 = vmatpush2.bf16.msra.mxu0 %v4220_v54  ;;  %v4309_v54 = vld [vmem:[%s6427_s1 + $0x3d0] ss:$8 sps:$4 sm:$0xff]  }
  0x34   :  { %2766 = vmatprep.subr.bf16.mxu0 %v4224_v55  ;;  %2806 = vmatpush2.bf16.msra.mxu1 %v4223_v56  ;;  %v4317_v55 = vld [vmem:[%s6427_s1 + $0x3c4] ss:$8 sps:$4 sm:$0xff]   ;;  %v4312_v56 = vld [vmem:[%s6427_s1 + $0x2c0] ss:$8 sps:$4 sm:$0xff]  }
  0x35   :  { %2807 = vmatprep.subr.bf16.mxu1 %v4227_v57  ;;  %v4320_v57 = vld [vmem:[%s6427_s1 + $0x2b4] ss:$8 sps:$4 sm:$0xff]  }
  0x37   :  { %2767 = vmatpush2.bf16.msra.mxu0 %v4226_v58  ;;  %v4315_v58 = vld [vmem:[%s6427_s1 + $0x3c0] ss:$8 sps:$4 sm:$0xff]  }
  0x38   :  { %2768 = vmatprep.subr.bf16.mxu0 %v4230_v59  ;;  %2808 = vmatpush2.bf16.msra.mxu1 %v4229_v60  ;;  %v4323_v59 = vld [vmem:[%s6427_s1 + $0x3b4] ss:$8 sps:$4 sm:$0xff]   ;;  %v4318_v60 = vld [vmem:[%s6427_s1 + $0x2b0] ss:$8 sps:$4 sm:$0xff]  }
  0x39   :  { %2809 = vmatprep.subr.bf16.mxu1 %v4233_v61  ;;  %v4326_v61 = vld [vmem:[%s6427_s1 + $0x2a4] ss:$8 sps:$4 sm:$0xff]  }
  0x3b   :  { %2769 = vmatpush2.bf16.msra.mxu0 %v4232_v62  ;;  %v4321_v62 = vld [vmem:[%s6427_s1 + $0x3b0] ss:$8 sps:$4 sm:$0xff]  }
  0x3c   :  { %2770 = vmatprep.subr.bf16.mxu0 %v4236_v63  ;;  %2810 = vmatpush2.bf16.msra.mxu1 %v4235_v0  ;;  %v4329_v63 = vld [vmem:[%s6427_s1 + $0x3a4] ss:$8 sps:$4 sm:$0xff]   ;;  %v4324_v0 = vld [vmem:[%s6427_s1 + $0x2a0] ss:$8 sps:$4 sm:$0xff]  }
  0x3d   :  { %2811 = vmatprep.subr.bf16.mxu1 %v4239_v1  ;;  %v4332_v1 = vld [vmem:[%s6427_s1 + $0x294] ss:$8 sps:$4 sm:$0xff]  }
  0x3f   :  { %2771 = vmatpush2.bf16.msra.mxu0 %v4238_v2  ;;  %v4327_v2 = vld [vmem:[%s6427_s1 + $0x3a0] ss:$8 sps:$4 sm:$0xff]  }
  0x40   :  { %2822 = vmatprep.subr.bf16.mxu0 %v4246_v3  ;;  %2812 = vmatpush2.bf16.msra.mxu1 %v4243_v4  ;;  %v4335_v3 = vld [vmem:[%s6427_s1 + $0x394] ss:$8 sps:$4 sm:$0xff]   ;;  %v4330_v4 = vld [vmem:[%s6427_s1 + $0x290] ss:$8 sps:$4 sm:$0xff]  }
  0x41   :  { %2863 = vmatprep.subr.bf16.mxu1 %v4251_v6  ;;  %v4333_v6 = vld [vmem:[%s6427_s1 + $0x390] ss:$8 sps:$4 sm:$0xff]  }
  0x42   :  { %2773 = vmatmul.mubr.bf16.vlgmr.msra.gmra.mxu0 %v3592_v5  ;;  %v4338_v5 = vld [vmem:[%s6427_s1 + $0x284] ss:$8 sps:$4 sm:$0xff]  }
  0x43   :  { %2823 = vmatpush1.bf16.msra.mxu0 %v4244_v7  ;;  %2814 = vmatmul.mubr.bf16.vlgmr.msra.gmra.mxu1 %v3594_v8  ;;  %v4341_v7 = vld [vmem:[%s6427_s1 + $0x384] ss:$8 sps:$4 sm:$0xff]   ;;  %v4336_v8 = vld [vmem:[%s6427_s1 + $0x280] ss:$8 sps:$4 sm:$0xff]  }
  0x44   :  { %2824 = vmatprep.subr.bf16.mxu0 %v4254_v9  ;;  %2864 = vmatpush1.bf16.msra.mxu1 %v4249_v10  ;;  %v4346_v9 = vld [vmem:[%s6427_s1 + $0x474] ss:$8 sps:$4 sm:$0xff]   ;;  %v4339_v10 = vld [vmem:[%s6427_s1 + $0x380] ss:$8 sps:$4 sm:$0xff]  }
  0x45   :  { %2865 = vmatprep.subr.bf16.mxu1 %v4257_v11  ;;  %2854 = vmatprep.mubr.bf16.mxu0 %v3597_v34  ;;  %v3596_v11 = vcombine.low %v5159_v32, %v5159_v32  ;;  %v4367_v32 = vld [vmem:[%s6427_s1 + $0x540] ss:$8 sps:$4 sm:$0xff]   ;;  %v4370_v34 = vld [vmem:[%s6427_s1 + $0x430] ss:$8 sps:$4 sm:$0xff]  }
  0x46   :  { %2895 = vmatprep.mubr.bf16.mxu1 %v3599_v37  ;;  %v4381_v37 = vld [vmem:[%s6427_s1 + $0x524] ss:$8 sps:$4 sm:$0xff]  }
  0x47   :  { %2825 = vmatpush1.bf16.msra.mxu0 %v4252_v12  ;;  %v4351_v12 = vld [vmem:[%s6427_s1 + $0x574] ss:$8 sps:$4 sm:$0xff]  }
  0x48   :  { %2826 = vmatprep.subr.bf16.mxu0 %v4260_v13  ;;  %2866 = vmatpush1.bf16.msra.mxu1 %v4255_v14  ;;  %v4344_v13 = vld [vmem:[%s6427_s1 + $0x470] ss:$8 sps:$4 sm:$0xff]   ;;  %v3598_v14 = vcombine.low %v5169_v35, %v5169_v35  ;;  %v4378_v35 = vld [vmem:[%s6427_s1 + $0x424] ss:$8 sps:$4 sm:$0xff]  }
  0x49   :  { %2867 = vmatprep.subr.bf16.mxu1 %v4263_v15  ;;  %v4354_v15 = vld [vmem:[%s6427_s1 + $0x464] ss:$8 sps:$4 sm:$0xff]  }
  0x4b   :  { %2827 = vmatpush1.bf16.msra.mxu0 %v4258_v16  ;;  %v4349_v16 = vld [vmem:[%s6427_s1 + $0x570] ss:$8 sps:$4 sm:$0xff]  }
  0x4c   :  { %2828 = vmatprep.subr.bf16.mxu0 %v4266_v17  ;;  %2868 = vmatpush1.bf16.msra.mxu1 %v4261_v18  ;;  %v5306_v17 = vld [vmem:[%s6428_s0 + $0x20] sm:$0xff] }
  0x4d   :  { %2869 = vmatprep.subr.bf16.mxu1 %v4269_v19  ;;  %v4352_v18 = vld [vmem:[%s6427_s1 + $0x460] ss:$8 sps:$4 sm:$0xff]   ;;  %v4357_v19 = vld [vmem:[%s6427_s1 + $0x564] ss:$8 sps:$4 sm:$0xff]  }
  0x4f   :  { %2829 = vmatpush1.bf16.msra.mxu0 %v4264_v20  ;;  %v3601_v20 = vcombine.high %v5306_v17, %v5306_v17 }
  0x50   :  { %2830 = vmatprep.subr.bf16.mxu0 %v4272_v21  ;;  %2870 = vmatpush1.bf16.msra.mxu1 %v4267_v22  ;;  %v5319_v21 = vld [vmem:[%s6428_s0 + $0x28] sm:$0xff]  ;;  %v4360_v22 = vld [vmem:[%s6427_s1 + $0x454] ss:$8 sps:$4 sm:$0xff]  }
  0x51   :  { %2871 = vmatprep.subr.bf16.mxu1 %v4275_v23  ;;  %v3603_v23 = vcombine.high %v5319_v21, %v5319_v21 }
  0x53   :  { %2831 = vmatpush1.bf16.msra.mxu0 %v4270_v24  ;;  %v4355_v24 = vld [vmem:[%s6427_s1 + $0x560] ss:$8 sps:$4 sm:$0xff]  }
  0x54   :  { %2832 = vmatprep.subr.bf16.mxu0 %v4278_v25  ;;  %2872 = vmatpush1.bf16.msra.mxu1 %v4273_v26  ;;  %v4363_v25 = vld [vmem:[%s6427_s1 + $0x554] ss:$8 sps:$4 sm:$0xff]   ;;  %v4358_v26 = vld [vmem:[%s6427_s1 + $0x450] ss:$8 sps:$4 sm:$0xff]  }
  0x55   :  { %2873 = vmatprep.subr.bf16.mxu1 %v4281_v27  ;;  %v4366_v27 = vld [vmem:[%s6427_s1 + $0x444] ss:$8 sps:$4 sm:$0xff]  }
  0x57   :  { %2833 = vmatpush1.bf16.msra.mxu0 %v4276_v28  ;;  %v4361_v28 = vld [vmem:[%s6427_s1 + $0x550] ss:$8 sps:$4 sm:$0xff]  }
  0x58   :  { %2834 = vmatprep.subr.bf16.mxu0 %v4284_v29  ;;  %2874 = vmatpush1.bf16.msra.mxu1 %v4279_v30  ;;  %v4369_v29 = vld [vmem:[%s6427_s1 + $0x544] ss:$8 sps:$4 sm:$0xff]   ;;  %v4364_v30 = vld [vmem:[%s6427_s1 + $0x440] ss:$8 sps:$4 sm:$0xff]  }
  0x59   :  { %2875 = vmatprep.subr.bf16.mxu1 %v4287_v31  ;;  %v4372_v31 = vld [vmem:[%s6427_s1 + $0x434] ss:$8 sps:$4 sm:$0xff]  }
  0x5b   :  { %2835 = vmatpush1.bf16.msra.mxu0 %v4282_v33  ;;  %v4375_v33 = vld [vmem:[%s6427_s1 + $0x534] ss:$8 sps:$4 sm:$0xff]  }
  0x5c   :  { %2836 = vmatprep.subr.bf16.mxu0 %v4290_v36  ;;  %2876 = vmatpush1.bf16.msra.mxu1 %v4285_v38  ;;  %v4373_v36 = vld [vmem:[%s6427_s1 + $0x530] ss:$8 sps:$4 sm:$0xff]   ;;  %v4376_v38 = vld [vmem:[%s6427_s1 + $0x420] ss:$8 sps:$4 sm:$0xff]  }
  0x5d   :  { %2877 = vmatprep.subr.bf16.mxu1 %v4293_v39  ;;  %v4384_v39 = vld [vmem:[%s6427_s1 + $0x414] ss:$8 sps:$4 sm:$0xff]  }
  0x5f   :  { %2837 = vmatpush1.bf16.msra.mxu0 %v4288_v40  ;;  %v4379_v40 = vld [vmem:[%s6427_s1 + $0x520] ss:$8 sps:$4 sm:$0xff]  }
  0x60   :  { %2838 = vmatprep.subr.bf16.mxu0 %v4296_v41  ;;  %2878 = vmatpush1.bf16.msra.mxu1 %v4291_v42  ;;  %v4387_v41 = vld [vmem:[%s6427_s1 + $0x514] ss:$8 sps:$4 sm:$0xff]   ;;  %v4382_v42 = vld [vmem:[%s6427_s1 + $0x410] ss:$8 sps:$4 sm:$0xff]  }
  0x61   :  { %2879 = vmatprep.subr.bf16.mxu1 %v4299_v43  ;;  %v4390_v43 = vld [vmem:[%s6427_s1 + $0x404] ss:$8 sps:$4 sm:$0xff]  }
  0x63   :  { %2839 = vmatpush2.bf16.msra.mxu0 %v4294_v44  ;;  %v4385_v44 = vld [vmem:[%s6427_s1 + $0x510] ss:$8 sps:$4 sm:$0xff]  }
  0x64   :  { %2840 = vmatprep.subr.bf16.mxu0 %v4302_v45  ;;  %2880 = vmatpush2.bf16.msra.mxu1 %v4297_v46  ;;  %v4393_v45 = vld [vmem:[%s6427_s1 + $0x504] ss:$8 sps:$4 sm:$0xff]   ;;  %v4388_v46 = vld [vmem:[%s6427_s1 + $0x400] ss:$8 sps:$4 sm:$0xff]  }
  0x65   :  { %2881 = vmatprep.subr.bf16.mxu1 %v4305_v47  ;;  %v4396_v47 = vld [vmem:[%s6427_s1 + $0x4f4] ss:$8 sps:$4 sm:$0xff]  }
  0x67   :  { %2841 = vmatpush2.bf16.msra.mxu0 %v4300_v48  ;;  %v4391_v48 = vld [vmem:[%s6427_s1 + $0x500] ss:$8 sps:$4 sm:$0xff]  }
  0x68   :  { %2842 = vmatprep.subr.bf16.mxu0 %v4308_v49  ;;  %2882 = vmatpush2.bf16.msra.mxu1 %v4303_v50  ;;  %v4399_v49 = vld [vmem:[%s6427_s1 + $0x5f4] ss:$8 sps:$4 sm:$0xff]   ;;  %v4394_v50 = vld [vmem:[%s6427_s1 + $0x4f0] ss:$8 sps:$4 sm:$0xff]  }
  0x69   :  { %2883 = vmatprep.subr.bf16.mxu1 %v4311_v51  ;;  %v4402_v51 = vld [vmem:[%s6427_s1 + $0x4e4] ss:$8 sps:$4 sm:$0xff]  }
  0x6b   :  { %2843 = vmatpush2.bf16.msra.mxu0 %v4306_v52  ;;  %v4397_v52 = vld [vmem:[%s6427_s1 + $0x5f0] ss:$8 sps:$4 sm:$0xff]  }
  0x6c   :  { %2844 = vmatprep.subr.bf16.mxu0 %v4314_v53  ;;  %2884 = vmatpush2.bf16.msra.mxu1 %v4309_v54  ;;  %v4405_v53 = vld [vmem:[%s6427_s1 + $0x5e4] ss:$8 sps:$4 sm:$0xff]   ;;  %v4400_v54 = vld [vmem:[%s6427_s1 + $0x4e0] ss:$8 sps:$4 sm:$0xff]  }
  0x6d   :  { %2885 = vmatprep.subr.bf16.mxu1 %v4317_v55  ;;  %v4408_v55 = vld [vmem:[%s6427_s1 + $0x4d4] ss:$8 sps:$4 sm:$0xff]  }
  0x6f   :  { %2845 = vmatpush2.bf16.msra.mxu0 %v4312_v56  ;;  %v4403_v56 = vld [vmem:[%s6427_s1 + $0x5e0] ss:$8 sps:$4 sm:$0xff]  }
  0x70   :  { %2846 = vmatprep.subr.bf16.mxu0 %v4320_v57  ;;  %2886 = vmatpush2.bf16.msra.mxu1 %v4315_v58  ;;  %v4411_v57 = vld [vmem:[%s6427_s1 + $0x5d4] ss:$8 sps:$4 sm:$0xff]   ;;  %v4406_v58 = vld [vmem:[%s6427_s1 + $0x4d0] ss:$8 sps:$4 sm:$0xff]  }
  0x71   :  { %2887 = vmatprep.subr.bf16.mxu1 %v4323_v59  ;;  %v4414_v59 = vld [vmem:[%s6427_s1 + $0x4c4] ss:$8 sps:$4 sm:$0xff]  }
  0x73   :  { %2847 = vmatpush2.bf16.msra.mxu0 %v4318_v60  ;;  %v4409_v60 = vld [vmem:[%s6427_s1 + $0x5d0] ss:$8 sps:$4 sm:$0xff]  }
  0x74   :  { %2848 = vmatprep.subr.bf16.mxu0 %v4326_v61  ;;  %2888 = vmatpush2.bf16.msra.mxu1 %v4321_v62  ;;  %v4417_v61 = vld [vmem:[%s6427_s1 + $0x5c4] ss:$8 sps:$4 sm:$0xff]   ;;  %v4412_v62 = vld [vmem:[%s6427_s1 + $0x4c0] ss:$8 sps:$4 sm:$0xff]  }
  0x75   :  { %2889 = vmatprep.subr.bf16.mxu1 %v4329_v63  ;;  %v4420_v63 = vld [vmem:[%s6427_s1 + $0x4b4] ss:$8 sps:$4 sm:$0xff]  }
  0x77   :  { %2849 = vmatpush2.bf16.msra.mxu0 %v4324_v0  ;;  %v4415_v0 = vld [vmem:[%s6427_s1 + $0x5c0] ss:$8 sps:$4 sm:$0xff]  }
  0x78   :  { %2850 = vmatprep.subr.bf16.mxu0 %v4332_v1  ;;  %2890 = vmatpush2.bf16.msra.mxu1 %v4327_v2  ;;  %v4423_v1 = vld [vmem:[%s6427_s1 + $0x5b4] ss:$8 sps:$4 sm:$0xff]   ;;  %v4418_v2 = vld [vmem:[%s6427_s1 + $0x4b0] ss:$8 sps:$4 sm:$0xff]  }
  0x79   :  { %2891 = vmatprep.subr.bf16.mxu1 %v4335_v3  ;;  %v4426_v3 = vld [vmem:[%s6427_s1 + $0x4a4] ss:$8 sps:$4 sm:$0xff]  }
  0x7b   :  { %2851 = vmatpush2.bf16.msra.mxu0 %v4330_v4  ;;  %v4421_v4 = vld [vmem:[%s6427_s1 + $0x5b0] ss:$8 sps:$4 sm:$0xff]  }
  0x7c   :  { %2852 = vmatprep.subr.bf16.mxu0 %v4338_v5  ;;  %2892 = vmatpush2.bf16.msra.mxu1 %v4333_v6  ;;  %v4429_v5 = vld [vmem:[%s6427_s1 + $0x5a4] ss:$8 sps:$4 sm:$0xff]   ;;  %v4424_v6 = vld [vmem:[%s6427_s1 + $0x4a0] ss:$8 sps:$4 sm:$0xff]  }
  0x7d   :  { %2893 = vmatprep.subr.bf16.mxu1 %v4341_v7  ;;  %v4432_v7 = vld [vmem:[%s6427_s1 + $0x494] ss:$8 sps:$4 sm:$0xff]  }
  0x7f   :  { %2853 = vmatpush2.bf16.msra.mxu0 %v4336_v8  ;;  %v4427_v8 = vld [vmem:[%s6427_s1 + $0x5a0] ss:$8 sps:$4 sm:$0xff]  }
  0x80   :  { %2904 = vmatprep.subr.bf16.mxu0 %v4346_v9  ;;  %2894 = vmatpush2.bf16.msra.mxu1 %v4339_v10  ;;  %v4435_v9 = vld [vmem:[%s6427_s1 + $0x594] ss:$8 sps:$4 sm:$0xff]   ;;  %v4430_v10 = vld [vmem:[%s6427_s1 + $0x490] ss:$8 sps:$4 sm:$0xff]  }
  0x81   :  { %2945 = vmatprep.subr.bf16.mxu1 %v4351_v12  ;;  %v4433_v12 = vld [vmem:[%s6427_s1 + $0x590] ss:$8 sps:$4 sm:$0xff]  }
  0x82   :  { %2855 = vmatmul.mubr.bf16.vlgmr.msra.gmra.mxu0 %v3596_v11  ;;  %v4438_v11 = vld [vmem:[%s6427_s1 + $0x484] ss:$8 sps:$4 sm:$0xff]  }
  0x83   :  { %2905 = vmatpush1.bf16.msra.mxu0 %v4344_v13  ;;  %2896 = vmatmul.mubr.bf16.vlgmr.msra.gmra.mxu1 %v3598_v14  ;;  %v4436_v13 = vld [vmem:[%s6427_s1 + $0x480] ss:$8 sps:$4 sm:$0xff]   ;;  %v4441_v14 = vld [vmem:[%s6427_s1 + $0x584] ss:$8 sps:$4 sm:$0xff]  }
  0x84   :  { %2906 = vmatprep.subr.bf16.mxu0 %v4354_v15  ;;  %2946 = vmatpush1.bf16.msra.mxu1 %v4349_v16  ;;  %v4446_v15 = vld [vmem:[%s6427_s1 + $0x674] ss:$8 sps:$4 sm:$0xff]  }
  0x85   :  { %2936 = vmatprep.mubr.bf16.mxu0 %v3601_v20  ;;  %2947 = vmatprep.subr.bf16.mxu1 %v4357_v19  ;;  %v5497_v16 = vld [vmem:[%s6428_s0 + $0x30] sm:$0xff]  ;;  %v3600_v19 = vcombine.low %v5306_v17, %v5306_v17  ;;  %v3602_v17 = vcombine.low %v5319_v21, %v5319_v21  ;;  %v4452_v21 = vld [vmem:[%s6427_s1 + $0x660] ss:$8 sps:$4 sm:$0xff]  }
  0x86   :  { %2977 = vmatprep.mubr.bf16.mxu1 %v3603_v23  ;;  %v4451_v20 = vld [vmem:[%s6427_s1 + $0x774] ss:$8 sps:$4 sm:$0xff]   ;;  %v4444_v23 = vld [vmem:[%s6427_s1 + $0x670] ss:$8 sps:$4 sm:$0xff]  }
  0x87   :  { %2907 = vmatpush1.bf16.msra.mxu0 %v4352_v18  ;;  %v4439_v18 = vld [vmem:[%s6427_s1 + $0x580] ss:$8 sps:$4 sm:$0xff]  }
  0x88   :  { %2908 = vmatprep.subr.bf16.mxu0 %v4360_v22  ;;  %2948 = vmatpush1.bf16.msra.mxu1 %v4355_v24  ;;  %v5510_v22 = vld [vmem:[%s6428_s0 + $0x38] sm:$0xff]  ;;  %v3605_v24 = vcombine.high %v5497_v16, %v5497_v16 }
  0x89   :  { %2949 = vmatprep.subr.bf16.mxu1 %v4363_v25  ;;  %v4454_v25 = vld [vmem:[%s6427_s1 + $0x664] ss:$8 sps:$4 sm:$0xff]  }
  0x8b   :  { %2909 = vmatpush1.bf16.msra.mxu0 %v4358_v26  ;;  %v4449_v26 = vld [vmem:[%s6427_s1 + $0x770] ss:$8 sps:$4 sm:$0xff]  }
  0x8c   :  { %2910 = vmatprep.subr.bf16.mxu0 %v4366_v27  ;;  %2950 = vmatpush1.bf16.msra.mxu1 %v4361_v28  ;;  %v3607_v27 = vcombine.high %v5510_v22, %v5510_v22  ;;  %v4457_v28 = vld [vmem:[%s6427_s1 + $0x764] ss:$8 sps:$4 sm:$0xff]  }
  0x8d   :  { %2951 = vmatprep.subr.bf16.mxu1 %v4369_v29  ;;  %v4460_v29 = vld [vmem:[%s6427_s1 + $0x654] ss:$8 sps:$4 sm:$0xff]  }
  0x8f   :  { %2911 = vmatpush1.bf16.msra.mxu0 %v4364_v30  ;;  %v4455_v30 = vld [vmem:[%s6427_s1 + $0x760] ss:$8 sps:$4 sm:$0xff]  }
  0x90   :  { %2912 = vmatprep.subr.bf16.mxu0 %v4372_v31  ;;  %2952 = vmatpush1.bf16.msra.mxu1 %v4367_v32  ;;  %v4463_v31 = vld [vmem:[%s6427_s1 + $0x754] ss:$8 sps:$4 sm:$0xff]   ;;  %v4458_v32 = vld [vmem:[%s6427_s1 + $0x650] ss:$8 sps:$4 sm:$0xff]  }
  0x91   :  { %2953 = vmatprep.subr.bf16.mxu1 %v4375_v33  ;;  %v4466_v33 = vld [vmem:[%s6427_s1 + $0x644] ss:$8 sps:$4 sm:$0xff]  }
  0x93   :  { %2913 = vmatpush1.bf16.msra.mxu0 %v4370_v34  ;;  %v4461_v34 = vld [vmem:[%s6427_s1 + $0x750] ss:$8 sps:$4 sm:$0xff]  }
  0x94   :  { %2914 = vmatprep.subr.bf16.mxu0 %v4378_v35  ;;  %2954 = vmatpush1.bf16.msra.mxu1 %v4373_v36  ;;  %v4469_v35 = vld [vmem:[%s6427_s1 + $0x744] ss:$8 sps:$4 sm:$0xff]   ;;  %v4464_v36 = vld [vmem:[%s6427_s1 + $0x640] ss:$8 sps:$4 sm:$0xff]  }
  0x95   :  { %2955 = vmatprep.subr.bf16.mxu1 %v4381_v37  ;;  %v4472_v37 = vld [vmem:[%s6427_s1 + $0x634] ss:$8 sps:$4 sm:$0xff]  }
  0x97   :  { %2915 = vmatpush1.bf16.msra.mxu0 %v4376_v38  ;;  %v4467_v38 = vld [vmem:[%s6427_s1 + $0x740] ss:$8 sps:$4 sm:$0xff]  }
  0x98   :  { %2916 = vmatprep.subr.bf16.mxu0 %v4384_v39  ;;  %2956 = vmatpush1.bf16.msra.mxu1 %v4379_v40  ;;  %v4475_v39 = vld [vmem:[%s6427_s1 + $0x734] ss:$8 sps:$4 sm:$0xff]   ;;  %v4470_v40 = vld [vmem:[%s6427_s1 + $0x630] ss:$8 sps:$4 sm:$0xff]  }
  0x99   :  { %2957 = vmatprep.subr.bf16.mxu1 %v4387_v41  ;;  %v4478_v41 = vld [vmem:[%s6427_s1 + $0x624] ss:$8 sps:$4 sm:$0xff]  }
  0x9b   :  { %2917 = vmatpush1.bf16.msra.mxu0 %v4382_v42  ;;  %v4473_v42 = vld [vmem:[%s6427_s1 + $0x730] ss:$8 sps:$4 sm:$0xff]  }
  0x9c   :  { %2918 = vmatprep.subr.bf16.mxu0 %v4390_v43  ;;  %2958 = vmatpush1.bf16.msra.mxu1 %v4385_v44  ;;  %v4481_v43 = vld [vmem:[%s6427_s1 + $0x724] ss:$8 sps:$4 sm:$0xff]   ;;  %v4476_v44 = vld [vmem:[%s6427_s1 + $0x620] ss:$8 sps:$4 sm:$0xff]  }
  0x9d   :  { %2959 = vmatprep.subr.bf16.mxu1 %v4393_v45  ;;  %v4484_v45 = vld [vmem:[%s6427_s1 + $0x614] ss:$8 sps:$4 sm:$0xff]  }
  0x9f   :  { %2919 = vmatpush1.bf16.msra.mxu0 %v4388_v46  ;;  %v4479_v46 = vld [vmem:[%s6427_s1 + $0x720] ss:$8 sps:$4 sm:$0xff]  }
  0xa0   :  { %2920 = vmatprep.subr.bf16.mxu0 %v4396_v47  ;;  %2960 = vmatpush1.bf16.msra.mxu1 %v4391_v48  ;;  %v4487_v47 = vld [vmem:[%s6427_s1 + $0x714] ss:$8 sps:$4 sm:$0xff]   ;;  %v4482_v48 = vld [vmem:[%s6427_s1 + $0x610] ss:$8 sps:$4 sm:$0xff]  }
  0xa1   :  { %2961 = vmatprep.subr.bf16.mxu1 %v4399_v49  ;;  %v4490_v49 = vld [vmem:[%s6427_s1 + $0x604] ss:$8 sps:$4 sm:$0xff]  }
  0xa3   :  { %2921 = vmatpush2.bf16.msra.mxu0 %v4394_v50  ;;  %v4485_v50 = vld [vmem:[%s6427_s1 + $0x710] ss:$8 sps:$4 sm:$0xff]  }
  0xa4   :  { %2922 = vmatprep.subr.bf16.mxu0 %v4402_v51  ;;  %2962 = vmatpush2.bf16.msra.mxu1 %v4397_v52  ;;  %v4493_v51 = vld [vmem:[%s6427_s1 + $0x704] ss:$8 sps:$4 sm:$0xff]   ;;  %v4488_v52 = vld [vmem:[%s6427_s1 + $0x600] ss:$8 sps:$4 sm:$0xff]  }
  0xa5   :  { %2963 = vmatprep.subr.bf16.mxu1 %v4405_v53  ;;  %v4496_v53 = vld [vmem:[%s6427_s1 + $0x6f4] ss:$8 sps:$4 sm:$0xff]  }
  0xa7   :  { %2923 = vmatpush2.bf16.msra.mxu0 %v4400_v54  ;;  %v4491_v54 = vld [vmem:[%s6427_s1 + $0x700] ss:$8 sps:$4 sm:$0xff]  }
  0xa8   :  { %2924 = vmatprep.subr.bf16.mxu0 %v4408_v55  ;;  %2964 = vmatpush2.bf16.msra.mxu1 %v4403_v56  ;;  %v4499_v55 = vld [vmem:[%s6427_s1 + $0x7f4] ss:$8 sps:$4 sm:$0xff]   ;;  %v4494_v56 = vld [vmem:[%s6427_s1 + $0x6f0] ss:$8 sps:$4 sm:$0xff]  }
  0xa9   :  { %2965 = vmatprep.subr.bf16.mxu1 %v4411_v57  ;;  %v4502_v57 = vld [vmem:[%s6427_s1 + $0x6e4] ss:$8 sps:$4 sm:$0xff]  }
  0xab   :  { %2925 = vmatpush2.bf16.msra.mxu0 %v4406_v58  ;;  %v4497_v58 = vld [vmem:[%s6427_s1 + $0x7f0] ss:$8 sps:$4 sm:$0xff]  }
  0xac   :  { %2926 = vmatprep.subr.bf16.mxu0 %v4414_v59  ;;  %2966 = vmatpush2.bf16.msra.mxu1 %v4409_v60  ;;  %v4505_v59 = vld [vmem:[%s6427_s1 + $0x7e4] ss:$8 sps:$4 sm:$0xff]   ;;  %v4500_v60 = vld [vmem:[%s6427_s1 + $0x6e0] ss:$8 sps:$4 sm:$0xff]  }
  0xad   :  { %2967 = vmatprep.subr.bf16.mxu1 %v4417_v61  ;;  %v4508_v61 = vld [vmem:[%s6427_s1 + $0x6d4] ss:$8 sps:$4 sm:$0xff]  }
  0xaf   :  { %2927 = vmatpush2.bf16.msra.mxu0 %v4412_v62  ;;  %v4503_v62 = vld [vmem:[%s6427_s1 + $0x7e0] ss:$8 sps:$4 sm:$0xff]  }
  0xb0   :  { %2928 = vmatprep.subr.bf16.mxu0 %v4420_v63  ;;  %2968 = vmatpush2.bf16.msra.mxu1 %v4415_v0  ;;  %v4511_v63 = vld [vmem:[%s6427_s1 + $0x7d4] ss:$8 sps:$4 sm:$0xff]   ;;  %v4506_v0 = vld [vmem:[%s6427_s1 + $0x6d0] ss:$8 sps:$4 sm:$0xff]  }
  0xb1   :  { %2969 = vmatprep.subr.bf16.mxu1 %v4423_v1  ;;  %v4514_v1 = vld [vmem:[%s6427_s1 + $0x6c4] ss:$8 sps:$4 sm:$0xff]  }
  0xb3   :  { %2929 = vmatpush2.bf16.msra.mxu0 %v4418_v2  ;;  %v4509_v2 = vld [vmem:[%s6427_s1 + $0x7d0] ss:$8 sps:$4 sm:$0xff]  }
  0xb4   :  { %2930 = vmatprep.subr.bf16.mxu0 %v4426_v3  ;;  %2970 = vmatpush2.bf16.msra.mxu1 %v4421_v4  ;;  %v4517_v3 = vld [vmem:[%s6427_s1 + $0x7c4] ss:$8 sps:$4 sm:$0xff]   ;;  %v4512_v4 = vld [vmem:[%s6427_s1 + $0x6c0] ss:$8 sps:$4 sm:$0xff]  }
  0xb5   :  { %2971 = vmatprep.subr.bf16.mxu1 %v4429_v5  ;;  %v4520_v5 = vld [vmem:[%s6427_s1 + $0x6b4] ss:$8 sps:$4 sm:$0xff]  }
  0xb7   :  { %2931 = vmatpush2.bf16.msra.mxu0 %v4424_v6  ;;  %v4515_v6 = vld [vmem:[%s6427_s1 + $0x7c0] ss:$8 sps:$4 sm:$0xff]  }
  0xb8   :  { %2932 = vmatprep.subr.bf16.mxu0 %v4432_v7  ;;  %2972 = vmatpush2.bf16.msra.mxu1 %v4427_v8  ;;  %v4523_v7 = vld [vmem:[%s6427_s1 + $0x7b4] ss:$8 sps:$4 sm:$0xff]   ;;  %v4518_v8 = vld [vmem:[%s6427_s1 + $0x6b0] ss:$8 sps:$4 sm:$0xff]  }
  0xb9   :  { %2973 = vmatprep.subr.bf16.mxu1 %v4435_v9  ;;  %v4526_v9 = vld [vmem:[%s6427_s1 + $0x6a4] ss:$8 sps:$4 sm:$0xff]  }
  0xbb   :  { %2933 = vmatpush2.bf16.msra.mxu0 %v4430_v10  ;;  %v4521_v10 = vld [vmem:[%s6427_s1 + $0x7b0] ss:$8 sps:$4 sm:$0xff]  }
  0xbc   :  { %2934 = vmatprep.subr.bf16.mxu0 %v4438_v11  ;;  %2974 = vmatpush2.bf16.msra.mxu1 %v4433_v12  ;;  %v4529_v11 = vld [vmem:[%s6427_s1 + $0x7a4] ss:$8 sps:$4 sm:$0xff]   ;;  %v4524_v12 = vld [vmem:[%s6427_s1 + $0x6a0] ss:$8 sps:$4 sm:$0xff]  }
  0xbd   :  { %2975 = vmatprep.subr.bf16.mxu1 %v4441_v14  ;;  %v4532_v14 = vld [vmem:[%s6427_s1 + $0x694] ss:$8 sps:$4 sm:$0xff]  }
  0xbf   :  { %2935 = vmatpush2.bf16.msra.mxu0 %v4436_v13  ;;  %v475_v13 = vlaneseq }
  0xc0   :  { %2986 = vmatprep.subr.bf16.mxu0 %v4446_v15  ;;  %2976 = vmatpush2.bf16.msra.mxu1 %v4439_v18  ;;  %v4527_v15 = vld [vmem:[%s6427_s1 + $0x7a0] ss:$8 sps:$4 sm:$0xff]   ;;  %v4535_v18 = vld [vmem:[%s6427_s1 + $0x794] ss:$8 sps:$4 sm:$0xff]  }
  0xc1   :  { %3027 = vmatprep.subr.bf16.mxu1 %v4451_v20  ;;  %v476_v20 = vshrl.u32 %v475_v13, 7  ;;  %v4588_v13 = vld [vmem:[%s6427_s1 + $0x800] ss:$8 sps:$4 sm:$0xff]  }
  0xc2   :  { %2937 = vmatmul.mubr.bf16.vlgmr.msra.gmra.mxu0 %v3600_v19  ;;  %v4530_v19 = vld [vmem:[%s6427_s1 + $0x690] ss:$8 sps:$4 sm:$0xff]  }
  0xc3   :  { %2987 = vmatpush1.bf16.msra.mxu0 %v4444_v23  ;;  %3018 = vmatprep.mubr.bf16.mxu0 %v3605_v24  ;;  %v4533_v23 = vld [vmem:[%s6427_s1 + $0x790] ss:$8 sps:$4 sm:$0xff]   ;;  %v4538_v24 = vld [vmem:[%s6427_s1 + $0x684] ss:$8 sps:$4 sm:$0xff]  }
  0xc4   :  { %2978 = vmatmul.mubr.bf16.vlgmr.msra.gmra.mxu1 %v3602_v17  ;;  %2988 = vmatprep.subr.bf16.mxu0 %v4454_v25  ;;  %v4536_v17 = vld [vmem:[%s6427_s1 + $0x680] ss:$8 sps:$4 sm:$0xff]   ;;  %v4541_v25 = vld [vmem:[%s6427_s1 + $0x784] ss:$8 sps:$4 sm:$0xff]  }
  0xc5   :  { %3028 = vmatpush1.bf16.msra.mxu1 %v4449_v26  ;;  %3059 = vmatprep.mubr.bf16.mxu1 %v3607_v27  ;;  %v4539_v26 = vld [vmem:[%s6427_s1 + $0x780] ss:$8 sps:$4 sm:$0xff]  }
  0xc6   :  { %3029 = vmatprep.subr.bf16.mxu1 %v4457_v28  ;;  %v473_v27 = vld [vmem:[%s6429_s2] sm:$0x3]  ;;  %v477_v28 = vsub.s32 0, %v476_v20 }
  0xc7   :  { %2989 = vmatpush1.bf16.msra.mxu0 %v4452_v21  ;;  %v4546_v21 = vld [vmem:[%s6427_s1 + $0x874] ss:$8 sps:$4 sm:$0xff]  }
  0xc8   :  { %2990 = vmatprep.subr.bf16.mxu0 %v4460_v29  ;;  %v5713_v29 = vld [vmem:[%s6428_s0 + $0x40] sm:$0xff] }
  0xc9   :  { %3030 = vmatpush1.bf16.msra.mxu1 %v4455_v30  ;;  %v481_v30 = vsub.s32 1, %v476_v20  ;;  %v4602_v20 = vld [vmem:[%s6427_s1 + $0x8e4] ss:$8 sps:$4 sm:$0xff]  }
  0xca   :  { %3031 = vmatprep.subr.bf16.mxu1 %v4463_v31  ;;  %v4551_v31 = vld [vmem:[%s6427_s1 + $0x974] ss:$8 sps:$4 sm:$0xff]  }
  0xcb   :  { %2991 = vmatpush1.bf16.msra.mxu0 %v4458_v32  ;;  %v3604_v32 = vcombine.low %v5497_v16, %v5497_v16  ;;  %v4554_v16 = vld [vmem:[%s6427_s1 + $0x864] ss:$8 sps:$4 sm:$0xff]  }
  0xcc   :  { %2992 = vmatprep.subr.bf16.mxu0 %v4466_v33  ;;  %v5723_v33 = vld [vmem:[%s6428_s0 + $0x48] sm:$0xff] }
  0xcd   :  { %3032 = vmatpush1.bf16.msra.mxu1 %v4461_v34  ;;  %v478_v34 = vrot.slane %v473_v27, %v477_v28  ;;  %v4606_v28 = vld [vmem:[%s6427_s1 + $0x8d0] ss:$8 sps:$4 sm:$0xff]  }
  0xce   :  { %3033 = vmatprep.subr.bf16.mxu1 %v4469_v35  ;;  %v4544_v35 = vld [vmem:[%s6427_s1 + $0x870] ss:$8 sps:$4 sm:$0xff]  }
  0xcf   :  { %2993 = vmatpush1.bf16.msra.mxu0 %v4464_v36  ;;  %v3609_v36 = vcombine.high %v5713_v29, %v5713_v29 }
  0xd0   :  { %2994 = vmatprep.subr.bf16.mxu0 %v4472_v37  ;;  %v3606_v37 = vcombine.low %v5510_v22, %v5510_v22  ;;  %v4557_v22 = vld [vmem:[%s6427_s1 + $0x964] ss:$8 sps:$4 sm:$0xff]  }
  0xd1   :  { %3034 = vmatpush1.bf16.msra.mxu1 %v4467_v38  ;;  %v482_v38 = vrot.slane %v473_v27, %v481_v30  ;;  %v4611_v27 = vld [vmem:[%s6427_s1 + $0x9d4] ss:$8 sps:$4 sm:$0xff]   ;;  %v4609_v30 = vld [vmem:[%s6427_s1 + $0x9d0] ss:$8 sps:$4 sm:$0xff]  }
  0xd2   :  { %3035 = vmatprep.subr.bf16.mxu1 %v4475_v39  ;;  %v4549_v39 = vld [vmem:[%s6427_s1 + $0x970] ss:$8 sps:$4 sm:$0xff]  }
  0xd3   :  { %2995 = vmatpush1.bf16.msra.mxu0 %v4470_v40  ;;  %v3611_v40 = vcombine.high %v5723_v33, %v5723_v33 }
  0xd4   :  { %2996 = vmatprep.subr.bf16.mxu0 %v4478_v41 }
  0xd5   :  { %3036 = vmatpush1.bf16.msra.mxu1 %v4473_v42 }
  0xd6   :  { %3037 = vmatprep.subr.bf16.mxu1 %v4481_v43  ;;  %v4552_v43 = vld [vmem:[%s6427_s1 + $0x860] ss:$8 sps:$4 sm:$0xff]  }
  0xd7   :  { %2997 = vmatpush1.bf16.msra.mxu0 %v4476_v44 }
  0xd8   :  { %2998 = vmatprep.subr.bf16.mxu0 %v4484_v45 }
  0xd9   :  { %3038 = vmatpush1.bf16.msra.mxu1 %v4479_v46  ;;  %v4560_v46 = vld [vmem:[%s6427_s1 + $0x854] ss:$8 sps:$4 sm:$0xff]  }
  0xda   :  { %3039 = vmatprep.subr.bf16.mxu1 %v4487_v47 }
  0xdb   :  { %2999 = vmatpush1.bf16.msra.mxu0 %v4482_v48 }
  0xdc   :  { %3000 = vmatprep.subr.bf16.mxu0 %v4490_v49  ;;  %v4555_v49 = vld [vmem:[%s6427_s1 + $0x960] ss:$8 sps:$4 sm:$0xff]  }
  0xdd   :  { %3040 = vmatpush1.bf16.msra.mxu1 %v4485_v50 }
  0xde   :  { %3041 = vmatprep.subr.bf16.mxu1 %v4493_v51 }
  0xdf   :  { %3001 = vmatpush1.bf16.msra.mxu0 %v4488_v52  ;;  %v4558_v52 = vld [vmem:[%s6427_s1 + $0x850] ss:$8 sps:$4 sm:$0xff]  }
  0xe0   :  { %3002 = vmatprep.subr.bf16.mxu0 %v4496_v53  ;;  %v4563_v53 = vld [vmem:[%s6427_s1 + $0x954] ss:$8 sps:$4 sm:$0xff]  }
  0xe1   :  { %3042 = vmatpush1.bf16.msra.mxu1 %v4491_v54 }
  0xe2   :  { %3043 = vmatprep.subr.bf16.mxu1 %v4499_v55  ;;  %v4561_v55 = vld [vmem:[%s6427_s1 + $0x950] ss:$8 sps:$4 sm:$0xff]  }
  0xe3   :  { %3003 = vmatpush2.bf16.msra.mxu0 %v4494_v56 }
  0xe4   :  { %3004 = vmatprep.subr.bf16.mxu0 %v4502_v57  ;;  %v4566_v57 = vld [vmem:[%s6427_s1 + $0x844] ss:$8 sps:$4 sm:$0xff]  }
  0xe5   :  { %3044 = vmatpush2.bf16.msra.mxu1 %v4497_v58  ;;  %v4569_v58 = vld [vmem:[%s6427_s1 + $0x944] ss:$8 sps:$4 sm:$0xff]  }
  0xe6   :  { %3045 = vmatprep.subr.bf16.mxu1 %v4505_v59 }
  0xe7   :  { %3005 = vmatpush2.bf16.msra.mxu0 %v4500_v60  ;;  %v4564_v60 = vld [vmem:[%s6427_s1 + $0x840] ss:$8 sps:$4 sm:$0xff]  }
  0xe8   :  { %3006 = vmatprep.subr.bf16.mxu0 %v4508_v61 }
  0xe9   :  { %3046 = vmatpush2.bf16.msra.mxu1 %v4503_v62  ;;  %v4567_v62 = vld [vmem:[%s6427_s1 + $0x940] ss:$8 sps:$4 sm:$0xff]  }
  0xea   :  { %3047 = vmatprep.subr.bf16.mxu1 %v4511_v63  ;;  %v4572_v63 = vld [vmem:[%s6427_s1 + $0x834] ss:$8 sps:$4 sm:$0xff]  }
  0xeb   :  { %3007 = vmatpush2.bf16.msra.mxu0 %v4506_v0  ;;  %v4575_v0 = vld [vmem:[%s6427_s1 + $0x934] ss:$8 sps:$4 sm:$0xff]  }
  0xec   :  { %3008 = vmatprep.subr.bf16.mxu0 %v4514_v1  ;;  %v4570_v1 = vld [vmem:[%s6427_s1 + $0x830] ss:$8 sps:$4 sm:$0xff]  }
  0xed   :  { %3048 = vmatpush2.bf16.msra.mxu1 %v4509_v2  ;;  %v4573_v2 = vld [vmem:[%s6427_s1 + $0x930] ss:$8 sps:$4 sm:$0xff]  }
  0xee   :  { %3049 = vmatprep.subr.bf16.mxu1 %v4517_v3  ;;  %v4578_v3 = vld [vmem:[%s6427_s1 + $0x824] ss:$8 sps:$4 sm:$0xff]  }
  0xef   :  { %3009 = vmatpush2.bf16.msra.mxu0 %v4512_v4  ;;  %v4581_v4 = vld [vmem:[%s6427_s1 + $0x924] ss:$8 sps:$4 sm:$0xff]  }
  0xf0   :  { %3010 = vmatprep.subr.bf16.mxu0 %v4520_v5  ;;  %v4576_v5 = vld [vmem:[%s6427_s1 + $0x820] ss:$8 sps:$4 sm:$0xff]  }
  0xf1   :  { %3050 = vmatpush2.bf16.msra.mxu1 %v4515_v6  ;;  %v4579_v6 = vld [vmem:[%s6427_s1 + $0x920] ss:$8 sps:$4 sm:$0xff]  }
  0xf2   :  { %3051 = vmatprep.subr.bf16.mxu1 %v4523_v7  ;;  %v4584_v7 = vld [vmem:[%s6427_s1 + $0x814] ss:$8 sps:$4 sm:$0xff]  }
  0xf3   :  { %3011 = vmatpush2.bf16.msra.mxu0 %v4518_v8  ;;  %v4587_v8 = vld [vmem:[%s6427_s1 + $0x914] ss:$8 sps:$4 sm:$0xff]  }
  0xf4   :  { %3012 = vmatprep.subr.bf16.mxu0 %v4526_v9  ;;  %v4582_v9 = vld [vmem:[%s6427_s1 + $0x810] ss:$8 sps:$4 sm:$0xff]  }
  0xf5   :  { %3052 = vmatpush2.bf16.msra.mxu1 %v4521_v10  ;;  %v4590_v10 = vld [vmem:[%s6427_s1 + $0x804] ss:$8 sps:$4 sm:$0xff]  }
  0xf6   :  { %3053 = vmatprep.subr.bf16.mxu1 %v4529_v11  ;;  %v4585_v11 = vld [vmem:[%s6427_s1 + $0x910] ss:$8 sps:$4 sm:$0xff]  }
  0xf7   :  { %3013 = vmatpush2.bf16.msra.mxu0 %v4524_v12  ;;  %v4593_v12 = vld [vmem:[%s6427_s1 + $0x904] ss:$8 sps:$4 sm:$0xff]  }
  0xf8   :  { %3014 = vmatprep.subr.bf16.mxu0 %v4532_v14  ;;  %v4596_v14 = vld [vmem:[%s6427_s1 + $0x8f4] ss:$8 sps:$4 sm:$0xff]  }
  0xf9   :  { %3054 = vmatpush2.bf16.msra.mxu1 %v4527_v15  ;;  %v4591_v15 = vld [vmem:[%s6427_s1 + $0x900] ss:$8 sps:$4 sm:$0xff]  }
  0xfa   :  { %3055 = vmatprep.subr.bf16.mxu1 %v4535_v18  ;;  %v4599_v18 = vld [vmem:[%s6427_s1 + $0x9f4] ss:$8 sps:$4 sm:$0xff]  }
  0xfb   :  { %3015 = vmatpush2.bf16.msra.mxu0 %v4530_v19  ;;  %v4594_v19 = vld [vmem:[%s6427_s1 + $0x8f0] ss:$8 sps:$4 sm:$0xff]  }
  0xfc   :  { %3016 = vmatprep.subr.bf16.mxu0 %v4538_v24  ;;  %v4605_v24 = vld [vmem:[%s6427_s1 + $0x9e4] ss:$8 sps:$4 sm:$0xff]  }
  0xfd   :  { %3056 = vmatpush2.bf16.msra.mxu1 %v4533_v23  ;;  %v4597_v23 = vld [vmem:[%s6427_s1 + $0x9f0] ss:$8 sps:$4 sm:$0xff]  }
  0xfe   :  { %3057 = vmatprep.subr.bf16.mxu1 %v4541_v25  ;;  %v4608_v25 = vld [vmem:[%s6427_s1 + $0x8d4] ss:$8 sps:$4 sm:$0xff]  }
  0xff   :  { %3017 = vmatpush2.bf16.msra.mxu0 %v4536_v17  ;;  %v4600_v17 = vld [vmem:[%s6427_s1 + $0x8e0] ss:$8 sps:$4 sm:$0xff]  }
 0x100   :  { %3068 = vmatprep.subr.bf16.mxu0 %v4546_v21  ;;  %v4614_v21 = vld [vmem:[%s6427_s1 + $0x8c4] ss:$8 sps:$4 sm:$0xff]  }
 0x101   :  { %3058 = vmatpush2.bf16.msra.mxu1 %v4539_v26  ;;  %v4603_v26 = vld [vmem:[%s6427_s1 + $0x9e0] ss:$8 sps:$4 sm:$0xff]  }
 0x102   :  { %v2774_v41 = vpop.f32.mrf.mxu0  ;;  %3019 = vmatmul.mubr.bf16.vlgmr.msra.gmra.mxu0 %v3604_v32  ;;  %3109 = vmatprep.subr.bf16.mxu1 %v4551_v31  ;;  %v4617_v31 = vld [vmem:[%s6427_s1 + $0x9c4] ss:$8 sps:$4 sm:$0xff]   ;;  %v4612_v32 = vld [vmem:[%s6427_s1 + $0x8c0] ss:$8 sps:$4 sm:$0xff]  }
 0x103   :  { %v2775_v42 = vadd.f32 %v2774_v41, %v478_v34  ;;  %3069 = vmatpush1.bf16.msra.mxu0 %v4544_v35  ;;  %3100 = vmatprep.mubr.bf16.mxu0 %v3609_v36  ;;  %v2815_v45 = vpop.f32.mrf.mxu1  ;;  %v4620_v34 = vld [vmem:[%s6427_s1 + $0x8b4] ss:$8 sps:$4 sm:$0xff]   ;;  %v4615_v35 = vld [vmem:[%s6427_s1 + $0x9c0] ss:$8 sps:$4 sm:$0xff]  }
 0x104   :  { %v2776_v44 = vpop.f32.mrf.mxu0  ;;  %3060 = vmatmul.mubr.bf16.vlgmr.msra.gmra.mxu1 %v3606_v37  ;;  %3070 = vmatprep.subr.bf16.mxu0 %v4554_v16  ;;  %v4623_v36 = vld [vmem:[%s6427_s1 + $0x9b4] ss:$8 sps:$4 sm:$0xff]   ;;  %v4618_v37 = vld [vmem:[%s6427_s1 + $0x8b0] ss:$8 sps:$4 sm:$0xff]   ;;  %v4626_v16 = vld [vmem:[%s6427_s1 + $0x8a4] ss:$8 sps:$4 sm:$0xff]  }
 0x105   :  { %v2777_v47 = vadd.f32 %v2776_v44, %v482_v38  ;;  %v5749_v48 = vadd.f32 %v2815_v45, %v2775_v42  ;;  %3110 = vmatpush1.bf16.msra.mxu1 %v4549_v39  ;;  %3141 = vmatprep.mubr.bf16.mxu1 %v3611_v40  ;;  %v2817_v51 = vpop.f32.mrf.mxu1  ;;  %v4621_v38 = vld [vmem:[%s6427_s1 + $0x9b0] ss:$8 sps:$4 sm:$0xff]   ;;  %v4629_v39 = vld [vmem:[%s6427_s1 + $0x9a4] ss:$8 sps:$4 sm:$0xff]   ;;  %v4624_v40 = vld [vmem:[%s6427_s1 + $0x8a0] ss:$8 sps:$4 sm:$0xff]  }
 0x106   :  { %v2778_v50 = vpop.f32.mrf.mxu0  ;;  %3111 = vmatprep.subr.bf16.mxu1 %v4557_v22  ;;  %v4632_v41 = vld [vmem:[%s6427_s1 + $0x894] ss:$8 sps:$4 sm:$0xff]   ;;  %v4627_v22 = vld [vmem:[%s6427_s1 + $0x9a0] ss:$8 sps:$4 sm:$0xff]   ;;  %v4638_v44 = vld [vmem:[%s6427_s1 + $0x884] ss:$8 sps:$4 sm:$0xff]  }
 0x107   :  { %v5760_v54 = vadd.f32 %v2817_v51, %v2777_v47  ;;  %3071 = vmatpush1.bf16.msra.mxu0 %v4552_v43  ;;  %v2819_v59 = vpop.f32.mrf.mxu1  ;;  %v4635_v42 = vld [vmem:[%s6427_s1 + $0x994] ss:$8 sps:$4 sm:$0xff]   ;;  %v4630_v43 = vld [vmem:[%s6427_s1 + $0x890] ss:$8 sps:$4 sm:$0xff]   ;;  %v4636_v47 = vld [vmem:[%s6427_s1 + $0x880] ss:$8 sps:$4 sm:$0xff]  }
 0x108   :  { %v2779_v56 = vpop.f32.mrf.mxu0  ;;  %3072 = vmatprep.subr.bf16.mxu0 %v4560_v46  ;;  %v4633_v45 = vld [vmem:[%s6427_s1 + $0x990] ss:$8 sps:$4 sm:$0xff]   ;;  %v4641_v46 = vld [vmem:[%s6427_s1 + $0x984] ss:$8 sps:$4 sm:$0xff]   ;;  %v4639_v51 = vld [vmem:[%s6427_s1 + $0x980] ss:$8 sps:$4 sm:$0xff]  }
 0x109   :  { %3112 = vmatpush1.bf16.msra.mxu1 %v4555_v49  ;;  %v2820_v61 = vpop.f32.mrf.mxu1  ;;  %v4646_v49 = vld [vmem:[%s6427_s1 + $0xa74] ss:$8 sps:$4 sm:$0xff]   ;;  %v4644_v56 = vld [vmem:[%s6427_s1 + $0xa70] ss:$8 sps:$4 sm:$0xff]  }
 0x10a   :  { %3113 = vmatprep.subr.bf16.mxu1 %v4563_v53  ;;  %v5924_v50 = vld [vmem:[%s6428_s0 + $0x50] sm:$0xff] }
 0x10b   :  { %3073 = vmatpush1.bf16.msra.mxu0 %v4558_v52  ;;  %v3608_v52 = vcombine.low %v5713_v29, %v5713_v29  ;;  %v4651_v53 = vld [vmem:[%s6427_s1 + $0xb74] ss:$8 sps:$4 sm:$0xff]   ;;  %v3610_v29 = vcombine.low %v5723_v33, %v5723_v33  ;;  %v4649_v59 = vld [vmem:[%s6427_s1 + $0xb70] ss:$8 sps:$4 sm:$0xff]  }
 0x10c   :  { %3074 = vmatprep.subr.bf16.mxu0 %v4566_v57  ;;  %v3613_v57 = vcombine.high %v5924_v50, %v5924_v50 }
 0x10d   :  { %3114 = vmatpush1.bf16.msra.mxu1 %v4561_v55  ;;  %v5937_v55 = vld [vmem:[%s6428_s0 + $0x58] sm:$0xff] }
 0x10e   :  { %3115 = vmatprep.subr.bf16.mxu1 %v4569_v58  ;;  %v4654_v58 = vld [vmem:[%s6427_s1 + $0xa64] ss:$8 sps:$4 sm:$0xff]  }
 0x10f   :  { %3075 = vmatpush1.bf16.msra.mxu0 %v4564_v60  ;;  %v3615_v60 = vcombine.high %v5937_v55, %v5937_v55 }
 0x110   :  { %3076 = vmatprep.subr.bf16.mxu0 %v4572_v63  ;;  %v4652_v63 = vld [vmem:[%s6427_s1 + $0xa60] ss:$8 sps:$4 sm:$0xff]  }
 0x111   :  { %3116 = vmatpush1.bf16.msra.mxu1 %v4567_v62  ;;  %v4657_v62 = vld [vmem:[%s6427_s1 + $0xb64] ss:$8 sps:$4 sm:$0xff]  }
 0x112   :  { %3117 = vmatprep.subr.bf16.mxu1 %v4575_v0 }
 0x113   :  { %3077 = vmatpush1.bf16.msra.mxu0 %v4570_v1 }
 0x114   :  { %3078 = vmatprep.subr.bf16.mxu0 %v4578_v3 }
 0x115   :  { %3118 = vmatpush1.bf16.msra.mxu1 %v4573_v2  ;;  %v4660_v2 = vld [vmem:[%s6427_s1 + $0xa54] ss:$8 sps:$4 sm:$0xff]  }
 0x116   :  { %3119 = vmatprep.subr.bf16.mxu1 %v4581_v4 }
 0x117   :  { %3079 = vmatpush1.bf16.msra.mxu0 %v4576_v5 }
 0x118   :  { %3080 = vmatprep.subr.bf16.mxu0 %v4584_v7  ;;  %v4663_v7 = vld [vmem:[%s6427_s1 + $0xb54] ss:$8 sps:$4 sm:$0xff]  }
 0x119   :  { %3120 = vmatpush1.bf16.msra.mxu1 %v4579_v6 }
 0x11a   :  { %3121 = vmatprep.subr.bf16.mxu1 %v4587_v8 }
 0x11b   :  { %3081 = vmatpush1.bf16.msra.mxu0 %v4582_v9 }
 0x11c   :  { %3082 = vmatprep.subr.bf16.mxu0 %v4590_v10  ;;  %v4666_v10 = vld [vmem:[%s6427_s1 + $0xa44] ss:$8 sps:$4 sm:$0xff]  }
 0x11d   :  { %3122 = vmatpush1.bf16.msra.mxu1 %v4585_v11 }
 0x11e   :  { %3123 = vmatprep.subr.bf16.mxu1 %v4593_v12  ;;  %v4661_v12 = vld [vmem:[%s6427_s1 + $0xb50] ss:$8 sps:$4 sm:$0xff]  }
 0x11f   :  { %3083 = vmatpush1.bf16.msra.mxu0 %v4588_v13  ;;  %v4669_v13 = vld [vmem:[%s6427_s1 + $0xb44] ss:$8 sps:$4 sm:$0xff]  }
 0x120   :  { %3084 = vmatprep.subr.bf16.mxu0 %v4596_v14 }
 0x121   :  { %3124 = vmatpush1.bf16.msra.mxu1 %v4591_v15  ;;  %v4664_v15 = vld [vmem:[%s6427_s1 + $0xa40] ss:$8 sps:$4 sm:$0xff]  }
 0x122   :  { %3125 = vmatprep.subr.bf16.mxu1 %v4599_v18  ;;  %v4672_v18 = vld [vmem:[%s6427_s1 + $0xa34] ss:$8 sps:$4 sm:$0xff]  }
 0x123   :  { %3085 = vmatpush2.bf16.msra.mxu0 %v4594_v19  ;;  %v4667_v19 = vld [vmem:[%s6427_s1 + $0xb40] ss:$8 sps:$4 sm:$0xff]  }
 0x124   :  { %3086 = vmatprep.subr.bf16.mxu0 %v4602_v20  ;;  %v4675_v20 = vld [vmem:[%s6427_s1 + $0xb34] ss:$8 sps:$4 sm:$0xff]  }
 0x125   :  { %3126 = vmatpush2.bf16.msra.mxu1 %v4597_v23  ;;  %v4670_v23 = vld [vmem:[%s6427_s1 + $0xa30] ss:$8 sps:$4 sm:$0xff]  }
 0x126   :  { %3127 = vmatprep.subr.bf16.mxu1 %v4605_v24  ;;  %v4678_v24 = vld [vmem:[%s6427_s1 + $0xa24] ss:$8 sps:$4 sm:$0xff]  }
 0x127   :  { %3087 = vmatpush2.bf16.msra.mxu0 %v4600_v17  ;;  %v4673_v17 = vld [vmem:[%s6427_s1 + $0xb30] ss:$8 sps:$4 sm:$0xff]  }
 0x128   :  { %3088 = vmatprep.subr.bf16.mxu0 %v4608_v25  ;;  %v4681_v25 = vld [vmem:[%s6427_s1 + $0xb24] ss:$8 sps:$4 sm:$0xff]  }
 0x129   :  { %3128 = vmatpush2.bf16.msra.mxu1 %v4603_v26  ;;  %v4676_v26 = vld [vmem:[%s6427_s1 + $0xa20] ss:$8 sps:$4 sm:$0xff]  }
 0x12a   :  { %3129 = vmatprep.subr.bf16.mxu1 %v4611_v27  ;;  %v4684_v27 = vld [vmem:[%s6427_s1 + $0xa14] ss:$8 sps:$4 sm:$0xff]  }
 0x12b   :  { %3089 = vmatpush2.bf16.msra.mxu0 %v4606_v28  ;;  %v4679_v28 = vld [vmem:[%s6427_s1 + $0xb20] ss:$8 sps:$4 sm:$0xff]  }
 0x12c   :  { %3090 = vmatprep.subr.bf16.mxu0 %v4614_v21  ;;  %v4687_v21 = vld [vmem:[%s6427_s1 + $0xb14] ss:$8 sps:$4 sm:$0xff]  }
 0x12d   :  { %3130 = vmatpush2.bf16.msra.mxu1 %v4609_v30  ;;  %v4682_v30 = vld [vmem:[%s6427_s1 + $0xa10] ss:$8 sps:$4 sm:$0xff]  }
 0x12e   :  { %3131 = vmatprep.subr.bf16.mxu1 %v4617_v31  ;;  %v4690_v31 = vld [vmem:[%s6427_s1 + $0xa04] ss:$8 sps:$4 sm:$0xff]  }
 0x12f   :  { %3091 = vmatpush2.bf16.msra.mxu0 %v4612_v32  ;;  %v4685_v32 = vld [vmem:[%s6427_s1 + $0xb10] ss:$8 sps:$4 sm:$0xff]  }
 0x130   :  { %3092 = vmatprep.subr.bf16.mxu0 %v4620_v34  ;;  %v4693_v34 = vld [vmem:[%s6427_s1 + $0xb04] ss:$8 sps:$4 sm:$0xff]  }
 0x131   :  { %3132 = vmatpush2.bf16.msra.mxu1 %v4615_v35  ;;  %v4688_v35 = vld [vmem:[%s6427_s1 + $0xa00] ss:$8 sps:$4 sm:$0xff]  }
 0x132   :  { %3133 = vmatprep.subr.bf16.mxu1 %v4623_v36  ;;  %v4696_v36 = vld [vmem:[%s6427_s1 + $0xaf4] ss:$8 sps:$4 sm:$0xff]  }
 0x133   :  { %3093 = vmatpush2.bf16.msra.mxu0 %v4618_v37  ;;  %v4691_v37 = vld [vmem:[%s6427_s1 + $0xb00] ss:$8 sps:$4 sm:$0xff]  }
 0x134   :  { %3094 = vmatprep.subr.bf16.mxu0 %v4626_v16  ;;  %v4699_v16 = vld [vmem:[%s6427_s1 + $0xbf4] ss:$8 sps:$4 sm:$0xff]  }
 0x135   :  { %3134 = vmatpush2.bf16.msra.mxu1 %v4621_v38  ;;  %v4694_v38 = vld [vmem:[%s6427_s1 + $0xaf0] ss:$8 sps:$4 sm:$0xff]  }
 0x136   :  { %3135 = vmatprep.subr.bf16.mxu1 %v4629_v39  ;;  %v4702_v39 = vld [vmem:[%s6427_s1 + $0xae4] ss:$8 sps:$4 sm:$0xff]  }
 0x137   :  { %3095 = vmatpush2.bf16.msra.mxu0 %v4624_v40  ;;  %v4697_v40 = vld [vmem:[%s6427_s1 + $0xbf0] ss:$8 sps:$4 sm:$0xff]  }
 0x138   :  { %3096 = vmatprep.subr.bf16.mxu0 %v4632_v41  ;;  %v4705_v41 = vld [vmem:[%s6427_s1 + $0xbe4] ss:$8 sps:$4 sm:$0xff]  }
 0x139   :  { %3136 = vmatpush2.bf16.msra.mxu1 %v4627_v22  ;;  %v4700_v22 = vld [vmem:[%s6427_s1 + $0xae0] ss:$8 sps:$4 sm:$0xff]  }
 0x13a   :  { %3137 = vmatprep.subr.bf16.mxu1 %v4635_v42  ;;  %v4708_v42 = vld [vmem:[%s6427_s1 + $0xad4] ss:$8 sps:$4 sm:$0xff]  }
 0x13b   :  { %3097 = vmatpush2.bf16.msra.mxu0 %v4630_v43  ;;  %v4703_v43 = vld [vmem:[%s6427_s1 + $0xbe0] ss:$8 sps:$4 sm:$0xff]  }
 0x13c   :  { %3098 = vmatprep.subr.bf16.mxu0 %v4638_v44  ;;  %v4711_v44 = vld [vmem:[%s6427_s1 + $0xbd4] ss:$8 sps:$4 sm:$0xff]  }
 0x13d   :  { %3138 = vmatpush2.bf16.msra.mxu1 %v4633_v45  ;;  %v4706_v45 = vld [vmem:[%s6427_s1 + $0xad0] ss:$8 sps:$4 sm:$0xff]  }
 0x13e   :  { %3139 = vmatprep.subr.bf16.mxu1 %v4641_v46  ;;  %v4714_v46 = vld [vmem:[%s6427_s1 + $0xac4] ss:$8 sps:$4 sm:$0xff]  }
 0x13f   :  { %3099 = vmatpush2.bf16.msra.mxu0 %v4636_v47  ;;  %v4709_v47 = vld [vmem:[%s6427_s1 + $0xbd0] ss:$8 sps:$4 sm:$0xff]  }
 0x140   :  { %3150 = vmatprep.subr.bf16.mxu0 %v4646_v49  ;;  %v4717_v49 = vld [vmem:[%s6427_s1 + $0xbc4] ss:$8 sps:$4 sm:$0xff]  }
 0x141   :  { %3140 = vmatpush2.bf16.msra.mxu1 %v4639_v51  ;;  %v4712_v51 = vld [vmem:[%s6427_s1 + $0xac0] ss:$8 sps:$4 sm:$0xff]  }
 0x142   :  { %v2856_v61 = vpop.f32.mrf.mxu0  ;;  %3101 = vmatmul.mubr.bf16.vlgmr.msra.gmra.mxu0 %v3608_v52  ;;  %3191 = vmatprep.subr.bf16.mxu1 %v4651_v53  ;;  %v4720_v52 = vld [vmem:[%s6427_s1 + $0xab4] ss:$8 sps:$4 sm:$0xff]   ;;  %v4715_v53 = vld [vmem:[%s6427_s1 + $0xbc0] ss:$8 sps:$4 sm:$0xff]  }
 0x143   :  { %v2857_v33 = vadd.f32 %v2856_v61, %v5749_v48  ;;  %3151 = vmatpush1.bf16.msra.mxu0 %v4644_v56  ;;  %3182 = vmatprep.mubr.bf16.mxu0 %v3613_v57  ;;  %v2897_v1 = vpop.f32.mrf.mxu1  ;;  %v4655_v48 = vld [vmem:[%s6427_s1 + $0xb60] ss:$8 sps:$4 sm:$0xff]   ;;  %v4723_v56 = vld [vmem:[%s6427_s1 + $0xbb4] ss:$8 sps:$4 sm:$0xff]   ;;  %v4718_v57 = vld [vmem:[%s6427_s1 + $0xab0] ss:$8 sps:$4 sm:$0xff]  }
 0x144   :  { %v2858_v0 = vpop.f32.mrf.mxu0  ;;  %3142 = vmatmul.mubr.bf16.vlgmr.msra.gmra.mxu1 %v3610_v29  ;;  %3152 = vmatprep.subr.bf16.mxu0 %v4654_v58  ;;  %v4726_v29 = vld [vmem:[%s6427_s1 + $0xaa4] ss:$8 sps:$4 sm:$0xff]   ;;  %v4721_v58 = vld [vmem:[%s6427_s1 + $0xbb0] ss:$8 sps:$4 sm:$0xff]   ;;  %v4732_v61 = vld [vmem:[%s6427_s1 + $0xa94] ss:$8 sps:$4 sm:$0xff]  }
 0x145   :  { %v2859_v3 = vadd.f32 %v2858_v0, %v5760_v54  ;;  %v5965_v4 = vadd.f32 %v2897_v1, %v2857_v33  ;;  %3192 = vmatpush1.bf16.msra.mxu1 %v4649_v59  ;;  %3223 = vmatprep.mubr.bf16.mxu1 %v3615_v60  ;;  %v2899_v6 = vpop.f32.mrf.mxu1  ;;  %v4658_v54 = vld [vmem:[%s6427_s1 + $0xa50] ss:$8 sps:$4 sm:$0xff]   ;;  %v4729_v59 = vld [vmem:[%s6427_s1 + $0xba4] ss:$8 sps:$4 sm:$0xff]   ;;  %v4724_v60 = vld [vmem:[%s6427_s1 + $0xaa0] ss:$8 sps:$4 sm:$0xff]  }
 0x146   :  { %v2860_v5 = vpop.f32.mrf.mxu0  ;;  %3193 = vmatprep.subr.bf16.mxu1 %v4657_v62  ;;  %v4727_v62 = vld [vmem:[%s6427_s1 + $0xba0] ss:$8 sps:$4 sm:$0xff]   ;;  %v4735_v33 = vld [vmem:[%s6427_s1 + $0xb94] ss:$8 sps:$4 sm:$0xff]   ;;  %v4738_v0 = vld [vmem:[%s6427_s1 + $0xa84] ss:$8 sps:$4 sm:$0xff]  }
 0x147   :  { %v5973_v8 = vadd.f32 %v2899_v6, %v2859_v3  ;;  %3153 = vmatpush1.bf16.msra.mxu0 %v4652_v63  ;;  %v2901_v11 = vpop.f32.mrf.mxu1  ;;  %v4730_v63 = vld [vmem:[%s6427_s1 + $0xa90] ss:$8 sps:$4 sm:$0xff]   ;;  %v4736_v3 = vld [vmem:[%s6427_s1 + $0xa80] ss:$8 sps:$4 sm:$0xff]  }
 0x148   :  { %v2861_v9 = vpop.f32.mrf.mxu0  ;;  %3154 = vmatprep.subr.bf16.mxu0 %v4660_v2  ;;  %v4733_v1 = vld [vmem:[%s6427_s1 + $0xb90] ss:$8 sps:$4 sm:$0xff]   ;;  %v4741_v2 = vld [vmem:[%s6427_s1 + $0xb84] ss:$8 sps:$4 sm:$0xff]   ;;  %v4739_v6 = vld [vmem:[%s6427_s1 + $0xb80] ss:$8 sps:$4 sm:$0xff]   ;;  %v3614_v11 = vcombine.low %v5937_v55, %v5937_v55 }
 0x149   :  { %3194 = vmatpush1.bf16.msra.mxu1 %v4655_v48  ;;  %v2902_v14 = vpop.f32.mrf.mxu1  ;;  %v4746_v48 = vld [vmem:[%s6427_s1 + $0xc74] ss:$8 sps:$4 sm:$0xff]   ;;  %v6140_v5 = vld [vmem:[%s6428_s0 + $0x60] sm:$0xff]  ;;  %v4744_v9 = vld [vmem:[%s6427_s1 + $0xc70] ss:$8 sps:$4 sm:$0xff]  }
 0x14a   :  { %3195 = vmatprep.subr.bf16.mxu1 %v4663_v7  ;;  %v3612_v7 = vcombine.low %v5924_v50, %v5924_v50  ;;  %v4751_v50 = vld [vmem:[%s6427_s1 + $0xc64] ss:$8 sps:$4 sm:$0xff]   ;;  %v4749_v55 = vld [vmem:[%s6427_s1 + $0xc60] ss:$8 sps:$4 sm:$0xff]  }
 0x14b   :  { %3155 = vmatpush1.bf16.msra.mxu0 %v4658_v54  ;;  %v4772_v54 = vld [vmem:[%s6427_s1 + $0xd74] ss:$8 sps:$4 sm:$0xff]   ;;  %v4778_v14 = vld [vmem:[%s6427_s1 + $0xd64] ss:$8 sps:$4 sm:$0xff]  }
 0x14c   :  { %3156 = vmatprep.subr.bf16.mxu0 %v4666_v10  ;;  %v3617_v10 = vcombine.high %v6140_v5, %v6140_v5 }
 0x14d   :  { %3196 = vmatpush1.bf16.msra.mxu1 %v4661_v12  ;;  %v4770_v12 = vld [vmem:[%s6427_s1 + $0xd70] ss:$8 sps:$4 sm:$0xff]  }
 0x14e   :  { %3197 = vmatprep.subr.bf16.mxu1 %v4669_v13 }
 0x14f   :  { %3157 = vmatpush1.bf16.msra.mxu0 %v4664_v15 }
 0x150   :  { %3158 = vmatprep.subr.bf16.mxu0 %v4672_v18 }
 0x151   :  { %3198 = vmatpush1.bf16.msra.mxu1 %v4667_v19 }
 0x152   :  { %3199 = vmatprep.subr.bf16.mxu1 %v4675_v20  ;;  %v4754_v20 = vld [vmem:[%s6427_s1 + $0xc54] ss:$8 sps:$4 sm:$0xff]  }
 0x153   :  { %3159 = vmatpush1.bf16.msra.mxu0 %v4670_v23 }
 0x154   :  { %3160 = vmatprep.subr.bf16.mxu0 %v4678_v24 }
 0x155   :  { %3200 = vmatpush1.bf16.msra.mxu1 %v4673_v17  ;;  %v4837_v17 = vmov 0  }
 0x156   :  { %3201 = vmatprep.subr.bf16.mxu1 %v4681_v25 }
 0x157   :  { %3161 = vmatpush1.bf16.msra.mxu0 %v4676_v26 }
 0x158   :  { %3162 = vmatprep.subr.bf16.mxu0 %v4684_v27  ;;  %v4784_v27 = vld [vmem:[%s6427_s1 + $0xd54] ss:$8 sps:$4 sm:$0xff]  }
 0x159   :  { %3202 = vmatpush1.bf16.msra.mxu1 %v4679_v28 }
 0x15a   :  { %3203 = vmatprep.subr.bf16.mxu1 %v4687_v21 }
 0x15b   :  { %3163 = vmatpush1.bf16.msra.mxu0 %v4682_v30  ;;  %v4757_v30 = vld [vmem:[%s6427_s1 + $0xc44] ss:$8 sps:$4 sm:$0xff]  }
 0x15c   :  { %3164 = vmatprep.subr.bf16.mxu0 %v4690_v31 }
 0x15d   :  { %3204 = vmatpush1.bf16.msra.mxu1 %v4685_v32  ;;  %v4782_v32 = vld [vmem:[%s6427_s1 + $0xd50] ss:$8 sps:$4 sm:$0xff]  }
 0x15e   :  { %3205 = vmatprep.subr.bf16.mxu1 %v4693_v34 }
 0x15f   :  { %3165 = vmatpush1.bf16.msra.mxu0 %v4688_v35  ;;  %v4790_v35 = vld [vmem:[%s6427_s1 + $0xd44] ss:$8 sps:$4 sm:$0xff]  }
 0x160   :  { %3166 = vmatprep.subr.bf16.mxu0 %v4696_v36  ;;  %v4755_v36 = vld [vmem:[%s6427_s1 + $0xc40] ss:$8 sps:$4 sm:$0xff]  }
 0x161   :  { %3206 = vmatpush1.bf16.msra.mxu1 %v4691_v37  ;;  %v4760_v37 = vld [vmem:[%s6427_s1 + $0xc34] ss:$8 sps:$4 sm:$0xff]  }
 0x162   :  { %3207 = vmatprep.subr.bf16.mxu1 %v4699_v16  ;;  %v4788_v16 = vld [vmem:[%s6427_s1 + $0xd40] ss:$8 sps:$4 sm:$0xff]  }
 0x163   :  { %3167 = vmatpush2.bf16.msra.mxu0 %v4694_v38  ;;  %v4796_v38 = vld [vmem:[%s6427_s1 + $0xd34] ss:$8 sps:$4 sm:$0xff]  }
 0x164   :  { %3168 = vmatprep.subr.bf16.mxu0 %v4702_v39  ;;  %v4758_v39 = vld [vmem:[%s6427_s1 + $0xc30] ss:$8 sps:$4 sm:$0xff]  }
 0x165   :  { %3208 = vmatpush2.bf16.msra.mxu1 %v4697_v40  ;;  %v4763_v40 = vld [vmem:[%s6427_s1 + $0xc24] ss:$8 sps:$4 sm:$0xff]  }
 0x166   :  { %3209 = vmatprep.subr.bf16.mxu1 %v4705_v41  ;;  %v4794_v41 = vld [vmem:[%s6427_s1 + $0xd30] ss:$8 sps:$4 sm:$0xff]  }
 0x167   :  { %3169 = vmatpush2.bf16.msra.mxu0 %v4700_v22  ;;  %v4802_v22 = vld [vmem:[%s6427_s1 + $0xd24] ss:$8 sps:$4 sm:$0xff]  }
 0x168   :  { %3170 = vmatprep.subr.bf16.mxu0 %v4708_v42  ;;  %v4761_v42 = vld [vmem:[%s6427_s1 + $0xc20] ss:$8 sps:$4 sm:$0xff]  }
 0x169   :  { %3210 = vmatpush2.bf16.msra.mxu1 %v4703_v43  ;;  %v4766_v43 = vld [vmem:[%s6427_s1 + $0xc14] ss:$8 sps:$4 sm:$0xff]  }
 0x16a   :  { %3211 = vmatprep.subr.bf16.mxu1 %v4711_v44  ;;  %v4800_v44 = vld [vmem:[%s6427_s1 + $0xd20] ss:$8 sps:$4 sm:$0xff]  }
 0x16b   :  { %3171 = vmatpush2.bf16.msra.mxu0 %v4706_v45  ;;  %v4808_v45 = vld [vmem:[%s6427_s1 + $0xd14] ss:$8 sps:$4 sm:$0xff]  }
 0x16c   :  { %3172 = vmatprep.subr.bf16.mxu0 %v4714_v46  ;;  %v4764_v46 = vld [vmem:[%s6427_s1 + $0xc10] ss:$8 sps:$4 sm:$0xff]  }
 0x16d   :  { %3212 = vmatpush2.bf16.msra.mxu1 %v4709_v47  ;;  %v4769_v47 = vld [vmem:[%s6427_s1 + $0xc04] ss:$8 sps:$4 sm:$0xff]  }
 0x16e   :  { %3213 = vmatprep.subr.bf16.mxu1 %v4717_v49  ;;  %v4806_v49 = vld [vmem:[%s6427_s1 + $0xd10] ss:$8 sps:$4 sm:$0xff]  }
 0x16f   :  { %3173 = vmatpush2.bf16.msra.mxu0 %v4712_v51  ;;  %v4814_v51 = vld [vmem:[%s6427_s1 + $0xd04] ss:$8 sps:$4 sm:$0xff]  }
 0x170   :  { %3174 = vmatprep.subr.bf16.mxu0 %v4720_v52  ;;  %v4767_v52 = vld [vmem:[%s6427_s1 + $0xc00] ss:$8 sps:$4 sm:$0xff]  }
 0x171   :  { %3214 = vmatpush2.bf16.msra.mxu1 %v4715_v53  ;;  %v4775_v53 = vld [vmem:[%s6427_s1 + $0xcf4] ss:$8 sps:$4 sm:$0xff]  }
 0x172   :  { %3215 = vmatprep.subr.bf16.mxu1 %v4723_v56  ;;  %v4812_v56 = vld [vmem:[%s6427_s1 + $0xd00] ss:$8 sps:$4 sm:$0xff]  }
 0x173   :  { %3175 = vmatpush2.bf16.msra.mxu0 %v4718_v57  ;;  %v4773_v57 = vld [vmem:[%s6427_s1 + $0xcf0] ss:$8 sps:$4 sm:$0xff]  }
 0x174   :  { %3176 = vmatprep.subr.bf16.mxu0 %v4726_v29  ;;  %v4781_v29 = vld [vmem:[%s6427_s1 + $0xce4] ss:$8 sps:$4 sm:$0xff]  }
 0x175   :  { %3216 = vmatpush2.bf16.msra.mxu1 %v4721_v58  ;;  %v4818_v58 = vld [vmem:[%s6428_s0 + $0x68] ss:$0 sps:$4 sm:$0xff]  }
 0x176   :  { %3217 = vmatprep.subr.bf16.mxu1 %v4729_v59  ;;  %v4779_v59 = vld [vmem:[%s6427_s1 + $0xce0] ss:$8 sps:$4 sm:$0xff]  }
 0x177   :  { %3177 = vmatpush2.bf16.msra.mxu0 %v4724_v60  ;;  %v4787_v60 = vld [vmem:[%s6427_s1 + $0xcd4] ss:$8 sps:$4 sm:$0xff]  }
 0x178   :  { %3178 = vmatprep.subr.bf16.mxu0 %v4732_v61  ;;  %v4785_v61 = vld [vmem:[%s6427_s1 + $0xcd0] ss:$8 sps:$4 sm:$0xff]  }
 0x179   :  { %3218 = vmatpush2.bf16.msra.mxu1 %v4727_v62  ;;  %v4793_v62 = vld [vmem:[%s6427_s1 + $0xcc4] ss:$8 sps:$4 sm:$0xff]  }
 0x17a   :  { %3219 = vmatprep.subr.bf16.mxu1 %v4735_v33  ;;  %v4791_v33 = vld [vmem:[%s6427_s1 + $0xcc0] ss:$8 sps:$4 sm:$0xff]  }
 0x17b   :  { %3179 = vmatpush2.bf16.msra.mxu0 %v4730_v63  ;;  %v4799_v63 = vld [vmem:[%s6427_s1 + $0xcb4] ss:$8 sps:$4 sm:$0xff]  }
 0x17c   :  { %3180 = vmatprep.subr.bf16.mxu0 %v4738_v0  ;;  %v4797_v0 = vld [vmem:[%s6427_s1 + $0xcb0] ss:$8 sps:$4 sm:$0xff]  }
 0x17d   :  { %3220 = vmatpush2.bf16.msra.mxu1 %v4733_v1  ;;  %v4805_v1 = vld [vmem:[%s6427_s1 + $0xca4] ss:$8 sps:$4 sm:$0xff]  }
 0x17e   :  { %3221 = vmatprep.subr.bf16.mxu1 %v4741_v2  ;;  %v4803_v2 = vld [vmem:[%s6427_s1 + $0xca0] ss:$8 sps:$4 sm:$0xff]  }
 0x17f   :  { %3181 = vmatpush2.bf16.msra.mxu0 %v4736_v3  ;;  %v4811_v3 = vld [vmem:[%s6427_s1 + $0xc94] ss:$8 sps:$4 sm:$0xff]  }
 0x180   :  { %3232 = vmatprep.subr.bf16.mxu0 %v4746_v48  ;;  %v4809_v48 = vld [vmem:[%s6427_s1 + $0xc90] ss:$8 sps:$4 sm:$0xff]  }
 0x181   :  { %3222 = vmatpush2.bf16.msra.mxu1 %v4739_v6  ;;  %v4817_v6 = vld [vmem:[%s6427_s1 + $0xc84] ss:$8 sps:$4 sm:$0xff]  }
 0x182   :  { %v2938_v13 = vpop.f32.mrf.mxu0  ;;  %3183 = vmatmul.mubr.bf16.vlgmr.msra.gmra.mxu0 %v3612_v7  ;;  %3273 = vmatprep.subr.bf16.mxu1 %v4772_v54  ;;  %v4815_v7 = vld [vmem:[%s6427_s1 + $0xc80] ss:$8 sps:$4 sm:$0xff]   ;;  %v3616_v54 = vcombine.low %v6140_v5, %v6140_v5  ;;  %v4821_v5 = vld [vmem:[%s6430_s3 + $0x78] sm:$0xff]  }
 0x183   :  { %v2939_v15 = vadd.f32 %v2938_v13, %v5965_v4  ;;  %3233 = vmatpush1.bf16.msra.mxu0 %v4744_v9  ;;  %3264 = vmatprep.mubr.bf16.mxu0 %v3617_v10  ;;  %v4776_v4 = vld [vmem:[%s6427_s1 + $0xd60] ss:$8 sps:$4 sm:$0xff]  }
 0x184   :  { %v2940_v18 = vpop.f32.mrf.mxu0  ;;  %v2979_v19 = vpop.f32.mrf.mxu1  ;;  %3224 = vmatmul.mubr.bf16.vlgmr.msra.gmra.mxu1 %v3614_v11  ;;  %3234 = vmatprep.subr.bf16.mxu0 %v4751_v50 }
 0x185   :  { %v2941_v23 = vadd.f32 %v2940_v18, %v5973_v8  ;;  %v6174_v24 = vadd.f32 %v2979_v19, %v2939_v15  ;;  %3274 = vmatpush1.bf16.msra.mxu1 %v4770_v12  ;;  %3305 = vmatprep.mubr.bf16.mxu1 %v4837_v17  ;;  %v4752_v8 = vld [vmem:[%s6427_s1 + $0xc50] ss:$8 sps:$4 sm:$0xff]   ;;  %v4825_v17 = vld [vmem:[%s6430_s3 + $0x68] sm:$0xff]  }
 0x186   :  { %v2942_v25 = vpop.f32.mrf.mxu0  ;;  %v2981_v26 = vpop.f32.mrf.mxu1  ;;  %3275 = vmatprep.subr.bf16.mxu1 %v4778_v14 }
 0x187   :  { %v6182_v28 = vadd.f32 %v2981_v26, %v2941_v23  ;;  %3235 = vmatpush1.bf16.msra.mxu0 %v4749_v55  ;;  %v4822_v23 = vld [vmem:[%s6430_s3 + $0x38] sm:$0xff]   ;;  %v4826_v25 = vld [vmem:[%s6430_s3 + $0x28] sm:$0xff]   ;;  %v4827_v26 = vld [vmem:[%s6430_s3 + $0x60] sm:$0xff]  }
 0x188   :  { %v2943_v21 = vpop.f32.mrf.mxu0  ;;  %3236 = vmatprep.subr.bf16.mxu0 %v4754_v20  ;;  %v2983_v31 = vpop.f32.mrf.mxu1 }
 0x189   :  { %3276 = vmatpush1.bf16.msra.mxu1 %v4776_v4  ;;  %v4824_v4 = vld [vmem:[%s6430_s3 + $0x30] sm:$0xff]  }
 0x18a   :  { %v2984_v34 = vpop.f32.mrf.mxu1  ;;  %3277 = vmatprep.subr.bf16.mxu1 %v4784_v27  ;;  %v4828_v27 = vld [vmem:[%s6430_s3 + $0x20] sm:$0xff]   ;;  %v4831_v21 = vld [vmem:[%s6430_s3 + $0x50] sm:$0xff]  }
 0x18b   :  { %3237 = vmatpush1.bf16.msra.mxu0 %v4752_v8  ;;  %v4830_v8 = vld [vmem:[%s6430_s3 + $0x18] sm:$0xff]  }
 0x18c   :  { %3238 = vmatprep.subr.bf16.mxu0 %v4757_v30  ;;  %v4832_v30 = vld [vmem:[%s6430_s3 + $0x10] sm:$0xff]  }
 0x18d   :  { %3278 = vmatpush1.bf16.msra.mxu1 %v4782_v32 }
 0x18e   :  { %3279 = vmatprep.subr.bf16.mxu1 %v4790_v35 }
 0x18f   :  { %3239 = vmatpush1.bf16.msra.mxu0 %v4755_v36  ;;  %v4833_v36 = vld [vmem:[%s6430_s3 + $0x48] sm:$0xff]  }
 0x190   :  { %3240 = vmatprep.subr.bf16.mxu0 %v4760_v37 }
 0x191   :  { %3280 = vmatpush1.bf16.msra.mxu1 %v4788_v16 }
 0x192   :  { %3281 = vmatprep.subr.bf16.mxu1 %v4796_v38  ;;  %v4834_v38 = vld [vmem:[%s6430_s3 + $0x8] sm:$0xff]  }
 0x193   :  { %3241 = vmatpush1.bf16.msra.mxu0 %v4758_v39 }
 0x194   :  { %3242 = vmatprep.subr.bf16.mxu0 %v4763_v40 }
 0x195   :  { %3282 = vmatpush1.bf16.msra.mxu1 %v4794_v41 }
 0x196   :  { %3283 = vmatprep.subr.bf16.mxu1 %v4802_v22 }
 0x197   :  { %3243 = vmatpush1.bf16.msra.mxu0 %v4761_v42 }
 0x198   :  { %3244 = vmatprep.subr.bf16.mxu0 %v4766_v43  ;;  %v4835_v43 = vld [vmem:[%s6430_s3 + $0x40] sm:$0xff]  }
 0x199   :  { %3284 = vmatpush1.bf16.msra.mxu1 %v4800_v44  ;;  %v4836_v44 = vld [vmem:[%s6430_s3] sm:$0xff]  }
 0x19a   :  { %3285 = vmatprep.subr.bf16.mxu1 %v4808_v45 }
 0x19b   :  { %3245 = vmatpush1.bf16.msra.mxu0 %v4764_v46  ;;  %v4838_v46 = vmov 0.0  }
 0x19c   :  { %3246 = vmatprep.subr.bf16.mxu0 %v4769_v47  ;;  %v3509_v47 = vld [vmem:[%s6431_s5 + $0x78] sm:$0xff] }
 0x19d   :  { %3286 = vmatpush1.bf16.msra.mxu1 %v4806_v49  ;;  %v3508_v49 = vld [vmem:[%s6431_s5 + $0x70] sm:$0xff] }
 0x19e   :  { %3287 = vmatprep.subr.bf16.mxu1 %v4814_v51  ;;  %v3507_v51 = vld [vmem:[%s6431_s5 + $0x68] sm:$0xff] }
 0x19f   :  { %3247 = vmatpush1.bf16.msra.mxu0 %v4767_v52  ;;  %v3506_v52 = vld [vmem:[%s6431_s5 + $0x60] sm:$0xff] }
 0x1a0   :  { %3248 = vmatprep.subr.bf16.mxu0 %v4775_v53  ;;  %v3505_v53 = vld [vmem:[%s6431_s5 + $0x58] sm:$0xff] }
 0x1a1   :  { %3288 = vmatpush1.bf16.msra.mxu1 %v4812_v56  ;;  %v3504_v56 = vld [vmem:[%s6431_s5 + $0x50] sm:$0xff] }
 0x1a2   :  { %4069 = vmatprep.subr.bf16.mxu1 %v4821_v5 }
 0x1a3   :  { %3249 = vmatpush2.bf16.msra.mxu0 %v4773_v57  ;;  %v3503_v57 = vld [vmem:[%s6431_s5 + $0x48] sm:$0xff] }
 0x1a4   :  { %3250 = vmatprep.subr.bf16.mxu0 %v4781_v29  ;;  %3306 = vmatmul.mubr.bf16.vlgmr.msra.gmra.mxu1 %v4818_v58  ;;  %v3502_v29 = vld [vmem:[%s6431_s5 + $0x40] sm:$0xff]  ;;  %v3501_v58 = vld [vmem:[%s6431_s5 + $0x38] sm:$0xff] }
 0x1a5   :  { %4070 = vmatpush3.bf16.msra.mxu1 %v4822_v23 }
 0x1a7   :  { %3251 = vmatpush2.bf16.msra.mxu0 %v4779_v59  ;;  %v3500_v59 = vld [vmem:[%s6431_s5 + $0x30] sm:$0xff] }
 0x1a8   :  { %3252 = vmatprep.subr.bf16.mxu0 %v4787_v60  ;;  %v3499_v60 = vld [vmem:[%s6431_s5 + $0x28] sm:$0xff] }
 0x1ab   :  { %3253 = vmatpush2.bf16.msra.mxu0 %v4785_v61 }
 0x1ac   :  { %3254 = vmatprep.subr.bf16.mxu0 %v4793_v62 }
 0x1af   :  { %3255 = vmatpush2.bf16.msra.mxu0 %v4791_v33 }
 0x1b0   :  { %3256 = vmatprep.subr.bf16.mxu0 %v4799_v63 }
 0x1b3   :  { %3257 = vmatpush2.bf16.msra.mxu0 %v4797_v0 }
 0x1b4   :  { %3258 = vmatprep.subr.bf16.mxu0 %v4805_v1 }
 0x1b7   :  { %3259 = vmatpush2.bf16.msra.mxu0 %v4803_v2 }
 0x1b8   :  { %3260 = vmatprep.subr.bf16.mxu0 %v4811_v3 }
 0x1bb   :  { %3261 = vmatpush2.bf16.msra.mxu0 %v4809_v48 }
 0x1bc   :  { %3262 = vmatprep.subr.bf16.mxu0 %v4817_v6 }
 0x1bf   :  { %3263 = vmatpush2.bf16.msra.mxu0 %v4815_v7 }
 0x1c0   :  { %4108 = vmatprep.subr.mxu0 %v4838_v46 }
 0x1c2   :  { %v3020_v9 = vpop.f32.mrf.mxu0  ;;  %3265 = vmatmul.mubr.bf16.vlgmr.msra.gmra.mxu0 %v3616_v54 }
 0x1c3   :  { %v3021_v10 = vadd.f32 %v3020_v9, %v6174_v24  ;;  %v4823_v24 = vld [vmem:[%s6430_s3 + $0x70] sm:$0xff]   ;;  %4109 = vmatpush3.msra.mxu0 %v3509_v47  ;;  %4140 = vmatprep.mubr.msk.f32.mxu0 %vm4839_vm0, %v4838_v46 }
 0x1c4   :  { %v3022_v11 = vpop.f32.mrf.mxu0  ;;  %v3061_v50 = vpop.f32.mrf.mxu1  ;;  %4071 = vmatprep.subr.bf16.mxu1 %v4823_v24  ;;  %4110 = vmatprep.subr.mxu0 %v4838_v46 }
 0x1c5   :  { %v3023_v12 = vadd.f32 %v3022_v11, %v6182_v28  ;;  %v3062_v13 = vadd.f32 %v3061_v50, %v3021_v10  ;;  %4072 = vmatpush3.bf16.msra.mxu1 %v4824_v4  ;;  %v4829_v28 = vld [vmem:[%s6430_s3 + $0x58] sm:$0xff]   ;;  %4111 = vmatpush3.msra.mxu0 %v3508_v49 }
 0x1c6   :  { %v3024_v14 = vpop.f32.mrf.mxu0  ;;  %v3063_v15 = vpop.f32.mrf.mxu1  ;;  %4073 = vmatprep.subr.bf16.mxu1 %v4825_v17  ;;  %4112 = vmatprep.subr.mxu0 %v4838_v46  ;;  %v3498_v17 = vld [vmem:[%s6431_s5 + $0x20] sm:$0xff] }
 0x1c7   :  { %v3064_v55 = vadd.f32 %v3063_v15, %v3023_v12  ;;  %4113 = vmatpush3.msra.mxu0 %v3507_v51 }
 0x1c8   :  { %v3025_v18 = vpop.f32.mrf.mxu0  ;;  %v3065_v19 = vpop.f32.mrf.mxu1  ;;  %4114 = vmatprep.subr.mxu0 %v4838_v46 }
 0x1c9   :  { %4074 = vmatpush3.bf16.msra.mxu1 %v4826_v25  ;;  %4115 = vmatpush3.msra.mxu0 %v3506_v52  ;;  %v3497_v25 = vld [vmem:[%s6431_s5 + $0x18] sm:$0xff] }
 0x1ca   :  { %v3066_v20 = vpop.f32.mrf.mxu1  ;;  %4075 = vmatprep.subr.bf16.mxu1 %v4827_v26  ;;  %4116 = vmatprep.subr.mxu0 %v4838_v46  ;;  %v3496_v26 = vld [vmem:[%s6431_s5 + $0x10] sm:$0xff] }
 0x1cb   :  { %4117 = vmatpush3.msra.mxu0 %v3505_v53 }
 0x1cc   :  { %4118 = vmatprep.subr.mxu0 %v4838_v46 }
 0x1cd   :  { %4076 = vmatpush3.bf16.msra.mxu1 %v4828_v27  ;;  %4119 = vmatpush3.msra.mxu0 %v3504_v56  ;;  %v3495_v27 = vld [vmem:[%s6431_s5 + $0x8] sm:$0xff] }
 0x1ce   :  { %4077 = vmatprep.subr.bf16.mxu1 %v4829_v28  ;;  %4120 = vmatprep.subr.mxu0 %v4838_v46  ;;  %v3494_v28 = vld [vmem:[%s6431_s5] sm:$0xff] }
 0x1cf   :  { %4121 = vmatpush3.msra.mxu0 %v3503_v57 }
 0x1d0   :  { %4122 = vmatprep.subr.mxu0 %v4838_v46 }
 0x1d1   :  { %4078 = vmatpush3.bf16.msra.mxu1 %v4830_v8  ;;  %4123 = vmatpush3.msra.mxu0 %v3502_v29 }
 0x1d2   :  { %4079 = vmatprep.subr.bf16.mxu1 %v4831_v21  ;;  %4124 = vmatprep.subr.mxu0 %v4838_v46  ;;  %v4051_v21 = vld [vmem:[%s6432_s4] ss:$0 sm:$0xff] }
 0x1d3   :  { %4125 = vmatpush3.msra.mxu0 %v3501_v58 }
 0x1d4   :  { %4126 = vmatprep.subr.mxu0 %v4838_v46 }
 0x1d5   :  { %4080 = vmatpush3.bf16.msra.mxu1 %v4832_v30  ;;  %4127 = vmatpush3.msra.mxu0 %v3500_v59 }
 0x1d6   :  { %4081 = vmatprep.subr.bf16.mxu1 %v4833_v36  ;;  %4128 = vmatprep.subr.mxu0 %v4838_v46 }
 0x1d7   :  { %4129 = vmatpush3.msra.mxu0 %v3499_v60 }
 0x1d8   :  { %4130 = vmatprep.subr.mxu0 %v4838_v46 }
 0x1d9   :  { %4082 = vmatpush3.bf16.msra.mxu1 %v4834_v38  ;;  %4131 = vmatpush3.msra.mxu0 %v3498_v17 }
 0x1da   :  { %4083 = vmatprep.subr.bf16.mxu1 %v4835_v43  ;;  %4132 = vmatprep.subr.mxu0 %v4838_v46 }
 0x1db   :  { %4133 = vmatpush3.msra.mxu0 %v3497_v25 }
 0x1dc   :  { %4134 = vmatprep.subr.mxu0 %v4838_v46 }
 0x1dd   :  { %4084 = vmatpush3.bf16.msra.mxu1 %v4836_v44  ;;  %4135 = vmatpush3.msra.mxu0 %v3496_v26 }
 0x1de   :  { %4136 = vmatprep.subr.mxu0 %v4838_v46 }
 0x1df   :  { %4137 = vmatpush3.msra.mxu0 %v3495_v27 }
 0x1e0   :  { %4138 = vmatprep.subr.mxu0 %v4838_v46 }
 0x1e1   :  { %4139 = vmatpush3.msra.mxu0 %v3494_v28 }
 0x202   :  { %v3102_v31 = vpop.f32.mrf.mxu0 }
 0x203   :  { %v3103_v32 = vadd.f32 %v3102_v31, %v3062_v13 }
 0x204   :  { %v3104_v34 = vpop.f32.mrf.mxu0  ;;  %v3143_v35 = vpop.f32.mrf.mxu1 }
 0x205   :  { %v3105_v37 = vadd.f32 %v3104_v34, %v3064_v55  ;;  %v3144_v16 = vadd.f32 %v3143_v35, %v3103_v32 }
 0x206   :  { %v3106_v39 = vpop.f32.mrf.mxu0  ;;  %v3145_v40 = vpop.f32.mrf.mxu1 }
 0x207   :  { %v3146_v41 = vadd.f32 %v3145_v40, %v3105_v37  ;;  %v4068_v37 = vld [vmem:[%s6433_s6] ss:$0 sm:$0xff] }
 0x208   :  { %v3107_v22 = vpop.f32.mrf.mxu0  ;;  %v3147_v42 = vpop.f32.mrf.mxu1 }
 0x20a   :  { %v3148_v45 = vpop.f32.mrf.mxu1 }
 0x242   :  { %v3184_v61 = vpop.f32.mrf.mxu0 }
 0x243   :  { %v3185_v9 = vadd.f32 %v3184_v61, %v3144_v16 }
 0x244   :  { %v3186_v62 = vpop.f32.mrf.mxu0  ;;  %v3225_v33 = vpop.f32.mrf.mxu1 }
 0x245   :  { %v3187_v10 = vadd.f32 %v3186_v62, %v3146_v41  ;;  %v3226_v11 = vadd.f32 %v3225_v33, %v3185_v9 }
 0x246   :  { %v3188_v63 = vpop.f32.mrf.mxu0  ;;  %v3227_v0 = vpop.f32.mrf.mxu1 }
 0x247   :  { %v3228_v12 = vadd.f32 %v3227_v0, %v3187_v10 }
 0x248   :  { %v3189_v1 = vpop.f32.mrf.mxu0  ;;  %v3229_v2 = vpop.f32.mrf.mxu1 }
 0x24a   :  { %v3230_v3 = vpop.f32.mrf.mxu1 }
 0x264   :  { %v3307_v48 = vpop.f32.mrf.mxu1 }
 0x266   :  { %v3309_v6 = vpop.f32.mrf.mxu1 }
 0x268   :  { %v3311_v7 = vpop.f32.mrf.mxu1 }
 0x26a   :  { %v3312_v54 = vpop.f32.mrf.mxu1 }
 0x282   :  { %v3266_v50 = vpop.f32.mrf.mxu0 }
 0x283   :  { %v3267_v13 = vadd.f32 %v3266_v50, %v3226_v11 }
 0x284   :  { %v3268_v14 = vpop.f32.mrf.mxu0 }
 0x285   :  { %v3308_v15 = vadd.f32 %v3307_v48, %v3267_v13  ;;  %v3269_v55 = vadd.f32 %v3268_v14, %v3228_v12 }
 0x286   :  { %v3270_v18 = vpop.f32.mrf.mxu0 }
 0x287   :  { %v3310_v19 = vadd.f32 %v3309_v6, %v3269_v55  ;;  %v3314_v20 = vmax.f32 %v3308_v15, 0.0 }
 0x288   :  { %v3271_v5 = vpop.f32.mrf.mxu0 }
 0x289   :  { %v3315_v23 = vmax.f32 %v3310_v19, 0.0  ;;  %v3316_v4 = vpack.c.bf16 %v3314_v20, %v3314_v20 }
 0x28b   :  { %v3317_v24 = vpack.c.bf16 %v3315_v23, %v3315_v23 }
 0x28d   :  { %3485 = vmatprep.mubr.bf16.mxu1 %v3317_v24 }
 0x28e   :  { %3486 = vmatmul.mubr.bf16.vlgmr.msra.gmra.mxu1 %v3316_v4 }
 0x34e   :  { %v4085_v8 = vpop.f32.mrf.mxu1 }
 0x350   :  { %v4086_v30 = vpop.f32.mrf.mxu1 }
 0x351   :  { %v4087_v31 = vadd.f32 %v4086_v30, %v4085_v8 }
 0x352   :  { %v4088_v32 = vpop.f32.mrf.mxu1 }
 0x353   :  { %v3488_v34 = vadd.f32 %v4087_v31, %v4051_v21 }
 0x354   :  { %v4089_v35 = vpop.f32.mrf.mxu1 }
 0x355   :  { %v3493_v36 = vmax.f32 %v3488_v34, 0.0 }
 0x357   :  { %4141 = vmatmul.mubr.f32.vlgmr.msra.gmra.mxu0 %v3493_v36 }
 0x417   :  { %v3583_v16 = vpop.f32.mrf.mxu0 }
 0x418   :  { %v3584_v38 = vadd.f32 %v4068_v37, %v3583_v16 }
 0x419   :  { %v4142_v39 = vpop.f32.mrf.mxu0 }
 0x41a   :  { %3587 = vst [vmem:[%s6434_s7] sm:$0xff] %v3584_v38 }

</bundles_post_ra>
